<compile_context>
chip_gen: v7x
topology: tpu7x:2x2x1
jax: 0.10.0
libtpu: 0.0.40
codegen_flags: <defaults>
</compile_context>

<pallas_src>
import functools
import math

import jax
import jax.numpy as jnp
import numpy as np
from jax.experimental import pallas as pl
from jax.experimental.pallas import tpu as pltpu

LANE = 128      # vreg lane width
SUBLANE = 8     # vreg sublane count


def _round_up(x, m):
    return ((x + m - 1) // m) * m


# ----------------------------------------------------------------------------
# Fused Pallas kernel: all GRU layers + MLP head in a single pallas_call.
# ----------------------------------------------------------------------------
def _make_gru_model_kernel(num_layers, seq_len, b_pad, h_pad):
    """Builds the fused kernel.

    Activation rows are ordered (t, b) with the batch padded to a full sublane
    group (b_pad) and the hidden size padded to a lane multiple (h_pad), so
    every per-step window is a whole-tile (b_pad, k*128) view.

      inputs : x2d (T*Bp, in_pad), h0 (L, Bp, Hp),
               per layer: w_ih_t (in_pad, 3*Hp), w_hh_t (Hp, 3*Hp),
                          b_i (1, 3*Hp)  [b_ih with b_hh folded for r,z gates],
                          b_hn (1, Hp),
               fc: w1_t (Hp, Fp), b1 (1, Fp), w2_t (Fp, Op), b2 (1, Op)
      outputs: fc_out (T*Bp, Op)  [Op lane-padded to 128 -> unmasked stores],
               state (L, Bp, Hp)  [aliased onto the h0 input buffer]
      scratch: gi (T*Bp, 3*Hp), act_a (T*Bp, Hp), act_b (T*Bp, Hp)
    """
    n_in = 2 + 4 * num_layers + 4
    unroll = True if seq_len <= 32 else 4

    def kernel(*refs):
        x_ref, h0_ref = refs[0], refs[1]
        layer_refs = [refs[2 + 4 * l: 6 + 4 * l] for l in range(num_layers)]
        w1_t_ref, b1_ref, w2_t_ref, b2_ref = refs[2 + 4 * num_layers: n_in]
        fc_out_ref, state_ref = refs[n_in], refs[n_in + 1]
        gi_ref, act_a, act_b = refs[n_in + 2: n_in + 5]

        cur_ref = x_ref                                     # current layer input ref
        for l in range(num_layers):
            w_ih_t_ref, w_hh_t_ref, b_i_ref, b_hn_ref = layer_refs[l]

            # Hoisted input projection: ONE MXU matmul over the whole sequence,
            # with b_ih (and the r/z part of b_hh) already folded into b_i.
            # TODO(synk): chunk this projection over row slabs (pl.loop /
            #             emit_pipeline) at production T to bound live vregs.
            gi_ref[...] = (
                jnp.dot(cur_ref[...], w_ih_t_ref[...],
                        preferred_element_type=jnp.float32) + b_i_ref[...])

            w_hh_t = w_hh_t_ref[...]                        # (Hp, 3*Hp)
            b_hn = jnp.broadcast_to(b_hn_ref[...], (b_pad, h_pad))   # hoisted
            out_act = (act_a, act_b)[l % 2]                 # ping-pong buffer

            def step(t, h):
                row0 = pl.multiple_of(t * b_pad, b_pad)     # 8-aligned sublane base
                rows = pl.ds(row0, b_pad)
                gi = gi_ref[rows, :]                        # (Bp, 3*Hp) aligned slab
                # Only matmul left on the serial dependency chain.
                gh = jnp.dot(h, w_hh_t, preferred_element_type=jnp.float32)
                # Fused r/z: one sigmoid over the contiguous 2*Hp-lane slab.
                rz = jax.nn.sigmoid(gi[:, :2 * h_pad] + gh[:, :2 * h_pad])
                r = rz[:, :h_pad]
                z = rz[:, h_pad:]
                n = jnp.tanh(gi[:, 2 * h_pad:] + r * (gh[:, 2 * h_pad:] + b_hn))
                h_new = (1.0 - z) * n + z * h
                out_act[rows, :] = h_new
                return h_new

            h_last = jax.lax.fori_loop(0, seq_len, step, h0_ref[l], unroll=unroll)
            state_ref[l] = h_last                           # aliased with h0 (safe:
            cur_ref = out_act                               # h0[l] already consumed)

        # MLP head: Linear -> ReLU -> Linear on the flattened GRU output.
        # All lane dims (Hp, Fp, Op) are multiples of 128 -> unmasked ld/st.
        h1 = jnp.dot(cur_ref[...], w1_t_ref[...],
                     preferred_element_type=jnp.float32) + b1_ref[...]
        h1 = jnp.maximum(h1, 0.0)
        fc_out_ref[...] = jnp.dot(h1, w2_t_ref[...],
                                  preferred_element_type=jnp.float32) + b2_ref[...]

    return kernel


# ----------------------------------------------------------------------------
# Forward wrapper (glue only: pad / transpose / flatten / un-pad).
# ----------------------------------------------------------------------------
@functools.partial(jax.jit, static_argnames=("hidden_size",))
def gru_model_forward(x, prev_state, layer_params, fc_params, *, hidden_size):
    """Equivalent of GRUModel.forward (batch_first).

    x           : (B, T, input_size)
    prev_state  : (num_layers, B, hidden_size)
    layer_params: per-layer (w_ih_t, w_hh_t, b_i, b_hn) from prepare_params
    fc_params   : (w1_t, b1, w2_t, b2) from prepare_params (lane-padded)
    returns     : (fcl_out (B*T, input_size), state (num_layers, B, hidden_size))
    """
    B, T, in_dim = x.shape
    L = len(layer_params)
    H = hidden_size
    Hp = _round_up(H, LANE)
    Bp = _round_up(B, SUBLANE)
    in_pad = layer_params[0][0].shape[0]        # lane-padded input feature dim
    Fp = fc_params[0].shape[-1]                 # lane-padded fc hidden dim
    Op = fc_params[2].shape[-1]                 # lane-padded output dim
    out_dim = in_dim                            # module maps back to input_size

    # Time-major, batch padded to a full sublane group, features lane-padded,
    # flattened to 2-D (t, b) rows.
    # TODO(synk): fold this transpose/pad (and the inverse on fc_out) into
    #             BlockSpec index_maps once a T-chunked grid exists.
    x_tb = jnp.pad(jnp.transpose(x, (1, 0, 2)).astype(jnp.float32),
                   ((0, 0), (0, Bp - B), (0, in_pad - in_dim)))
    x2d = x_tb.reshape(T * Bp, in_pad)
    h0 = jnp.pad(prev_state.astype(jnp.float32),
                 ((0, 0), (0, Bp - B), (0, Hp - H)))

    flat_args = [x2d, h0]
    for lp in layer_params:
        flat_args.extend(lp)
    flat_args.extend(fc_params)

    # Advisory cost estimate for XLA's scheduler.
    flops = 2 * T * Bp * in_pad * 3 * Hp                    # layer-0 projection
    flops += 2 * (L - 1) * T * Bp * Hp * 3 * Hp             # deeper projections
    flops += 2 * L * T * Bp * Hp * 3 * Hp                   # recurrent matmuls
    flops += 2 * T * Bp * Hp * Fp + 2 * T * Bp * Fp * Op    # FC head
    transcendentals = L * T * Bp * 3 * Hp                   # sigmoid(2Hp)+tanh(Hp)/step
    arg_bytes = sum(int(np.prod(a.shape)) * 4 for a in flat_args)
    out_bytes = (T * Bp * Op + L * Bp * Hp) * 4
    scratch_bytes = (T * Bp * 3 * Hp + 2 * T * Bp * Hp) * 4
    # Size the scoped-VMEM limit to actual usage (with headroom), capped at the
    # smallest physical VMEM across generations (v7x: 64 MiB per TC).
    vmem_limit = int(min(64 * 1024 * 1024,
                         max(2 * (arg_bytes + out_bytes + scratch_bytes),
                             16 * 1024 * 1024)))

    kernel = _make_gru_model_kernel(L, T, Bp, Hp)
    fc2d, state_pad = pl.pallas_call(
        kernel,
        out_shape=(
            jax.ShapeDtypeStruct((T * Bp, Op), jnp.float32),
            jax.ShapeDtypeStruct((L, Bp, Hp), jnp.float32),
        ),
        scratch_shapes=[
            pltpu.VMEM((T * Bp, 3 * Hp), jnp.float32),   # hoisted input projection
            pltpu.VMEM((T * Bp, Hp), jnp.float32),       # inter-layer act (ping)
            pltpu.VMEM((T * Bp, Hp), jnp.float32),       # inter-layer act (pong)
        ],
        input_output_aliases={1: 1},                     # h0 buffer -> state output
        compiler_params=pltpu.CompilerParams(vmem_limit_bytes=vmem_limit),
        cost_estimate=pl.CostEstimate(flops=flops,
                                      transcendentals=transcendentals,
                                      bytes_accessed=arg_bytes + out_bytes),
    )(*flat_args)

    # Undo padding; reorder rows from (t, b) to PyTorch's (b, t) ordering.
    fcl_out = (fc2d.reshape(T, Bp, Op)[:, :B, :out_dim]
               .transpose(1, 0, 2).reshape(B * T, out_dim))
    state = state_pad[:, :B, :H]
    return fcl_out, state


# ----------------------------------------------------------------------------
# One-time parameter preparation: transpose, lane padding, bias folding.
# ----------------------------------------------------------------------------
def prepare_params(params, hidden_size):
    H = hidden_size
    Hp = _round_up(H, LANE)
    layers = []
    for l, p in enumerate(params["gru"]):
        w_ih = np.asarray(p["w_ih"], np.float32)   # (3H, in_dim), gates r|z|n
        w_hh = np.asarray(p["w_hh"], np.float32)   # (3H, H)
        b_ih = np.asarray(p["b_ih"], np.float32)
        b_hh = np.asarray(p["b_hh"], np.float32)
        in_dim = w_ih.shape[1]
        # Layer 0 consumes lane-padded input features; deeper layers consume
        # the lane-padded hidden state. Padded weight rows/cols are zero so
        # padded lanes never contribute (keep this invariant).
        in_pad = _round_up(in_dim, LANE) if l == 0 else Hp
        w_ih_t = np.zeros((in_pad, 3 * Hp), np.float32)
        w_hh_t = np.zeros((Hp, 3 * Hp), np.float32)
        b_i = np.zeros((1, 3 * Hp), np.float32)
        b_hn = np.zeros((1, Hp), np.float32)
        for g in range(3):                         # gate order r, z, n
            w_ih_t[:in_dim, g * Hp:g * Hp + H] = w_ih[g * H:(g + 1) * H, :].T
            w_hh_t[:H, g * Hp:g * Hp + H] = w_hh[g * H:(g + 1) * H, :].T
            b = b_ih[g * H:(g + 1) * H]
            if g < 2:                              # fold b_hh for r and z gates
                b = b + b_hh[g * H:(g + 1) * H]
            b_i[0, g * Hp:g * Hp + H] = b
        b_hn[0, :H] = b_hh[2 * H:3 * H]
        layers.append(tuple(jnp.asarray(a) for a in (w_ih_t, w_hh_t, b_i, b_hn)))

    # FC head: pad both the hidden (F) and output (O) lane dims to 128 so the
    # kernel's intermediate and output stores are lane-dense (no vst.msk).
    fc = params["fc"]
    w1 = np.asarray(fc["w1"], np.float32)          # (F, H)
    w2 = np.asarray(fc["w2"], np.float32)          # (O, F)
    F, O = w1.shape[0], w2.shape[0]
    Fp, Op = _round_up(F, LANE), _round_up(O, LANE)
    w1_t = np.zeros((Hp, Fp), np.float32)
    w1_t[:H, :F] = w1.T
    b1 = np.zeros((1, Fp), np.float32)
    b1[0, :F] = np.asarray(fc["b1"], np.float32)
    w2_t = np.zeros((Fp, Op), np.float32)
    w2_t[:F, :O] = w2.T
    b2 = np.zeros((1, Op), np.float32)
    b2[0, :O] = np.asarray(fc["b2"], np.float32)
    fc_prep = tuple(jnp.asarray(a) for a in (w1_t, b1, w2_t, b2))
    return tuple(layers), fc_prep


# ----------------------------------------------------------------------------
# Deterministic parameter init (matches nn.GRU / nn.Linear shapes & init style)
# ----------------------------------------------------------------------------
def init_params(key, input_size, hidden_size, gru_layers, fc_hidden_dim):
    params = {"gru": [], "fc": {}}
    bound_gru = 1.0 / math.sqrt(hidden_size)
    for l in range(gru_layers):
        in_dim = input_size if l == 0 else hidden_size
        key, k1, k2, k3, k4 = jax.random.split(key, 5)
        params["gru"].append(
            dict(
                w_ih=jax.random.uniform(k1, (3 * hidden_size, in_dim),
                                        jnp.float32, -bound_gru, bound_gru),
                w_hh=jax.random.uniform(k2, (3 * hidden_size, hidden_size),
                                        jnp.float32, -bound_gru, bound_gru),
                b_ih=jax.random.uniform(k3, (3 * hidden_size,),
                                        jnp.float32, -bound_gru, bound_gru),
                b_hh=jax.random.uniform(k4, (3 * hidden_size,),
                                        jnp.float32, -bound_gru, bound_gru),
            )
        )
    key, k1, k2, k3, k4 = jax.random.split(key, 5)
    b1 = 1.0 / math.sqrt(hidden_size)
    b2 = 1.0 / math.sqrt(fc_hidden_dim)
    params["fc"] = dict(
        w1=jax.random.uniform(k1, (fc_hidden_dim, hidden_size), jnp.float32, -b1, b1),
        b1=jax.random.uniform(k2, (fc_hidden_dim,), jnp.float32, -b1, b1),
        w2=jax.random.uniform(k3, (input_size, fc_hidden_dim), jnp.float32, -b2, b2),
        b2=jax.random.uniform(k4, (input_size,), jnp.float32, -b2, b2),
    )
    return params


# ----------------------------------------------------------------------------
# Pure-numpy reference (mirrors torch.nn.GRU + the MLP head) for validation.
# ----------------------------------------------------------------------------
def reference_forward(x, prev_state, params):
    xb = np.asarray(x, np.float32)
    hs = np.asarray(prev_state, np.float32)
    B, T, _ = xb.shape
    H = hs.shape[-1]

    def sigmoid(v):
        return 1.0 / (1.0 + np.exp(-v))

    layer_in = xb
    finals = []
    for l, p in enumerate(params["gru"]):
        w_ih = np.asarray(p["w_ih"]); w_hh = np.asarray(p["w_hh"])
        b_ih = np.asarray(p["b_ih"]); b_hh = np.asarray(p["b_hh"])
        h = hs[l]
        outs = np.zeros((B, T, H), np.float32)
        for t in range(T):
            gi = layer_in[:, t, :] @ w_ih.T + b_ih
            gh = h @ w_hh.T + b_hh
            r = sigmoid(gi[:, :H] + gh[:, :H])
            z = sigmoid(gi[:, H:2 * H] + gh[:, H:2 * H])
            n = np.tanh(gi[:, 2 * H:] + r * gh[:, 2 * H:])
            h = (1.0 - z) * n + z * h
            outs[:, t, :] = h
        finals.append(h)
        layer_in = outs
    state = np.stack(finals, axis=0)
    flat = layer_in.reshape(-1, H)
    fc = params["fc"]
    h1 = np.maximum(flat @ np.asarray(fc["w1"]).T + np.asarray(fc["b1"]), 0.0)
    out = h1 @ np.asarray(fc["w2"]).T + np.asarray(fc["b2"])
    return out, state


if __name__ == "__main__":
    batch = 2
    seq = 8
    input_size = 16
    hidden_size = 32
    gru_layers = 2
    fc_hidden_dim = 64

    key = jax.random.PRNGKey(0)
    key, kx = jax.random.split(key)
    params = init_params(key, input_size, hidden_size, gru_layers, fc_hidden_dim)
    layer_params, fc_params = prepare_params(params, hidden_size)

    x = jax.random.normal(kx, (batch, seq, input_size), dtype=jnp.float32)
    # init_hidden(batch): zeros (num_layers, B, H)
    prev_state = jnp.zeros((gru_layers, batch, hidden_size), dtype=jnp.float32)

    fcl_out, state = gru_model_forward(x, prev_state, layer_params, fc_params,
                                       hidden_size=hidden_size)
    jax.block_until_ready((fcl_out, state))

    assert fcl_out.shape == (batch * seq, input_size)
    assert state.shape == (gru_layers, batch, hidden_size)

    ref_out, ref_state = reference_forward(x, prev_state, params)
    np.testing.assert_allclose(np.asarray(fcl_out), ref_out, rtol=2e-3, atol=2e-3)
    np.testing.assert_allclose(np.asarray(state), ref_state, rtol=2e-3, atol=2e-3)
    print("KERNEL_OK")
</pallas_src>

<mosaic_0001>
module attributes {stable_mosaic.version = 11 : i64} {
  func.func @kernel(%arg0: memref<64x128xf32, #tpu.memory_space<vmem>>, %arg1: memref<2x8x128xf32, #tpu.memory_space<vmem>>, %arg2: memref<128x384xf32, #tpu.memory_space<vmem>>, %arg3: memref<128x384xf32, #tpu.memory_space<vmem>>, %arg4: memref<1x384xf32, #tpu.memory_space<vmem>>, %arg5: memref<1x128xf32, #tpu.memory_space<vmem>>, %arg6: memref<128x384xf32, #tpu.memory_space<vmem>>, %arg7: memref<128x384xf32, #tpu.memory_space<vmem>>, %arg8: memref<1x384xf32, #tpu.memory_space<vmem>>, %arg9: memref<1x128xf32, #tpu.memory_space<vmem>>, %arg10: memref<128x128xf32, #tpu.memory_space<vmem>>, %arg11: memref<1x128xf32, #tpu.memory_space<vmem>>, %arg12: memref<128x128xf32, #tpu.memory_space<vmem>>, %arg13: memref<1x128xf32, #tpu.memory_space<vmem>>, %arg14: memref<64x128xf32, #tpu.memory_space<vmem>>, %arg15: memref<2x8x128xf32, #tpu.memory_space<vmem>>, %arg16: memref<64x384xf32, #tpu.memory_space<vmem>>, %arg17: memref<64x128xf32, #tpu.memory_space<vmem>>, %arg18: memref<64x128xf32, #tpu.memory_space<vmem>>) attributes {dimension_semantics = [], scalar_prefetch = 0 : i64, scratch_operands = 3 : i64, tpu.core_type = #tpu.core_type<tc>} {
    %c0 = arith.constant 0 : index
    %c0_0 = arith.constant 0 : index
    %0 = vector.load %arg0[%c0, %c0_0] : memref<64x128xf32, #tpu.memory_space<vmem>>, vector<64x128xf32>
    %c0_1 = arith.constant 0 : index
    %c0_2 = arith.constant 0 : index
    %1 = vector.load %arg2[%c0_1, %c0_2] : memref<128x384xf32, #tpu.memory_space<vmem>>, vector<128x384xf32>
    %cst = arith.constant dense<0.000000e+00> : vector<64x384xf32>
    %2 = tpu.matmul %0, %1, %cst {dimension_numbers = #tpu.dot_dimension_numbers<[1], [0], [0], [1], [0, 0, 1, 1], [], []>} : vector<64x128xf32>, vector<128x384xf32>, vector<64x384xf32> -> vector<64x384xf32>
    %c0_3 = arith.constant 0 : index
    %c0_4 = arith.constant 0 : index
    %3 = vector.load %arg4[%c0_3, %c0_4] : memref<1x384xf32, #tpu.memory_space<vmem>>, vector<1x384xf32>
    %4 = vector.broadcast %3 : vector<1x384xf32> to vector<64x384xf32>
    %5 = arith.addf %2, %4 : vector<64x384xf32>
    %c0_5 = arith.constant 0 : index
    %c0_6 = arith.constant 0 : index
    %6 = vector.load %arg16[%c0_5, %c0_6] : memref<64x384xf32, #tpu.memory_space<vmem>>, vector<64x384xf32>
    tpu.vector_store %arg16[%c0_5, %c0_6], %5 {strides = array<i32>} : memref<64x384xf32, #tpu.memory_space<vmem>>, vector<64x384xf32>,
    %c0_7 = arith.constant 0 : index
    %c0_8 = arith.constant 0 : index
    %7 = vector.load %arg3[%c0_7, %c0_8] : memref<128x384xf32, #tpu.memory_space<vmem>>, vector<128x384xf32>
    %c0_9 = arith.constant 0 : index
    %c0_10 = arith.constant 0 : index
    %8 = vector.load %arg5[%c0_9, %c0_10] : memref<1x128xf32, #tpu.memory_space<vmem>>, vector<1x128xf32>
    %9 = vector.shape_cast %8 : vector<1x128xf32> to vector<1x128xf32>
    %10 = vector.broadcast %9 : vector<1x128xf32> to vector<8x128xf32>
    %c0_11 = arith.constant 0 : index
    %c0_12 = arith.constant 0 : index
    %c0_13 = arith.constant 0 : index
    %11 = vector.load %arg1[%c0_11, %c0_12, %c0_13] : memref<2x8x128xf32, #tpu.memory_space<vmem>>, vector<1x8x128xf32>
    %12 = vector.shape_cast %11 : vector<1x8x128xf32> to vector<8x128xf32>
    %c0_i32 = arith.constant 0 : i32
    %c8_i32 = arith.constant 8 : i32
    %13 = arith.muli %c0_i32, %c8_i32 : i32
    %14 = tpu.assume_multiple %13, 8 : i32
    %15 = arith.index_cast %14 : i32 to index
    %c0_14 = arith.constant 0 : index
    %16 = vector.load %arg16[%15, %c0_14] : memref<64x384xf32, #tpu.memory_space<vmem>>, vector<8x384xf32>
    %cst_15 = arith.constant dense<0.000000e+00> : vector<8x384xf32>
    %17 = tpu.matmul %12, %7, %cst_15 {dimension_numbers = #tpu.dot_dimension_numbers<[1], [0], [0], [1], [0, 0, 1, 1], [], []>} : vector<8x128xf32>, vector<128x384xf32>, vector<8x384xf32> -> vector<8x384xf32>
    %18 = vector.extract_strided_slice %16 {offsets = [0, 0], sizes = [8, 256], strides = [1, 1]} : vector<8x384xf32> to vector<8x256xf32>
    %19 = vector.extract_strided_slice %17 {offsets = [0, 0], sizes = [8, 256], strides = [1, 1]} : vector<8x384xf32> to vector<8x256xf32>
    %20 = arith.addf %18, %19 : vector<8x256xf32>
    %21 = arith.negf %20 : vector<8x256xf32>
    %22 = math.exp %21 : vector<8x256xf32>
    %cst_16 = arith.constant 1.000000e+00 : f32
    %23 = vector.broadcast %cst_16 : f32 to vector<8x256xf32>
    %24 = arith.addf %23, %22 : vector<8x256xf32>
    %25 = arith.divf %23, %24 : vector<8x256xf32>
    %26 = vector.extract_strided_slice %25 {offsets = [0, 0], sizes = [8, 128], strides = [1, 1]} : vector<8x256xf32> to vector<8x128xf32>
    %27 = vector.extract_strided_slice %25 {offsets = [0, 128], sizes = [8, 128], strides = [1, 1]} : vector<8x256xf32> to vector<8x128xf32>
    %28 = vector.extract_strided_slice %16 {offsets = [0, 256], sizes = [8, 128], strides = [1, 1]} : vector<8x384xf32> to vector<8x128xf32>
    %29 = vector.extract_strided_slice %17 {offsets = [0, 256], sizes = [8, 128], strides = [1, 1]} : vector<8x384xf32> to vector<8x128xf32>
    %30 = arith.addf %29, %10 : vector<8x128xf32>
    %31 = arith.mulf %26, %30 : vector<8x128xf32>
    %32 = arith.addf %28, %31 : vector<8x128xf32>
    %33 = math.tanh %32 : vector<8x128xf32>
    %cst_17 = arith.constant 1.000000e+00 : f32
    %34 = vector.broadcast %cst_17 : f32 to vector<8x128xf32>
    %35 = arith.subf %34, %27 : vector<8x128xf32>
    %36 = arith.mulf %35, %33 : vector<8x128xf32>
    %37 = arith.mulf %27, %12 : vector<8x128xf32>
    %38 = arith.addf %36, %37 : vector<8x128xf32>
    %39 = arith.index_cast %14 : i32 to index
    %c0_18 = arith.constant 0 : index
    %40 = vector.load %arg17[%39, %c0_18] : memref<64x128xf32, #tpu.memory_space<vmem>>, vector<8x128xf32>
    tpu.vector_store %arg17[%39, %c0_18], %38 {strides = array<i32>} : memref<64x128xf32, #tpu.memory_space<vmem>>, vector<8x128xf32>,
    %c1_i32 = arith.constant 1 : i32
    %c8_i32_19 = arith.constant 8 : i32
    %41 = arith.muli %c1_i32, %c8_i32_19 : i32
    %42 = tpu.assume_multiple %41, 8 : i32
    %43 = arith.index_cast %42 : i32 to index
    %c0_20 = arith.constant 0 : index
    %44 = vector.load %arg16[%43, %c0_20] : memref<64x384xf32, #tpu.memory_space<vmem>>, vector<8x384xf32>
    %cst_21 = arith.constant dense<0.000000e+00> : vector<8x384xf32>
    %45 = tpu.matmul %38, %7, %cst_21 {dimension_numbers = #tpu.dot_dimension_numbers<[1], [0], [0], [1], [0, 0, 1, 1], [], []>} : vector<8x128xf32>, vector<128x384xf32>, vector<8x384xf32> -> vector<8x384xf32>
    %46 = vector.extract_strided_slice %44 {offsets = [0, 0], sizes = [8, 256], strides = [1, 1]} : vector<8x384xf32> to vector<8x256xf32>
    %47 = vector.extract_strided_slice %45 {offsets = [0, 0], sizes = [8, 256], strides = [1, 1]} : vector<8x384xf32> to vector<8x256xf32>
    %48 = arith.addf %46, %47 : vector<8x256xf32>
    %49 = arith.negf %48 : vector<8x256xf32>
    %50 = math.exp %49 : vector<8x256xf32>
    %cst_22 = arith.constant 1.000000e+00 : f32
    %51 = vector.broadcast %cst_22 : f32 to vector<8x256xf32>
    %52 = arith.addf %51, %50 : vector<8x256xf32>
    %53 = arith.divf %51, %52 : vector<8x256xf32>
    %54 = vector.extract_strided_slice %53 {offsets = [0, 0], sizes = [8, 128], strides = [1, 1]} : vector<8x256xf32> to vector<8x128xf32>
    %55 = vector.extract_strided_slice %53 {offsets = [0, 128], sizes = [8, 128], strides = [1, 1]} : vector<8x256xf32> to vector<8x128xf32>
    %56 = vector.extract_strided_slice %44 {offsets = [0, 256], sizes = [8, 128], strides = [1, 1]} : vector<8x384xf32> to vector<8x128xf32>
    %57 = vector.extract_strided_slice %45 {offsets = [0, 256], sizes = [8, 128], strides = [1, 1]} : vector<8x384xf32> to vector<8x128xf32>
    %58 = arith.addf %57, %10 : vector<8x128xf32>
    %59 = arith.mulf %54, %58 : vector<8x128xf32>
    %60 = arith.addf %56, %59 : vector<8x128xf32>
    %61 = math.tanh %60 : vector<8x128xf32>
    %cst_23 = arith.constant 1.000000e+00 : f32
    %62 = vector.broadcast %cst_23 : f32 to vector<8x128xf32>
    %63 = arith.subf %62, %55 : vector<8x128xf32>
    %64 = arith.mulf %63, %61 : vector<8x128xf32>
    %65 = arith.mulf %55, %38 : vector<8x128xf32>
    %66 = arith.addf %64, %65 : vector<8x128xf32>
    %67 = arith.index_cast %42 : i32 to index
    %c0_24 = arith.constant 0 : index
    %68 = vector.load %arg17[%67, %c0_24] : memref<64x128xf32, #tpu.memory_space<vmem>>, vector<8x128xf32>
    tpu.vector_store %arg17[%67, %c0_24], %66 {strides = array<i32>} : memref<64x128xf32, #tpu.memory_space<vmem>>, vector<8x128xf32>,
    %c2_i32 = arith.constant 2 : i32
    %c8_i32_25 = arith.constant 8 : i32
    %69 = arith.muli %c2_i32, %c8_i32_25 : i32
    %70 = tpu.assume_multiple %69, 8 : i32
    %71 = arith.index_cast %70 : i32 to index
    %c0_26 = arith.constant 0 : index
    %72 = vector.load %arg16[%71, %c0_26] : memref<64x384xf32, #tpu.memory_space<vmem>>, vector<8x384xf32>
    %cst_27 = arith.constant dense<0.000000e+00> : vector<8x384xf32>
    %73 = tpu.matmul %66, %7, %cst_27 {dimension_numbers = #tpu.dot_dimension_numbers<[1], [0], [0], [1], [0, 0, 1, 1], [], []>} : vector<8x128xf32>, vector<128x384xf32>, vector<8x384xf32> -> vector<8x384xf32>
    %74 = vector.extract_strided_slice %72 {offsets = [0, 0], sizes = [8, 256], strides = [1, 1]} : vector<8x384xf32> to vector<8x256xf32>
    %75 = vector.extract_strided_slice %73 {offsets = [0, 0], sizes = [8, 256], strides = [1, 1]} : vector<8x384xf32> to vector<8x256xf32>
    %76 = arith.addf %74, %75 : vector<8x256xf32>
    %77 = arith.negf %76 : vector<8x256xf32>
    %78 = math.exp %77 : vector<8x256xf32>
    %cst_28 = arith.constant 1.000000e+00 : f32
    %79 = vector.broadcast %cst_28 : f32 to vector<8x256xf32>
    %80 = arith.addf %79, %78 : vector<8x256xf32>
    %81 = arith.divf %79, %80 : vector<8x256xf32>
    %82 = vector.extract_strided_slice %81 {offsets = [0, 0], sizes = [8, 128], strides = [1, 1]} : vector<8x256xf32> to vector<8x128xf32>
    %83 = vector.extract_strided_slice %81 {offsets = [0, 128], sizes = [8, 128], strides = [1, 1]} : vector<8x256xf32> to vector<8x128xf32>
    %84 = vector.extract_strided_slice %72 {offsets = [0, 256], sizes = [8, 128], strides = [1, 1]} : vector<8x384xf32> to vector<8x128xf32>
    %85 = vector.extract_strided_slice %73 {offsets = [0, 256], sizes = [8, 128], strides = [1, 1]} : vector<8x384xf32> to vector<8x128xf32>
    %86 = arith.addf %85, %10 : vector<8x128xf32>
    %87 = arith.mulf %82, %86 : vector<8x128xf32>
    %88 = arith.addf %84, %87 : vector<8x128xf32>
    %89 = math.tanh %88 : vector<8x128xf32>
    %cst_29 = arith.constant 1.000000e+00 : f32
    %90 = vector.broadcast %cst_29 : f32 to vector<8x128xf32>
    %91 = arith.subf %90, %83 : vector<8x128xf32>
    %92 = arith.mulf %91, %89 : vector<8x128xf32>
    %93 = arith.mulf %83, %66 : vector<8x128xf32>
    %94 = arith.addf %92, %93 : vector<8x128xf32>
    %95 = arith.index_cast %70 : i32 to index
    %c0_30 = arith.constant 0 : index
    %96 = vector.load %arg17[%95, %c0_30] : memref<64x128xf32, #tpu.memory_space<vmem>>, vector<8x128xf32>
    tpu.vector_store %arg17[%95, %c0_30], %94 {strides = array<i32>} : memref<64x128xf32, #tpu.memory_space<vmem>>, vector<8x128xf32>,
    %c3_i32 = arith.constant 3 : i32
    %c8_i32_31 = arith.constant 8 : i32
    %97 = arith.muli %c3_i32, %c8_i32_31 : i32
    %98 = tpu.assume_multiple %97, 8 : i32
    %99 = arith.index_cast %98 : i32 to index
    %c0_32 = arith.constant 0 : index
    %100 = vector.load %arg16[%99, %c0_32] : memref<64x384xf32, #tpu.memory_space<vmem>>, vector<8x384xf32>
    %cst_33 = arith.constant dense<0.000000e+00> : vector<8x384xf32>
    %101 = tpu.matmul %94, %7, %cst_33 {dimension_numbers = #tpu.dot_dimension_numbers<[1], [0], [0], [1], [0, 0, 1, 1], [], []>} : vector<8x128xf32>, vector<128x384xf32>, vector<8x384xf32> -> vector<8x384xf32>
    %102 = vector.extract_strided_slice %100 {offsets = [0, 0], sizes = [8, 256], strides = [1, 1]} : vector<8x384xf32> to vector<8x256xf32>
    %103 = vector.extract_strided_slice %101 {offsets = [0, 0], sizes = [8, 256], strides = [1, 1]} : vector<8x384xf32> to vector<8x256xf32>
    %104 = arith.addf %102, %103 : vector<8x256xf32>
    %105 = arith.negf %104 : vector<8x256xf32>
    %106 = math.exp %105 : vector<8x256xf32>
    %cst_34 = arith.constant 1.000000e+00 : f32
    %107 = vector.broadcast %cst_34 : f32 to vector<8x256xf32>
    %108 = arith.addf %107, %106 : vector<8x256xf32>
    %109 = arith.divf %107, %108 : vector<8x256xf32>
    %110 = vector.extract_strided_slice %109 {offsets = [0, 0], sizes = [8, 128], strides = [1, 1]} : vector<8x256xf32> to vector<8x128xf32>
    %111 = vector.extract_strided_slice %109 {offsets = [0, 128], sizes = [8, 128], strides = [1, 1]} : vector<8x256xf32> to vector<8x128xf32>
    %112 = vector.extract_strided_slice %100 {offsets = [0, 256], sizes = [8, 128], strides = [1, 1]} : vector<8x384xf32> to vector<8x128xf32>
    %113 = vector.extract_strided_slice %101 {offsets = [0, 256], sizes = [8, 128], strides = [1, 1]} : vector<8x384xf32> to vector<8x128xf32>
    %114 = arith.addf %113, %10 : vector<8x128xf32>
    %115 = arith.mulf %110, %114 : vector<8x128xf32>
    %116 = arith.addf %112, %115 : vector<8x128xf32>
    %117 = math.tanh %116 : vector<8x128xf32>
    %cst_35 = arith.constant 1.000000e+00 : f32
    %118 = vector.broadcast %cst_35 : f32 to vector<8x128xf32>
    %119 = arith.subf %118, %111 : vector<8x128xf32>
    %120 = arith.mulf %119, %117 : vector<8x128xf32>
    %121 = arith.mulf %111, %94 : vector<8x128xf32>
    %122 = arith.addf %120, %121 : vector<8x128xf32>
    %123 = arith.index_cast %98 : i32 to index
    %c0_36 = arith.constant 0 : index
    %124 = vector.load %arg17[%123, %c0_36] : memref<64x128xf32, #tpu.memory_space<vmem>>, vector<8x128xf32>
    tpu.vector_store %arg17[%123, %c0_36], %122 {strides = array<i32>} : memref<64x128xf32, #tpu.memory_space<vmem>>, vector<8x128xf32>,
    %c4_i32 = arith.constant 4 : i32
    %c8_i32_37 = arith.constant 8 : i32
    %125 = arith.muli %c4_i32, %c8_i32_37 : i32
    %126 = tpu.assume_multiple %125, 8 : i32
    %127 = arith.index_cast %126 : i32 to index
    %c0_38 = arith.constant 0 : index
    %128 = vector.load %arg16[%127, %c0_38] : memref<64x384xf32, #tpu.memory_space<vmem>>, vector<8x384xf32>
    %cst_39 = arith.constant dense<0.000000e+00> : vector<8x384xf32>
    %129 = tpu.matmul %122, %7, %cst_39 {dimension_numbers = #tpu.dot_dimension_numbers<[1], [0], [0], [1], [0, 0, 1, 1], [], []>} : vector<8x128xf32>, vector<128x384xf32>, vector<8x384xf32> -> vector<8x384xf32>
    %130 = vector.extract_strided_slice %128 {offsets = [0, 0], sizes = [8, 256], strides = [1, 1]} : vector<8x384xf32> to vector<8x256xf32>
    %131 = vector.extract_strided_slice %129 {offsets = [0, 0], sizes = [8, 256], strides = [1, 1]} : vector<8x384xf32> to vector<8x256xf32>
    %132 = arith.addf %130, %131 : vector<8x256xf32>
    %133 = arith.negf %132 : vector<8x256xf32>
    %134 = math.exp %133 : vector<8x256xf32>
    %cst_40 = arith.constant 1.000000e+00 : f32
    %135 = vector.broadcast %cst_40 : f32 to vector<8x256xf32>
    %136 = arith.addf %135, %134 : vector<8x256xf32>
    %137 = arith.divf %135, %136 : vector<8x256xf32>
    %138 = vector.extract_strided_slice %137 {offsets = [0, 0], sizes = [8, 128], strides = [1, 1]} : vector<8x256xf32> to vector<8x128xf32>
    %139 = vector.extract_strided_slice %137 {offsets = [0, 128], sizes = [8, 128], strides = [1, 1]} : vector<8x256xf32> to vector<8x128xf32>
    %140 = vector.extract_strided_slice %128 {offsets = [0, 256], sizes = [8, 128], strides = [1, 1]} : vector<8x384xf32> to vector<8x128xf32>
    %141 = vector.extract_strided_slice %129 {offsets = [0, 256], sizes = [8, 128], strides = [1, 1]} : vector<8x384xf32> to vector<8x128xf32>
    %142 = arith.addf %141, %10 : vector<8x128xf32>
    %143 = arith.mulf %138, %142 : vector<8x128xf32>
    %144 = arith.addf %140, %143 : vector<8x128xf32>
    %145 = math.tanh %144 : vector<8x128xf32>
    %cst_41 = arith.constant 1.000000e+00 : f32
    %146 = vector.broadcast %cst_41 : f32 to vector<8x128xf32>
    %147 = arith.subf %146, %139 : vector<8x128xf32>
    %148 = arith.mulf %147, %145 : vector<8x128xf32>
    %149 = arith.mulf %139, %122 : vector<8x128xf32>
    %150 = arith.addf %148, %149 : vector<8x128xf32>
    %151 = arith.index_cast %126 : i32 to index
    %c0_42 = arith.constant 0 : index
    %152 = vector.load %arg17[%151, %c0_42] : memref<64x128xf32, #tpu.memory_space<vmem>>, vector<8x128xf32>
    tpu.vector_store %arg17[%151, %c0_42], %150 {strides = array<i32>} : memref<64x128xf32, #tpu.memory_space<vmem>>, vector<8x128xf32>,
    %c5_i32 = arith.constant 5 : i32
    %c8_i32_43 = arith.constant 8 : i32
    %153 = arith.muli %c5_i32, %c8_i32_43 : i32
    %154 = tpu.assume_multiple %153, 8 : i32
    %155 = arith.index_cast %154 : i32 to index
    %c0_44 = arith.constant 0 : index
    %156 = vector.load %arg16[%155, %c0_44] : memref<64x384xf32, #tpu.memory_space<vmem>>, vector<8x384xf32>
    %cst_45 = arith.constant dense<0.000000e+00> : vector<8x384xf32>
    %157 = tpu.matmul %150, %7, %cst_45 {dimension_numbers = #tpu.dot_dimension_numbers<[1], [0], [0], [1], [0, 0, 1, 1], [], []>} : vector<8x128xf32>, vector<128x384xf32>, vector<8x384xf32> -> vector<8x384xf32>
    %158 = vector.extract_strided_slice %156 {offsets = [0, 0], sizes = [8, 256], strides = [1, 1]} : vector<8x384xf32> to vector<8x256xf32>
    %159 = vector.extract_strided_slice %157 {offsets = [0, 0], sizes = [8, 256], strides = [1, 1]} : vector<8x384xf32> to vector<8x256xf32>
    %160 = arith.addf %158, %159 : vector<8x256xf32>
    %161 = arith.negf %160 : vector<8x256xf32>
    %162 = math.exp %161 : vector<8x256xf32>
    %cst_46 = arith.constant 1.000000e+00 : f32
    %163 = vector.broadcast %cst_46 : f32 to vector<8x256xf32>
    %164 = arith.addf %163, %162 : vector<8x256xf32>
    %165 = arith.divf %163, %164 : vector<8x256xf32>
    %166 = vector.extract_strided_slice %165 {offsets = [0, 0], sizes = [8, 128], strides = [1, 1]} : vector<8x256xf32> to vector<8x128xf32>
    %167 = vector.extract_strided_slice %165 {offsets = [0, 128], sizes = [8, 128], strides = [1, 1]} : vector<8x256xf32> to vector<8x128xf32>
    %168 = vector.extract_strided_slice %156 {offsets = [0, 256], sizes = [8, 128], strides = [1, 1]} : vector<8x384xf32> to vector<8x128xf32>
    %169 = vector.extract_strided_slice %157 {offsets = [0, 256], sizes = [8, 128], strides = [1, 1]} : vector<8x384xf32> to vector<8x128xf32>
    %170 = arith.addf %169, %10 : vector<8x128xf32>
    %171 = arith.mulf %166, %170 : vector<8x128xf32>
    %172 = arith.addf %168, %171 : vector<8x128xf32>
    %173 = math.tanh %172 : vector<8x128xf32>
    %cst_47 = arith.constant 1.000000e+00 : f32
    %174 = vector.broadcast %cst_47 : f32 to vector<8x128xf32>
    %175 = arith.subf %174, %167 : vector<8x128xf32>
    %176 = arith.mulf %175, %173 : vector<8x128xf32>
    %177 = arith.mulf %167, %150 : vector<8x128xf32>
    %178 = arith.addf %176, %177 : vector<8x128xf32>
    %179 = arith.index_cast %154 : i32 to index
    %c0_48 = arith.constant 0 : index
    %180 = vector.load %arg17[%179, %c0_48] : memref<64x128xf32, #tpu.memory_space<vmem>>, vector<8x128xf32>
    tpu.vector_store %arg17[%179, %c0_48], %178 {strides = array<i32>} : memref<64x128xf32, #tpu.memory_space<vmem>>, vector<8x128xf32>,
    %c6_i32 = arith.constant 6 : i32
    %c8_i32_49 = arith.constant 8 : i32
    %181 = arith.muli %c6_i32, %c8_i32_49 : i32
    %182 = tpu.assume_multiple %181, 8 : i32
    %183 = arith.index_cast %182 : i32 to index
    %c0_50 = arith.constant 0 : index
    %184 = vector.load %arg16[%183, %c0_50] : memref<64x384xf32, #tpu.memory_space<vmem>>, vector<8x384xf32>
    %cst_51 = arith.constant dense<0.000000e+00> : vector<8x384xf32>
    %185 = tpu.matmul %178, %7, %cst_51 {dimension_numbers = #tpu.dot_dimension_numbers<[1], [0], [0], [1], [0, 0, 1, 1], [], []>} : vector<8x128xf32>, vector<128x384xf32>, vector<8x384xf32> -> vector<8x384xf32>
    %186 = vector.extract_strided_slice %184 {offsets = [0, 0], sizes = [8, 256], strides = [1, 1]} : vector<8x384xf32> to vector<8x256xf32>
    %187 = vector.extract_strided_slice %185 {offsets = [0, 0], sizes = [8, 256], strides = [1, 1]} : vector<8x384xf32> to vector<8x256xf32>
    %188 = arith.addf %186, %187 : vector<8x256xf32>
    %189 = arith.negf %188 : vector<8x256xf32>
    %190 = math.exp %189 : vector<8x256xf32>
    %cst_52 = arith.constant 1.000000e+00 : f32
    %191 = vector.broadcast %cst_52 : f32 to vector<8x256xf32>
    %192 = arith.addf %191, %190 : vector<8x256xf32>
    %193 = arith.divf %191, %192 : vector<8x256xf32>
    %194 = vector.extract_strided_slice %193 {offsets = [0, 0], sizes = [8, 128], strides = [1, 1]} : vector<8x256xf32> to vector<8x128xf32>
    %195 = vector.extract_strided_slice %193 {offsets = [0, 128], sizes = [8, 128], strides = [1, 1]} : vector<8x256xf32> to vector<8x128xf32>
    %196 = vector.extract_strided_slice %184 {offsets = [0, 256], sizes = [8, 128], strides = [1, 1]} : vector<8x384xf32> to vector<8x128xf32>
    %197 = vector.extract_strided_slice %185 {offsets = [0, 256], sizes = [8, 128], strides = [1, 1]} : vector<8x384xf32> to vector<8x128xf32>
    %198 = arith.addf %197, %10 : vector<8x128xf32>
    %199 = arith.mulf %194, %198 : vector<8x128xf32>
    %200 = arith.addf %196, %199 : vector<8x128xf32>
    %201 = math.tanh %200 : vector<8x128xf32>
    %cst_53 = arith.constant 1.000000e+00 : f32
    %202 = vector.broadcast %cst_53 : f32 to vector<8x128xf32>
    %203 = arith.subf %202, %195 : vector<8x128xf32>
    %204 = arith.mulf %203, %201 : vector<8x128xf32>
    %205 = arith.mulf %195, %178 : vector<8x128xf32>
    %206 = arith.addf %204, %205 : vector<8x128xf32>
    %207 = arith.index_cast %182 : i32 to index
    %c0_54 = arith.constant 0 : index
    %208 = vector.load %arg17[%207, %c0_54] : memref<64x128xf32, #tpu.memory_space<vmem>>, vector<8x128xf32>
    tpu.vector_store %arg17[%207, %c0_54], %206 {strides = array<i32>} : memref<64x128xf32, #tpu.memory_space<vmem>>, vector<8x128xf32>,
    %c7_i32 = arith.constant 7 : i32
    %c8_i32_55 = arith.constant 8 : i32
    %209 = arith.muli %c7_i32, %c8_i32_55 : i32
    %210 = tpu.assume_multiple %209, 8 : i32
    %211 = arith.index_cast %210 : i32 to index
    %c0_56 = arith.constant 0 : index
    %212 = vector.load %arg16[%211, %c0_56] : memref<64x384xf32, #tpu.memory_space<vmem>>, vector<8x384xf32>
    %cst_57 = arith.constant dense<0.000000e+00> : vector<8x384xf32>
    %213 = tpu.matmul %206, %7, %cst_57 {dimension_numbers = #tpu.dot_dimension_numbers<[1], [0], [0], [1], [0, 0, 1, 1], [], []>} : vector<8x128xf32>, vector<128x384xf32>, vector<8x384xf32> -> vector<8x384xf32>
    %214 = vector.extract_strided_slice %212 {offsets = [0, 0], sizes = [8, 256], strides = [1, 1]} : vector<8x384xf32> to vector<8x256xf32>
    %215 = vector.extract_strided_slice %213 {offsets = [0, 0], sizes = [8, 256], strides = [1, 1]} : vector<8x384xf32> to vector<8x256xf32>
    %216 = arith.addf %214, %215 : vector<8x256xf32>
    %217 = arith.negf %216 : vector<8x256xf32>
    %218 = math.exp %217 : vector<8x256xf32>
    %cst_58 = arith.constant 1.000000e+00 : f32
    %219 = vector.broadcast %cst_58 : f32 to vector<8x256xf32>
    %220 = arith.addf %219, %218 : vector<8x256xf32>
    %221 = arith.divf %219, %220 : vector<8x256xf32>
    %222 = vector.extract_strided_slice %221 {offsets = [0, 0], sizes = [8, 128], strides = [1, 1]} : vector<8x256xf32> to vector<8x128xf32>
    %223 = vector.extract_strided_slice %221 {offsets = [0, 128], sizes = [8, 128], strides = [1, 1]} : vector<8x256xf32> to vector<8x128xf32>
    %224 = vector.extract_strided_slice %212 {offsets = [0, 256], sizes = [8, 128], strides = [1, 1]} : vector<8x384xf32> to vector<8x128xf32>
    %225 = vector.extract_strided_slice %213 {offsets = [0, 256], sizes = [8, 128], strides = [1, 1]} : vector<8x384xf32> to vector<8x128xf32>
    %226 = arith.addf %225, %10 : vector<8x128xf32>
    %227 = arith.mulf %222, %226 : vector<8x128xf32>
    %228 = arith.addf %224, %227 : vector<8x128xf32>
    %229 = math.tanh %228 : vector<8x128xf32>
    %cst_59 = arith.constant 1.000000e+00 : f32
    %230 = vector.broadcast %cst_59 : f32 to vector<8x128xf32>
    %231 = arith.subf %230, %223 : vector<8x128xf32>
    %232 = arith.mulf %231, %229 : vector<8x128xf32>
    %233 = arith.mulf %223, %206 : vector<8x128xf32>
    %234 = arith.addf %232, %233 : vector<8x128xf32>
    %235 = arith.index_cast %210 : i32 to index
    %c0_60 = arith.constant 0 : index
    %236 = vector.load %arg17[%235, %c0_60] : memref<64x128xf32, #tpu.memory_space<vmem>>, vector<8x128xf32>
    tpu.vector_store %arg17[%235, %c0_60], %234 {strides = array<i32>} : memref<64x128xf32, #tpu.memory_space<vmem>>, vector<8x128xf32>,
    %c8_i32_61 = arith.constant 8 : i32
    %c0_62 = arith.constant 0 : index
    %c0_63 = arith.constant 0 : index
    %c0_64 = arith.constant 0 : index
    %237 = vector.load %arg15[%c0_62, %c0_63, %c0_64] : memref<2x8x128xf32, #tpu.memory_space<vmem>>, vector<1x8x128xf32>
    %238 = vector.shape_cast %237 : vector<1x8x128xf32> to vector<8x128xf32>
    %239 = vector.shape_cast %234 : vector<8x128xf32> to vector<1x8x128xf32>
    tpu.vector_store %arg15[%c0_62, %c0_63, %c0_64], %239 {strides = array<i32>} : memref<2x8x128xf32, #tpu.memory_space<vmem>>, vector<1x8x128xf32>,
    %c0_65 = arith.constant 0 : index
    %c0_66 = arith.constant 0 : index
    %240 = vector.load %arg17[%c0_65, %c0_66] : memref<64x128xf32, #tpu.memory_space<vmem>>, vector<64x128xf32>
    %c0_67 = arith.constant 0 : index
    %c0_68 = arith.constant 0 : index
    %241 = vector.load %arg6[%c0_67, %c0_68] : memref<128x384xf32, #tpu.memory_space<vmem>>, vector<128x384xf32>
    %cst_69 = arith.constant dense<0.000000e+00> : vector<64x384xf32>
    %242 = tpu.matmul %240, %241, %cst_69 {dimension_numbers = #tpu.dot_dimension_numbers<[1], [0], [0], [1], [0, 0, 1, 1], [], []>} : vector<64x128xf32>, vector<128x384xf32>, vector<64x384xf32> -> vector<64x384xf32>
    %c0_70 = arith.constant 0 : index
    %c0_71 = arith.constant 0 : index
    %243 = vector.load %arg8[%c0_70, %c0_71] : memref<1x384xf32, #tpu.memory_space<vmem>>, vector<1x384xf32>
    %244 = vector.broadcast %243 : vector<1x384xf32> to vector<64x384xf32>
    %245 = arith.addf %242, %244 : vector<64x384xf32>
    %c0_72 = arith.constant 0 : index
    %c0_73 = arith.constant 0 : index
    %246 = vector.load %arg16[%c0_72, %c0_73] : memref<64x384xf32, #tpu.memory_space<vmem>>, vector<64x384xf32>
    tpu.vector_store %arg16[%c0_72, %c0_73], %245 {strides = array<i32>} : memref<64x384xf32, #tpu.memory_space<vmem>>, vector<64x384xf32>,
    %c0_74 = arith.constant 0 : index
    %c0_75 = arith.constant 0 : index
    %247 = vector.load %arg7[%c0_74, %c0_75] : memref<128x384xf32, #tpu.memory_space<vmem>>, vector<128x384xf32>
    %c0_76 = arith.constant 0 : index
    %c0_77 = arith.constant 0 : index
    %248 = vector.load %arg9[%c0_76, %c0_77] : memref<1x128xf32, #tpu.memory_space<vmem>>, vector<1x128xf32>
    %249 = vector.shape_cast %248 : vector<1x128xf32> to vector<1x128xf32>
    %250 = vector.broadcast %249 : vector<1x128xf32> to vector<8x128xf32>
    %c1 = arith.constant 1 : index
    %c0_78 = arith.constant 0 : index
    %c0_79 = arith.constant 0 : index
    %251 = vector.load %arg1[%c1, %c0_78, %c0_79] : memref<2x8x128xf32, #tpu.memory_space<vmem>>, vector<1x8x128xf32>
    %252 = vector.shape_cast %251 : vector<1x8x128xf32> to vector<8x128xf32>
    %c0_i32_80 = arith.constant 0 : i32
    %c8_i32_81 = arith.constant 8 : i32
    %253 = arith.muli %c0_i32_80, %c8_i32_81 : i32
    %254 = tpu.assume_multiple %253, 8 : i32
    %255 = arith.index_cast %254 : i32 to index
    %c0_82 = arith.constant 0 : index
    %256 = vector.load %arg16[%255, %c0_82] : memref<64x384xf32, #tpu.memory_space<vmem>>, vector<8x384xf32>
    %cst_83 = arith.constant dense<0.000000e+00> : vector<8x384xf32>
    %257 = tpu.matmul %252, %247, %cst_83 {dimension_numbers = #tpu.dot_dimension_numbers<[1], [0], [0], [1], [0, 0, 1, 1], [], []>} : vector<8x128xf32>, vector<128x384xf32>, vector<8x384xf32> -> vector<8x384xf32>
    %258 = vector.extract_strided_slice %256 {offsets = [0, 0], sizes = [8, 256], strides = [1, 1]} : vector<8x384xf32> to vector<8x256xf32>
    %259 = vector.extract_strided_slice %257 {offsets = [0, 0], sizes = [8, 256], strides = [1, 1]} : vector<8x384xf32> to vector<8x256xf32>
    %260 = arith.addf %258, %259 : vector<8x256xf32>
    %261 = arith.negf %260 : vector<8x256xf32>
    %262 = math.exp %261 : vector<8x256xf32>
    %cst_84 = arith.constant 1.000000e+00 : f32
    %263 = vector.broadcast %cst_84 : f32 to vector<8x256xf32>
    %264 = arith.addf %263, %262 : vector<8x256xf32>
    %265 = arith.divf %263, %264 : vector<8x256xf32>
    %266 = vector.extract_strided_slice %265 {offsets = [0, 0], sizes = [8, 128], strides = [1, 1]} : vector<8x256xf32> to vector<8x128xf32>
    %267 = vector.extract_strided_slice %265 {offsets = [0, 128], sizes = [8, 128], strides = [1, 1]} : vector<8x256xf32> to vector<8x128xf32>
    %268 = vector.extract_strided_slice %256 {offsets = [0, 256], sizes = [8, 128], strides = [1, 1]} : vector<8x384xf32> to vector<8x128xf32>
    %269 = vector.extract_strided_slice %257 {offsets = [0, 256], sizes = [8, 128], strides = [1, 1]} : vector<8x384xf32> to vector<8x128xf32>
    %270 = arith.addf %269, %250 : vector<8x128xf32>
    %271 = arith.mulf %266, %270 : vector<8x128xf32>
    %272 = arith.addf %268, %271 : vector<8x128xf32>
    %273 = math.tanh %272 : vector<8x128xf32>
    %cst_85 = arith.constant 1.000000e+00 : f32
    %274 = vector.broadcast %cst_85 : f32 to vector<8x128xf32>
    %275 = arith.subf %274, %267 : vector<8x128xf32>
    %276 = arith.mulf %275, %273 : vector<8x128xf32>
    %277 = arith.mulf %267, %252 : vector<8x128xf32>
    %278 = arith.addf %276, %277 : vector<8x128xf32>
    %279 = arith.index_cast %254 : i32 to index
    %c0_86 = arith.constant 0 : index
    %280 = vector.load %arg18[%279, %c0_86] : memref<64x128xf32, #tpu.memory_space<vmem>>, vector<8x128xf32>
    tpu.vector_store %arg18[%279, %c0_86], %278 {strides = array<i32>} : memref<64x128xf32, #tpu.memory_space<vmem>>, vector<8x128xf32>,
    %c1_i32_87 = arith.constant 1 : i32
    %c8_i32_88 = arith.constant 8 : i32
    %281 = arith.muli %c1_i32_87, %c8_i32_88 : i32
    %282 = tpu.assume_multiple %281, 8 : i32
    %283 = arith.index_cast %282 : i32 to index
    %c0_89 = arith.constant 0 : index
    %284 = vector.load %arg16[%283, %c0_89] : memref<64x384xf32, #tpu.memory_space<vmem>>, vector<8x384xf32>
    %cst_90 = arith.constant dense<0.000000e+00> : vector<8x384xf32>
    %285 = tpu.matmul %278, %247, %cst_90 {dimension_numbers = #tpu.dot_dimension_numbers<[1], [0], [0], [1], [0, 0, 1, 1], [], []>} : vector<8x128xf32>, vector<128x384xf32>, vector<8x384xf32> -> vector<8x384xf32>
    %286 = vector.extract_strided_slice %284 {offsets = [0, 0], sizes = [8, 256], strides = [1, 1]} : vector<8x384xf32> to vector<8x256xf32>
    %287 = vector.extract_strided_slice %285 {offsets = [0, 0], sizes = [8, 256], strides = [1, 1]} : vector<8x384xf32> to vector<8x256xf32>
    %288 = arith.addf %286, %287 : vector<8x256xf32>
    %289 = arith.negf %288 : vector<8x256xf32>
    %290 = math.exp %289 : vector<8x256xf32>
    %cst_91 = arith.constant 1.000000e+00 : f32
    %291 = vector.broadcast %cst_91 : f32 to vector<8x256xf32>
    %292 = arith.addf %291, %290 : vector<8x256xf32>
    %293 = arith.divf %291, %292 : vector<8x256xf32>
    %294 = vector.extract_strided_slice %293 {offsets = [0, 0], sizes = [8, 128], strides = [1, 1]} : vector<8x256xf32> to vector<8x128xf32>
    %295 = vector.extract_strided_slice %293 {offsets = [0, 128], sizes = [8, 128], strides = [1, 1]} : vector<8x256xf32> to vector<8x128xf32>
    %296 = vector.extract_strided_slice %284 {offsets = [0, 256], sizes = [8, 128], strides = [1, 1]} : vector<8x384xf32> to vector<8x128xf32>
    %297 = vector.extract_strided_slice %285 {offsets = [0, 256], sizes = [8, 128], strides = [1, 1]} : vector<8x384xf32> to vector<8x128xf32>
    %298 = arith.addf %297, %250 : vector<8x128xf32>
    %299 = arith.mulf %294, %298 : vector<8x128xf32>
    %300 = arith.addf %296, %299 : vector<8x128xf32>
    %301 = math.tanh %300 : vector<8x128xf32>
    %cst_92 = arith.constant 1.000000e+00 : f32
    %302 = vector.broadcast %cst_92 : f32 to vector<8x128xf32>
    %303 = arith.subf %302, %295 : vector<8x128xf32>
    %304 = arith.mulf %303, %301 : vector<8x128xf32>
    %305 = arith.mulf %295, %278 : vector<8x128xf32>
    %306 = arith.addf %304, %305 : vector<8x128xf32>
    %307 = arith.index_cast %282 : i32 to index
    %c0_93 = arith.constant 0 : index
    %308 = vector.load %arg18[%307, %c0_93] : memref<64x128xf32, #tpu.memory_space<vmem>>, vector<8x128xf32>
    tpu.vector_store %arg18[%307, %c0_93], %306 {strides = array<i32>} : memref<64x128xf32, #tpu.memory_space<vmem>>, vector<8x128xf32>,
    %c2_i32_94 = arith.constant 2 : i32
    %c8_i32_95 = arith.constant 8 : i32
    %309 = arith.muli %c2_i32_94, %c8_i32_95 : i32
    %310 = tpu.assume_multiple %309, 8 : i32
    %311 = arith.index_cast %310 : i32 to index
    %c0_96 = arith.constant 0 : index
    %312 = vector.load %arg16[%311, %c0_96] : memref<64x384xf32, #tpu.memory_space<vmem>>, vector<8x384xf32>
    %cst_97 = arith.constant dense<0.000000e+00> : vector<8x384xf32>
    %313 = tpu.matmul %306, %247, %cst_97 {dimension_numbers = #tpu.dot_dimension_numbers<[1], [0], [0], [1], [0, 0, 1, 1], [], []>} : vector<8x128xf32>, vector<128x384xf32>, vector<8x384xf32> -> vector<8x384xf32>
    %314 = vector.extract_strided_slice %312 {offsets = [0, 0], sizes = [8, 256], strides = [1, 1]} : vector<8x384xf32> to vector<8x256xf32>
    %315 = vector.extract_strided_slice %313 {offsets = [0, 0], sizes = [8, 256], strides = [1, 1]} : vector<8x384xf32> to vector<8x256xf32>
    %316 = arith.addf %314, %315 : vector<8x256xf32>
    %317 = arith.negf %316 : vector<8x256xf32>
    %318 = math.exp %317 : vector<8x256xf32>
    %cst_98 = arith.constant 1.000000e+00 : f32
    %319 = vector.broadcast %cst_98 : f32 to vector<8x256xf32>
    %320 = arith.addf %319, %318 : vector<8x256xf32>
    %321 = arith.divf %319, %320 : vector<8x256xf32>
    %322 = vector.extract_strided_slice %321 {offsets = [0, 0], sizes = [8, 128], strides = [1, 1]} : vector<8x256xf32> to vector<8x128xf32>
    %323 = vector.extract_strided_slice %321 {offsets = [0, 128], sizes = [8, 128], strides = [1, 1]} : vector<8x256xf32> to vector<8x128xf32>
    %324 = vector.extract_strided_slice %312 {offsets = [0, 256], sizes = [8, 128], strides = [1, 1]} : vector<8x384xf32> to vector<8x128xf32>
    %325 = vector.extract_strided_slice %313 {offsets = [0, 256], sizes = [8, 128], strides = [1, 1]} : vector<8x384xf32> to vector<8x128xf32>
    %326 = arith.addf %325, %250 : vector<8x128xf32>
    %327 = arith.mulf %322, %326 : vector<8x128xf32>
    %328 = arith.addf %324, %327 : vector<8x128xf32>
    %329 = math.tanh %328 : vector<8x128xf32>
    %cst_99 = arith.constant 1.000000e+00 : f32
    %330 = vector.broadcast %cst_99 : f32 to vector<8x128xf32>
    %331 = arith.subf %330, %323 : vector<8x128xf32>
    %332 = arith.mulf %331, %329 : vector<8x128xf32>
    %333 = arith.mulf %323, %306 : vector<8x128xf32>
    %334 = arith.addf %332, %333 : vector<8x128xf32>
    %335 = arith.index_cast %310 : i32 to index
    %c0_100 = arith.constant 0 : index
    %336 = vector.load %arg18[%335, %c0_100] : memref<64x128xf32, #tpu.memory_space<vmem>>, vector<8x128xf32>
    tpu.vector_store %arg18[%335, %c0_100], %334 {strides = array<i32>} : memref<64x128xf32, #tpu.memory_space<vmem>>, vector<8x128xf32>,
    %c3_i32_101 = arith.constant 3 : i32
    %c8_i32_102 = arith.constant 8 : i32
    %337 = arith.muli %c3_i32_101, %c8_i32_102 : i32
    %338 = tpu.assume_multiple %337, 8 : i32
    %339 = arith.index_cast %338 : i32 to index
    %c0_103 = arith.constant 0 : index
    %340 = vector.load %arg16[%339, %c0_103] : memref<64x384xf32, #tpu.memory_space<vmem>>, vector<8x384xf32>
    %cst_104 = arith.constant dense<0.000000e+00> : vector<8x384xf32>
    %341 = tpu.matmul %334, %247, %cst_104 {dimension_numbers = #tpu.dot_dimension_numbers<[1], [0], [0], [1], [0, 0, 1, 1], [], []>} : vector<8x128xf32>, vector<128x384xf32>, vector<8x384xf32> -> vector<8x384xf32>
    %342 = vector.extract_strided_slice %340 {offsets = [0, 0], sizes = [8, 256], strides = [1, 1]} : vector<8x384xf32> to vector<8x256xf32>
    %343 = vector.extract_strided_slice %341 {offsets = [0, 0], sizes = [8, 256], strides = [1, 1]} : vector<8x384xf32> to vector<8x256xf32>
    %344 = arith.addf %342, %343 : vector<8x256xf32>
    %345 = arith.negf %344 : vector<8x256xf32>
    %346 = math.exp %345 : vector<8x256xf32>
    %cst_105 = arith.constant 1.000000e+00 : f32
    %347 = vector.broadcast %cst_105 : f32 to vector<8x256xf32>
    %348 = arith.addf %347, %346 : vector<8x256xf32>
    %349 = arith.divf %347, %348 : vector<8x256xf32>
    %350 = vector.extract_strided_slice %349 {offsets = [0, 0], sizes = [8, 128], strides = [1, 1]} : vector<8x256xf32> to vector<8x128xf32>
    %351 = vector.extract_strided_slice %349 {offsets = [0, 128], sizes = [8, 128], strides = [1, 1]} : vector<8x256xf32> to vector<8x128xf32>
    %352 = vector.extract_strided_slice %340 {offsets = [0, 256], sizes = [8, 128], strides = [1, 1]} : vector<8x384xf32> to vector<8x128xf32>
    %353 = vector.extract_strided_slice %341 {offsets = [0, 256], sizes = [8, 128], strides = [1, 1]} : vector<8x384xf32> to vector<8x128xf32>
    %354 = arith.addf %353, %250 : vector<8x128xf32>
    %355 = arith.mulf %350, %354 : vector<8x128xf32>
    %356 = arith.addf %352, %355 : vector<8x128xf32>
    %357 = math.tanh %356 : vector<8x128xf32>
    %cst_106 = arith.constant 1.000000e+00 : f32
    %358 = vector.broadcast %cst_106 : f32 to vector<8x128xf32>
    %359 = arith.subf %358, %351 : vector<8x128xf32>
    %360 = arith.mulf %359, %357 : vector<8x128xf32>
    %361 = arith.mulf %351, %334 : vector<8x128xf32>
    %362 = arith.addf %360, %361 : vector<8x128xf32>
    %363 = arith.index_cast %338 : i32 to index
    %c0_107 = arith.constant 0 : index
    %364 = vector.load %arg18[%363, %c0_107] : memref<64x128xf32, #tpu.memory_space<vmem>>, vector<8x128xf32>
    tpu.vector_store %arg18[%363, %c0_107], %362 {strides = array<i32>} : memref<64x128xf32, #tpu.memory_space<vmem>>, vector<8x128xf32>,
    %c4_i32_108 = arith.constant 4 : i32
    %c8_i32_109 = arith.constant 8 : i32
    %365 = arith.muli %c4_i32_108, %c8_i32_109 : i32
    %366 = tpu.assume_multiple %365, 8 : i32
    %367 = arith.index_cast %366 : i32 to index
    %c0_110 = arith.constant 0 : index
    %368 = vector.load %arg16[%367, %c0_110] : memref<64x384xf32, #tpu.memory_space<vmem>>, vector<8x384xf32>
    %cst_111 = arith.constant dense<0.000000e+00> : vector<8x384xf32>
    %369 = tpu.matmul %362, %247, %cst_111 {dimension_numbers = #tpu.dot_dimension_numbers<[1], [0], [0], [1], [0, 0, 1, 1], [], []>} : vector<8x128xf32>, vector<128x384xf32>, vector<8x384xf32> -> vector<8x384xf32>
    %370 = vector.extract_strided_slice %368 {offsets = [0, 0], sizes = [8, 256], strides = [1, 1]} : vector<8x384xf32> to vector<8x256xf32>
    %371 = vector.extract_strided_slice %369 {offsets = [0, 0], sizes = [8, 256], strides = [1, 1]} : vector<8x384xf32> to vector<8x256xf32>
    %372 = arith.addf %370, %371 : vector<8x256xf32>
    %373 = arith.negf %372 : vector<8x256xf32>
    %374 = math.exp %373 : vector<8x256xf32>
    %cst_112 = arith.constant 1.000000e+00 : f32
    %375 = vector.broadcast %cst_112 : f32 to vector<8x256xf32>
    %376 = arith.addf %375, %374 : vector<8x256xf32>
    %377 = arith.divf %375, %376 : vector<8x256xf32>
    %378 = vector.extract_strided_slice %377 {offsets = [0, 0], sizes = [8, 128], strides = [1, 1]} : vector<8x256xf32> to vector<8x128xf32>
    %379 = vector.extract_strided_slice %377 {offsets = [0, 128], sizes = [8, 128], strides = [1, 1]} : vector<8x256xf32> to vector<8x128xf32>
    %380 = vector.extract_strided_slice %368 {offsets = [0, 256], sizes = [8, 128], strides = [1, 1]} : vector<8x384xf32> to vector<8x128xf32>
    %381 = vector.extract_strided_slice %369 {offsets = [0, 256], sizes = [8, 128], strides = [1, 1]} : vector<8x384xf32> to vector<8x128xf32>
    %382 = arith.addf %381, %250 : vector<8x128xf32>
    %383 = arith.mulf %378, %382 : vector<8x128xf32>
    %384 = arith.addf %380, %383 : vector<8x128xf32>
    %385 = math.tanh %384 : vector<8x128xf32>
    %cst_113 = arith.constant 1.000000e+00 : f32
    %386 = vector.broadcast %cst_113 : f32 to vector<8x128xf32>
    %387 = arith.subf %386, %379 : vector<8x128xf32>
    %388 = arith.mulf %387, %385 : vector<8x128xf32>
    %389 = arith.mulf %379, %362 : vector<8x128xf32>
    %390 = arith.addf %388, %389 : vector<8x128xf32>
    %391 = arith.index_cast %366 : i32 to index
    %c0_114 = arith.constant 0 : index
    %392 = vector.load %arg18[%391, %c0_114] : memref<64x128xf32, #tpu.memory_space<vmem>>, vector<8x128xf32>
    tpu.vector_store %arg18[%391, %c0_114], %390 {strides = array<i32>} : memref<64x128xf32, #tpu.memory_space<vmem>>, vector<8x128xf32>,
    %c5_i32_115 = arith.constant 5 : i32
    %c8_i32_116 = arith.constant 8 : i32
    %393 = arith.muli %c5_i32_115, %c8_i32_116 : i32
    %394 = tpu.assume_multiple %393, 8 : i32
    %395 = arith.index_cast %394 : i32 to index
    %c0_117 = arith.constant 0 : index
    %396 = vector.load %arg16[%395, %c0_117] : memref<64x384xf32, #tpu.memory_space<vmem>>, vector<8x384xf32>
    %cst_118 = arith.constant dense<0.000000e+00> : vector<8x384xf32>
    %397 = tpu.matmul %390, %247, %cst_118 {dimension_numbers = #tpu.dot_dimension_numbers<[1], [0], [0], [1], [0, 0, 1, 1], [], []>} : vector<8x128xf32>, vector<128x384xf32>, vector<8x384xf32> -> vector<8x384xf32>
    %398 = vector.extract_strided_slice %396 {offsets = [0, 0], sizes = [8, 256], strides = [1, 1]} : vector<8x384xf32> to vector<8x256xf32>
    %399 = vector.extract_strided_slice %397 {offsets = [0, 0], sizes = [8, 256], strides = [1, 1]} : vector<8x384xf32> to vector<8x256xf32>
    %400 = arith.addf %398, %399 : vector<8x256xf32>
    %401 = arith.negf %400 : vector<8x256xf32>
    %402 = math.exp %401 : vector<8x256xf32>
    %cst_119 = arith.constant 1.000000e+00 : f32
    %403 = vector.broadcast %cst_119 : f32 to vector<8x256xf32>
    %404 = arith.addf %403, %402 : vector<8x256xf32>
    %405 = arith.divf %403, %404 : vector<8x256xf32>
    %406 = vector.extract_strided_slice %405 {offsets = [0, 0], sizes = [8, 128], strides = [1, 1]} : vector<8x256xf32> to vector<8x128xf32>
    %407 = vector.extract_strided_slice %405 {offsets = [0, 128], sizes = [8, 128], strides = [1, 1]} : vector<8x256xf32> to vector<8x128xf32>
    %408 = vector.extract_strided_slice %396 {offsets = [0, 256], sizes = [8, 128], strides = [1, 1]} : vector<8x384xf32> to vector<8x128xf32>
    %409 = vector.extract_strided_slice %397 {offsets = [0, 256], sizes = [8, 128], strides = [1, 1]} : vector<8x384xf32> to vector<8x128xf32>
    %410 = arith.addf %409, %250 : vector<8x128xf32>
    %411 = arith.mulf %406, %410 : vector<8x128xf32>
    %412 = arith.addf %408, %411 : vector<8x128xf32>
    %413 = math.tanh %412 : vector<8x128xf32>
    %cst_120 = arith.constant 1.000000e+00 : f32
    %414 = vector.broadcast %cst_120 : f32 to vector<8x128xf32>
    %415 = arith.subf %414, %407 : vector<8x128xf32>
    %416 = arith.mulf %415, %413 : vector<8x128xf32>
    %417 = arith.mulf %407, %390 : vector<8x128xf32>
    %418 = arith.addf %416, %417 : vector<8x128xf32>
    %419 = arith.index_cast %394 : i32 to index
    %c0_121 = arith.constant 0 : index
    %420 = vector.load %arg18[%419, %c0_121] : memref<64x128xf32, #tpu.memory_space<vmem>>, vector<8x128xf32>
    tpu.vector_store %arg18[%419, %c0_121], %418 {strides = array<i32>} : memref<64x128xf32, #tpu.memory_space<vmem>>, vector<8x128xf32>,
    %c6_i32_122 = arith.constant 6 : i32
    %c8_i32_123 = arith.constant 8 : i32
    %421 = arith.muli %c6_i32_122, %c8_i32_123 : i32
    %422 = tpu.assume_multiple %421, 8 : i32
    %423 = arith.index_cast %422 : i32 to index
    %c0_124 = arith.constant 0 : index
    %424 = vector.load %arg16[%423, %c0_124] : memref<64x384xf32, #tpu.memory_space<vmem>>, vector<8x384xf32>
    %cst_125 = arith.constant dense<0.000000e+00> : vector<8x384xf32>
    %425 = tpu.matmul %418, %247, %cst_125 {dimension_numbers = #tpu.dot_dimension_numbers<[1], [0], [0], [1], [0, 0, 1, 1], [], []>} : vector<8x128xf32>, vector<128x384xf32>, vector<8x384xf32> -> vector<8x384xf32>
    %426 = vector.extract_strided_slice %424 {offsets = [0, 0], sizes = [8, 256], strides = [1, 1]} : vector<8x384xf32> to vector<8x256xf32>
    %427 = vector.extract_strided_slice %425 {offsets = [0, 0], sizes = [8, 256], strides = [1, 1]} : vector<8x384xf32> to vector<8x256xf32>
    %428 = arith.addf %426, %427 : vector<8x256xf32>
    %429 = arith.negf %428 : vector<8x256xf32>
    %430 = math.exp %429 : vector<8x256xf32>
    %cst_126 = arith.constant 1.000000e+00 : f32
    %431 = vector.broadcast %cst_126 : f32 to vector<8x256xf32>
    %432 = arith.addf %431, %430 : vector<8x256xf32>
    %433 = arith.divf %431, %432 : vector<8x256xf32>
    %434 = vector.extract_strided_slice %433 {offsets = [0, 0], sizes = [8, 128], strides = [1, 1]} : vector<8x256xf32> to vector<8x128xf32>
    %435 = vector.extract_strided_slice %433 {offsets = [0, 128], sizes = [8, 128], strides = [1, 1]} : vector<8x256xf32> to vector<8x128xf32>
    %436 = vector.extract_strided_slice %424 {offsets = [0, 256], sizes = [8, 128], strides = [1, 1]} : vector<8x384xf32> to vector<8x128xf32>
    %437 = vector.extract_strided_slice %425 {offsets = [0, 256], sizes = [8, 128], strides = [1, 1]} : vector<8x384xf32> to vector<8x128xf32>
    %438 = arith.addf %437, %250 : vector<8x128xf32>
    %439 = arith.mulf %434, %438 : vector<8x128xf32>
    %440 = arith.addf %436, %439 : vector<8x128xf32>
    %441 = math.tanh %440 : vector<8x128xf32>
    %cst_127 = arith.constant 1.000000e+00 : f32
    %442 = vector.broadcast %cst_127 : f32 to vector<8x128xf32>
    %443 = arith.subf %442, %435 : vector<8x128xf32>
    %444 = arith.mulf %443, %441 : vector<8x128xf32>
    %445 = arith.mulf %435, %418 : vector<8x128xf32>
    %446 = arith.addf %444, %445 : vector<8x128xf32>
    %447 = arith.index_cast %422 : i32 to index
    %c0_128 = arith.constant 0 : index
    %448 = vector.load %arg18[%447, %c0_128] : memref<64x128xf32, #tpu.memory_space<vmem>>, vector<8x128xf32>
    tpu.vector_store %arg18[%447, %c0_128], %446 {strides = array<i32>} : memref<64x128xf32, #tpu.memory_space<vmem>>, vector<8x128xf32>,
    %c7_i32_129 = arith.constant 7 : i32
    %c8_i32_130 = arith.constant 8 : i32
    %449 = arith.muli %c7_i32_129, %c8_i32_130 : i32
    %450 = tpu.assume_multiple %449, 8 : i32
    %451 = arith.index_cast %450 : i32 to index
    %c0_131 = arith.constant 0 : index
    %452 = vector.load %arg16[%451, %c0_131] : memref<64x384xf32, #tpu.memory_space<vmem>>, vector<8x384xf32>
    %cst_132 = arith.constant dense<0.000000e+00> : vector<8x384xf32>
    %453 = tpu.matmul %446, %247, %cst_132 {dimension_numbers = #tpu.dot_dimension_numbers<[1], [0], [0], [1], [0, 0, 1, 1], [], []>} : vector<8x128xf32>, vector<128x384xf32>, vector<8x384xf32> -> vector<8x384xf32>
    %454 = vector.extract_strided_slice %452 {offsets = [0, 0], sizes = [8, 256], strides = [1, 1]} : vector<8x384xf32> to vector<8x256xf32>
    %455 = vector.extract_strided_slice %453 {offsets = [0, 0], sizes = [8, 256], strides = [1, 1]} : vector<8x384xf32> to vector<8x256xf32>
    %456 = arith.addf %454, %455 : vector<8x256xf32>
    %457 = arith.negf %456 : vector<8x256xf32>
    %458 = math.exp %457 : vector<8x256xf32>
    %cst_133 = arith.constant 1.000000e+00 : f32
    %459 = vector.broadcast %cst_133 : f32 to vector<8x256xf32>
    %460 = arith.addf %459, %458 : vector<8x256xf32>
    %461 = arith.divf %459, %460 : vector<8x256xf32>
    %462 = vector.extract_strided_slice %461 {offsets = [0, 0], sizes = [8, 128], strides = [1, 1]} : vector<8x256xf32> to vector<8x128xf32>
    %463 = vector.extract_strided_slice %461 {offsets = [0, 128], sizes = [8, 128], strides = [1, 1]} : vector<8x256xf32> to vector<8x128xf32>
    %464 = vector.extract_strided_slice %452 {offsets = [0, 256], sizes = [8, 128], strides = [1, 1]} : vector<8x384xf32> to vector<8x128xf32>
    %465 = vector.extract_strided_slice %453 {offsets = [0, 256], sizes = [8, 128], strides = [1, 1]} : vector<8x384xf32> to vector<8x128xf32>
    %466 = arith.addf %465, %250 : vector<8x128xf32>
    %467 = arith.mulf %462, %466 : vector<8x128xf32>
    %468 = arith.addf %464, %467 : vector<8x128xf32>
    %469 = math.tanh %468 : vector<8x128xf32>
    %cst_134 = arith.constant 1.000000e+00 : f32
    %470 = vector.broadcast %cst_134 : f32 to vector<8x128xf32>
    %471 = arith.subf %470, %463 : vector<8x128xf32>
    %472 = arith.mulf %471, %469 : vector<8x128xf32>
    %473 = arith.mulf %463, %446 : vector<8x128xf32>
    %474 = arith.addf %472, %473 : vector<8x128xf32>
    %475 = arith.index_cast %450 : i32 to index
    %c0_135 = arith.constant 0 : index
    %476 = vector.load %arg18[%475, %c0_135] : memref<64x128xf32, #tpu.memory_space<vmem>>, vector<8x128xf32>
    tpu.vector_store %arg18[%475, %c0_135], %474 {strides = array<i32>} : memref<64x128xf32, #tpu.memory_space<vmem>>, vector<8x128xf32>,
    %c8_i32_136 = arith.constant 8 : i32
    %c1_137 = arith.constant 1 : index
    %c0_138 = arith.constant 0 : index
    %c0_139 = arith.constant 0 : index
    %477 = vector.load %arg15[%c1_137, %c0_138, %c0_139] : memref<2x8x128xf32, #tpu.memory_space<vmem>>, vector<1x8x128xf32>
    %478 = vector.shape_cast %477 : vector<1x8x128xf32> to vector<8x128xf32>
    %479 = vector.shape_cast %474 : vector<8x128xf32> to vector<1x8x128xf32>
    tpu.vector_store %arg15[%c1_137, %c0_138, %c0_139], %479 {strides = array<i32>} : memref<2x8x128xf32, #tpu.memory_space<vmem>>, vector<1x8x128xf32>,
    %c0_140 = arith.constant 0 : index
    %c0_141 = arith.constant 0 : index
    %480 = vector.load %arg18[%c0_140, %c0_141] : memref<64x128xf32, #tpu.memory_space<vmem>>, vector<64x128xf32>
    %c0_142 = arith.constant 0 : index
    %c0_143 = arith.constant 0 : index
    %481 = vector.load %arg10[%c0_142, %c0_143] : memref<128x128xf32, #tpu.memory_space<vmem>>, vector<128x128xf32>
    %cst_144 = arith.constant dense<0.000000e+00> : vector<64x128xf32>
    %482 = tpu.matmul %480, %481, %cst_144 {dimension_numbers = #tpu.dot_dimension_numbers<[1], [0], [0], [1], [0, 0, 1, 1], [], []>} : vector<64x128xf32>, vector<128x128xf32>, vector<64x128xf32> -> vector<64x128xf32>
    %c0_145 = arith.constant 0 : index
    %c0_146 = arith.constant 0 : index
    %483 = vector.load %arg11[%c0_145, %c0_146] : memref<1x128xf32, #tpu.memory_space<vmem>>, vector<1x128xf32>
    %484 = vector.broadcast %483 : vector<1x128xf32> to vector<64x128xf32>
    %485 = arith.addf %482, %484 : vector<64x128xf32>
    %cst_147 = arith.constant 0.000000e+00 : f32
    %486 = vector.broadcast %cst_147 : f32 to vector<64x128xf32>
    %487 = arith.maximumf %485, %486 : vector<64x128xf32>
    %c0_148 = arith.constant 0 : index
    %c0_149 = arith.constant 0 : index
    %488 = vector.load %arg12[%c0_148, %c0_149] : memref<128x128xf32, #tpu.memory_space<vmem>>, vector<128x128xf32>
    %cst_150 = arith.constant dense<0.000000e+00> : vector<64x128xf32>
    %489 = tpu.matmul %487, %488, %cst_150 {dimension_numbers = #tpu.dot_dimension_numbers<[1], [0], [0], [1], [0, 0, 1, 1], [], []>} : vector<64x128xf32>, vector<128x128xf32>, vector<64x128xf32> -> vector<64x128xf32>
    %c0_151 = arith.constant 0 : index
    %c0_152 = arith.constant 0 : index
    %490 = vector.load %arg13[%c0_151, %c0_152] : memref<1x128xf32, #tpu.memory_space<vmem>>, vector<1x128xf32>
    %491 = vector.broadcast %490 : vector<1x128xf32> to vector<64x128xf32>
    %492 = arith.addf %489, %491 : vector<64x128xf32>
    %c0_153 = arith.constant 0 : index
    %c0_154 = arith.constant 0 : index
    %493 = vector.load %arg14[%c0_153, %c0_154] : memref<64x128xf32, #tpu.memory_space<vmem>>, vector<64x128xf32>
    tpu.vector_store %arg14[%c0_153, %c0_154], %492 {strides = array<i32>} : memref<64x128xf32, #tpu.memory_space<vmem>>, vector<64x128xf32>,
    return
  }
}

</mosaic_0001>

<bundles_post_ra>
// kernel: gru_model_forward.1
= control target key start
LH: loop header
LB: loop body
LE: loop exit
PB: predicated region body
PF: predicated region fallthrough
CT: control target
= control target key end

     0   :  { %21 = vsyncpa [#allocation6], 0  ;;  %s7669_s0 = inlined_call_operand.vmem [shape: f32[64,128], index: 0, kind: input, shape index: {}]   ;;  %s7670_s1 = inlined_call_operand.vmem [shape: f32[2,8,128], index: 1, kind: input, shape index: {}, may-alias: {1,15}]   ;;  %s7671_s2 = inlined_call_operand.hbm [shape: f32[128,384], index: 2, kind: input, shape index: {}]   ;;  %s7672_s3 = inlined_call_operand.hbm [shape: f32[128,384], index: 3, kind: input, shape index: {}]   ;;  %s7673_s4 = inlined_call_operand.vmem [shape: f32[1,384], index: 4, kind: input, shape index: {}]   ;;  %s7674_s5 = inlined_call_operand.vmem [shape: f32[1,128], index: 5, kind: input, shape index: {}]   ;;  %s7675_s6 = inlined_call_operand.hbm [shape: f32[128,384], index: 6, kind: input, shape index: {}]   ;;  %s7676_s7 = inlined_call_operand.hbm [shape: f32[128,384], index: 7, kind: input, shape index: {}]   ;;  %s7677_s8 = inlined_call_operand.vmem [shape: f32[1,384], index: 8, kind: input, shape index: {}]   ;;  %s7678_s9 = inlined_call_operand.vmem [shape: f32[1,128], index: 9, kind: input, shape index: {}]   ;;  %s7679_s10 = inlined_call_operand.vmem [shape: f32[128,128], index: 10, kind: input, shape index: {}]   ;;  %s7680_s11 = inlined_call_operand.vmem [shape: f32[1,128], index: 11, kind: input, shape index: {}]   ;;  %s7681_s12 = inlined_call_operand.hbm [shape: f32[128,128], index: 12, kind: input, shape index: {}]   ;;  %s7682_s13 = inlined_call_operand.vmem [shape: f32[1,128], index: 13, kind: input, shape index: {}]   ;;  %s7683_s14 = inlined_call_operand.vmem [shape: f32[64,128], index: 14, kind: output, shape index: {0}]   ;;  %s7684_s15 = inlined_call_operand.vmem [shape: f32[2,8,128], index: 15, kind: output, shape index: {1}, may-alias: {1,15}]  }
   0x1   :  { %22 = vsyncpa [#allocation8], 0 }
   0x2   :  { %23 = vsyncpa [#allocation11], 0  ;;  %s6454_s18 = smov [#allocation7]   ;;  %s6455_s20 = smov [#allocation10]  }
   0x3   :  { %s45_s19 = sshll.u32 %s6454_s18, 4  ;;  %s73_s21 = sshll.u32 %s6455_s20, 4  ;;  %s46_s19 = int_to_ptr.vmem [resolvable:$true] %s45_s19  ;;  %s6546_s21 = int_to_ptr.vmem [resolvable:$true] %s73_s21 }
   0x4   :  { %s6338_s24 = scalar_lea.hbm %s7672_s3, 6144 }
   0x5   :  { %p6339_p0 = scmp.ne.s32.totalorder %s7672_s3, %s6338_s24  ;;  %p6342_p1 = scmp.lt.u32.totalorder %s6338_s24, %s7672_s3 }
   0x7   :  { %p6344_p2 = pnand %p6342_p1, %p6339_p0 }
   0x9   :  { %6347 = shalt.err (!%p6344_p2)
}
   0xa   :  { %s6348_s29 = scalar_lea.vmem %s46_s19, 6144  ;;  %p6353_p4 = scmp.lt.s32.totalorder %s46_s19, %s46_s19 }
   0xb   :  { %p6349_p3 = scmp.ne.s32.totalorder %s46_s19, %s6348_s29  ;;  %p6354_p5 = scmp.lt.s32.totalorder %s6348_s29, %s6348_s29 }
   0xd   :  { %p6355_p6 = por %p6354_p5, %p6353_p4 }
   0xf   :  { %p6356_p7 = pnand %p6355_p6, %p6349_p3 }
  0x11   :  { %6359 = shalt.err (!%p6356_p7)
}
  0x12   :  { %s6456_s30 = smov 384   ;;  %s6457_s16 = smov 24  }
  0x13   :  { %51 = dma.hbm_to_vmem [thread:$0]  %s7672_s3, 6144, %s46_s19, [#allocation8], %s6456_s30, %s6456_s30, %s6457_s16  }
  0x14   :  { %s6360_s23 = scalar_lea.hbm %s7676_s7, 6144 }
  0x15   :  { %p6361_p8 = scmp.ne.s32.totalorder %s7676_s7, %s6360_s23  ;;  %p6364_p9 = scmp.lt.u32.totalorder %s6360_s23, %s7676_s7 }
  0x17   :  { %p6366_p10 = pnand %p6364_p9, %p6361_p8 }
  0x19   :  { %6369 = shalt.err (!%p6366_p10)
}
  0x1a   :  { %s6370_s28 = scalar_lea.vmem %s6546_s21, 6144  ;;  %p6375_p12 = scmp.lt.s32.totalorder %s6546_s21, %s6546_s21 }
  0x1b   :  { %p6371_p11 = scmp.ne.s32.totalorder %s6546_s21, %s6370_s28  ;;  %p6376_p13 = scmp.lt.s32.totalorder %s6370_s28, %s6370_s28 }
  0x1d   :  { %p6377_p0 = por %p6376_p13, %p6375_p12 }
  0x1f   :  { %p6378_p1 = pnand %p6377_p0, %p6371_p11 }
  0x21   :  { %6381 = shalt.err (!%p6378_p1)
}
  0x22   :  { %79 = dma.hbm_to_vmem [thread:$0]  %s7676_s7, 6144, %s6546_s21, [#allocation11], %s6456_s30, %s6456_s30, %s6457_s16  }
  0x23   :  { %s6458_s29 = smov [#allocation5]   ;;  %s6459_s18 = smov [#allocation9]  }
  0x24   :  { %s33_s17 = sshll.u32 %s6458_s29, 4  ;;  %s61_s20 = sshll.u32 %s6459_s18, 4  ;;  %s34_s17 = int_to_ptr.vmem [resolvable:$true] %s33_s17  ;;  %s6583_s20 = int_to_ptr.vmem [resolvable:$true] %s61_s20 }
  0x25   :  { %s6382_s24 = scalar_lea.hbm %s7671_s2, 6144 }
  0x26   :  { %p6383_p2 = scmp.ne.s32.totalorder %s7671_s2, %s6382_s24  ;;  %p6386_p3 = scmp.lt.u32.totalorder %s6382_s24, %s7671_s2 }
  0x28   :  { %p6388_p4 = pnand %p6386_p3, %p6383_p2 }
  0x2a   :  { %6391 = shalt.err (!%p6388_p4)
}
  0x2b   :  { %s6392_s7 = scalar_lea.vmem %s34_s17, 6144  ;;  %p6397_p6 = scmp.lt.s32.totalorder %s34_s17, %s34_s17 }
  0x2c   :  { %p6393_p5 = scmp.ne.s32.totalorder %s34_s17, %s6392_s7  ;;  %p6398_p7 = scmp.lt.s32.totalorder %s6392_s7, %s6392_s7 }
  0x2e   :  { %p6399_p8 = por %p6398_p7, %p6397_p6 }
  0x30   :  { %p6400_p9 = pnand %p6399_p8, %p6393_p5 }
  0x32   :  { %6403 = shalt.err (!%p6400_p9)
}
  0x33   :  { %39 = dma.hbm_to_vmem [thread:$0]  %s7671_s2, 6144, %s34_s17, [#allocation6], %s6456_s30, %s6456_s30, %s6457_s16  }
  0x34   :  { %s6404_s18 = scalar_lea.hbm %s7675_s6, 6144 }
  0x35   :  { %p6405_p10 = scmp.ne.s32.totalorder %s7675_s6, %s6404_s18  ;;  %p6408_p11 = scmp.lt.u32.totalorder %s6404_s18, %s7675_s6 }
  0x37   :  { %p6410_p12 = pnand %p6408_p11, %p6405_p10 }
  0x39   :  { %6413 = shalt.err (!%p6410_p12)
}
  0x3a   :  { %s6414_s26 = scalar_lea.vmem %s6583_s20, 6144  ;;  %p6419_p0 = scmp.lt.s32.totalorder %s6583_s20, %s6583_s20 }
  0x3b   :  { %p6415_p13 = scmp.ne.s32.totalorder %s6583_s20, %s6414_s26  ;;  %p6420_p1 = scmp.lt.s32.totalorder %s6414_s26, %s6414_s26 }
  0x3d   :  { %p6421_p2 = por %p6420_p1, %p6419_p0 }
  0x3f   :  { %p6422_p3 = pnand %p6421_p2, %p6415_p13 }
  0x41   :  { %6425 = shalt.err (!%p6422_p3)
}
  0x42   :  { %67 = dma.hbm_to_vmem [thread:$0]  %s7675_s6, 6144, %s6583_s20, [#allocation8], %s6456_s30, %s6456_s30, %s6457_s16  }
  0x43   :  { %s6460_s27 = smov [#allocation12]   ;;  %s6426_s3 = scalar_lea.hbm %s7681_s12, 2048 }
  0x44   :  { %s93_s28 = sshll.u32 %s6460_s27, 4  ;;  %p6427_p4 = scmp.ne.s32.totalorder %s7681_s12, %s6426_s3  ;;  %s94_s28 = int_to_ptr.vmem [resolvable:$true] %s93_s28 }
  0x45   :  { %p6430_p5 = scmp.lt.u32.totalorder %s6426_s3, %s7681_s12 }
  0x47   :  { %p6432_p6 = pnand %p6430_p5, %p6427_p4 }
  0x49   :  { %6435 = shalt.err (!%p6432_p6)
}
  0x4a   :  { %s6436_s23 = scalar_lea.vmem %s94_s28, 2048  ;;  %p6441_p8 = scmp.lt.s32.totalorder %s94_s28, %s94_s28 }
  0x4b   :  { %p6437_p7 = scmp.ne.s32.totalorder %s94_s28, %s6436_s23  ;;  %p6442_p9 = scmp.lt.s32.totalorder %s6436_s23, %s6436_s23 }
  0x4d   :  { %p6443_p10 = por %p6442_p9, %p6441_p8 }
  0x4f   :  { %p6444_p11 = pnand %p6443_p10, %p6437_p7 }
  0x51   :  { %6447 = shalt.err (!%p6444_p11)
}
  0x52   :  { %s6461_s6 = smov 128   ;;  %s6462_s30 = smov 8  }
  0x53   :  { %99 = dma.hbm_to_vmem [thread:$0]  %s7681_s12, 2048, %s94_s28, [#allocation11], %s6461_s6, %s6461_s6, %s6462_s30  }
  0x54   :  { %6448 = dma.done.wait [#allocation6], 6144  }
  0x55   :  { %6449 = vsyncadd [#allocation6], 4294961152 }
  0x56   :  { %6450 = dma.done.wait [#allocation8], 12288  }
  0x57   :  { %6451 = vsyncadd [#allocation8], 4294955008 }
  0x58   :  { %6452 = dma.done.wait [#allocation11], 8192  }
  0x59   :  { %6453 = vsyncadd [#allocation11], 4294959104  ;;  %v6463_v0 = vmov 0.0   ;;  %v126_v1 = vld [vmem:[#allocation5 + $0x8] sm:$0xff]  ;;  %v129_v2 = vld [vmem:[#allocation5 + $0x20] sm:$0xff]  ;;  %vm6465_vm0 = vmmov 0  }
  0x5a   :  { %254 = vmatprep.mubr.f32.mxu0 %v6463_v0  ;;  %v125_v3 = vld [vmem:[#allocation5] sm:$0xff]  ;;  %v5013_v4 = vpack.c.bf16 %v129_v2, %v126_v1  ;;  %v128_v5 = vld [vmem:[#allocation5 + $0x18] sm:$0xff]  ;;  %v135_v7 = vld [vmem:[#allocation5 + $0x50] sm:$0xff] }
  0x5b   :  { %v132_v6 = vld [vmem:[#allocation5 + $0x38] sm:$0xff]  ;;  %v5015_v8 = vpack.c.bf16 %v128_v5, %v125_v3  ;;  %v131_v10 = vld [vmem:[#allocation5 + $0x30] sm:$0xff]  ;;  %v134_v11 = vld [vmem:[#allocation5 + $0x48] sm:$0xff] }
  0x5c   :  { %v5017_v9 = vpack.c.bf16 %v135_v7, %v132_v6  ;;  %v138_v12 = vld [vmem:[#allocation5 + $0x68] sm:$0xff]  ;;  %5014 = vmatprep.subr.bf16.mxu0 %v5013_v4  ;;  %v141_v13 = vld [vmem:[#allocation5 + $0x80] sm:$0xff]  ;;  %v5019_v14 = vpack.c.bf16 %v134_v11, %v131_v10  ;;  %v140_v17 = vld [vmem:[#allocation5 + $0x78] sm:$0xff] }
  0x5d   :  { %5016 = vmatpush1.bf16.msra.mxu0 %v5015_v8  ;;  %v5021_v15 = vpack.c.bf16 %v141_v13, %v138_v12  ;;  %v137_v16 = vld [vmem:[#allocation5 + $0x60] sm:$0xff]  ;;  %v144_v18 = vld [vmem:[#allocation5 + $0x98] sm:$0xff]  ;;  %v147_v19 = vld [vmem:[#allocation5 + $0xb0] sm:$0xff] }
  0x5e   :  { %5018 = vmatprep.subr.bf16.mxu0 %v5017_v9  ;;  %v5023_v20 = vpack.c.bf16 %v140_v17, %v137_v16  ;;  %v143_v21 = vld [vmem:[#allocation5 + $0x90] sm:$0xff]  ;;  %v5025_v22 = vpack.c.bf16 %v147_v19, %v144_v18  ;;  %v146_v23 = vld [vmem:[#allocation5 + $0xa8] sm:$0xff]  ;;  %v153_v27 = vld [vmem:[#allocation5 + $0xe0] sm:$0xff] }
  0x5f   :  { %v127_v24 = vld [vmem:[#allocation5 + $0x10] sm:$0xff]  ;;  %v130_v25 = vld [vmem:[#allocation5 + $0x28] sm:$0xff]  ;;  %v133_v29 = vld [vmem:[#allocation5 + $0x40] sm:$0xff]  ;;  %v5027_v31 = vpack.c.bf16 %v146_v23, %v143_v21 }
  0x60   :  { %v150_v26 = vld [vmem:[#allocation5 + $0xc8] sm:$0xff]  ;;  %v5045_v28 = vpack.c.bf16 %v130_v25, %v127_v24  ;;  %v136_v30 = vld [vmem:[#allocation5 + $0x58] sm:$0xff]  ;;  %v149_v32 = vld [vmem:[#allocation5 + $0xc0] sm:$0xff] }
  0x61   :  { %5020 = vmatpush1.bf16.msra.mxu0 %v5019_v14  ;;  %v5049_v33 = vpack.c.bf16 %v136_v30, %v133_v29  ;;  %v5029_v34 = vpack.c.bf16 %v153_v27, %v150_v26  ;;  %v152_v35 = vld [vmem:[#allocation5 + $0xd8] sm:$0xff]  ;;  %v6636_v36 = vld [vmem:[%s7669_s0] sm:$0xff]  ;;  %v139_v37 = vld [vmem:[#allocation5 + $0x70] sm:$0xff] }
  0x62   :  { %5022 = vmatprep.subr.bf16.mxu0 %v5021_v15  ;;  %5046 = vmatprep.subr.bf16.mxu1 %v5045_v28  ;;  %v156_v38 = vld [vmem:[#allocation5 + $0xf8] sm:$0xff]  ;;  %v159_v39 = vld [vmem:[#allocation5 + $0x110] sm:$0xff]  ;;  %v142_v40 = vld [vmem:[#allocation5 + $0x88] sm:$0xff]  ;;  %v5031_v42 = vpack.c.bf16 %v152_v35, %v149_v32 }
  0x63   :  { %5048 = vmatpush3.bf16.msra.mxu1 %v5045_v28  ;;  %4309 = vmatprep.mubr.f32.mxu1 %v6636_v36  ;;  %v5053_v41 = vpack.c.bf16 %v142_v40, %v139_v37  ;;  %v145_v43 = vld [vmem:[#allocation5 + $0xa0] sm:$0xff]  ;;  %v148_v44 = vld [vmem:[#allocation5 + $0xb8] sm:$0xff]  ;;  %v5033_v45 = vpack.c.bf16 %v159_v39, %v156_v38  ;;  %v155_v46 = vld [vmem:[#allocation5 + $0xf0] sm:$0xff]  ;;  %v6464_v40 = vmov 0.0|0.0  }
  0x64   :  { %5050 = vmatprep.subr.bf16.mxu1 %v5049_v33  ;;  %v158_v47 = vld [vmem:[#allocation5 + $0x108] sm:$0xff]  ;;  %v165_v49 = vld [vmem:[#allocation5 + $0x140] sm:$0xff]  ;;  %v5057_v50 = vpack.c.bf16 %v148_v44, %v145_v43  ;;  %v151_v51 = vld [vmem:[#allocation5 + $0xd0] sm:$0xff] }
  0x65   :  { %5024 = vmatpush1.bf16.msra.mxu0 %v5023_v20  ;;  %v162_v48 = vld [vmem:[#allocation5 + $0x128] sm:$0xff]  ;;  %v5035_v53 = vpack.c.bf16 %v158_v47, %v155_v46  ;;  %v161_v55 = vld [vmem:[#allocation5 + $0x120] sm:$0xff]  ;;  %v164_v56 = vld [vmem:[#allocation5 + $0x138] sm:$0xff] }
  0x66   :  { %5026 = vmatprep.subr.bf16.mxu0 %v5025_v22  ;;  %v154_v52 = vld [vmem:[#allocation5 + $0xe8] sm:$0xff]  ;;  %v5037_v54 = vpack.c.bf16 %v165_v49, %v162_v48  ;;  %v168_v57 = vld [vmem:[#allocation5 + $0x158] sm:$0xff]  ;;  %v171_v58 = vld [vmem:[#allocation5 + $0x170] sm:$0xff]  ;;  %v5039_v62 = vpack.c.bf16 %v164_v56, %v161_v55 }
  0x67   :  { %5052 = vmatpush3.bf16.msra.mxu1 %v5049_v33  ;;  %v5061_v59 = vpack.c.bf16 %v154_v52, %v151_v51  ;;  %v157_v60 = vld [vmem:[#allocation5 + $0x100] sm:$0xff]  ;;  %v160_v61 = vld [vmem:[#allocation5 + $0x118] sm:$0xff]  ;;  %v5041_v63 = vpack.c.bf16 %v171_v58, %v168_v57  ;;  %v167_v1 = vld [vmem:[#allocation5 + $0x150] sm:$0xff] }
  0x68   :  { %5054 = vmatprep.subr.bf16.mxu1 %v5053_v41  ;;  %v170_v2 = vld [vmem:[#allocation5 + $0x168] sm:$0xff]  ;;  %v436_v4 = vld [vmem:[#allocation7 + $0x20] sm:$0xff]  ;;  %v5065_v5 = vpack.c.bf16 %v160_v61, %v157_v60  ;;  %v163_v6 = vld [vmem:[#allocation5 + $0x130] sm:$0xff] }
  0x69   :  { %5028 = vmatpush1.bf16.msra.mxu0 %v5027_v31  ;;  %v433_v3 = vld [vmem:[#allocation7 + $0x8] sm:$0xff]  ;;  %v5043_v8 = vpack.c.bf16 %v170_v2, %v167_v1  ;;  %v432_v10 = vld [vmem:[#allocation7] sm:$0xff]  ;;  %v435_v11 = vld [vmem:[#allocation7 + $0x18] sm:$0xff] }
  0x6a   :  { %5030 = vmatprep.subr.bf16.mxu0 %v5029_v34  ;;  %v166_v7 = vld [vmem:[#allocation5 + $0x148] sm:$0xff]  ;;  %v6639_v9 = vpack.c.bf16 %v436_v4, %v433_v3  ;;  %v439_v12 = vld [vmem:[#allocation7 + $0x38] sm:$0xff]  ;;  %v442_v13 = vld [vmem:[#allocation7 + $0x50] sm:$0xff]  ;;  %v6641_v17 = vpack.c.bf16 %v435_v11, %v432_v10 }
  0x6b   :  { %5056 = vmatpush3.bf16.msra.mxu1 %v5053_v41  ;;  %v5069_v14 = vpack.c.bf16 %v166_v7, %v163_v6  ;;  %v169_v15 = vld [vmem:[#allocation5 + $0x160] sm:$0xff]  ;;  %v172_v16 = vld [vmem:[#allocation5 + $0x178] sm:$0xff]  ;;  %v6644_v18 = vpack.c.bf16 %v442_v13, %v439_v12  ;;  %v438_v19 = vld [vmem:[#allocation7 + $0x30] sm:$0xff] }
  0x6c   :  { %5058 = vmatprep.subr.bf16.mxu1 %v5057_v50  ;;  %v441_v20 = vld [vmem:[#allocation7 + $0x48] sm:$0xff]  ;;  %v448_v22 = vld [vmem:[#allocation7 + $0x80] sm:$0xff]  ;;  %v5073_v23 = vpack.c.bf16 %v172_v16, %v169_v15  ;;  %v447_v28 = vld [vmem:[#allocation7 + $0x78] sm:$0xff] }
  0x6d   :  { %5032 = vmatpush1.bf16.msra.mxu0 %v5031_v42  ;;  %v445_v21 = vld [vmem:[#allocation7 + $0x68] sm:$0xff]  ;;  %v6652_v25 = vpack.c.bf16 %v441_v20, %v438_v19  ;;  %v444_v27 = vld [vmem:[#allocation7 + $0x60] sm:$0xff]  ;;  %v451_v29 = vld [vmem:[#allocation7 + $0x98] sm:$0xff] }
  0x6e   :  { %5034 = vmatprep.subr.bf16.mxu0 %v5033_v45  ;;  %v118_v24 = vld [vmem:[%s7669_s0 + $0x8] sm:$0xff]  ;;  %v6655_v26 = vpack.c.bf16 %v448_v22, %v445_v21  ;;  %v454_v30 = vld [vmem:[#allocation7 + $0xb0] sm:$0xff]  ;;  %v6662_v34 = vpack.c.bf16 %v447_v28, %v444_v27  ;;  %v460_v39 = vld [vmem:[#allocation7 + $0xe0] sm:$0xff] }
  0x6f   :  { %5060 = vmatpush3.bf16.msra.mxu1 %v5057_v50  ;;  %v434_v31 = vld [vmem:[#allocation7 + $0x10] sm:$0xff]  ;;  %v437_v32 = vld [vmem:[#allocation7 + $0x28] sm:$0xff]  ;;  %v6665_v35 = vpack.c.bf16 %v454_v30, %v451_v29  ;;  %v440_v42 = vld [vmem:[#allocation7 + $0x40] sm:$0xff] }
  0x70   :  { %5062 = vmatprep.subr.bf16.mxu1 %v5061_v59  ;;  %v119_v33 = vld [vmem:[%s7669_s0 + $0x10] sm:$0xff]  ;;  %v453_v37 = vld [vmem:[#allocation7 + $0xa8] sm:$0xff]  ;;  %v6668_v41 = vpack.c.bf16 %v437_v32, %v434_v31  ;;  %v443_v43 = vld [vmem:[#allocation7 + $0x58] sm:$0xff] }
  0x71   :  { %5036 = vmatpush1.bf16.msra.mxu0 %v5035_v53  ;;  %v457_v38 = vld [vmem:[#allocation7 + $0xc8] sm:$0xff]  ;;  %v120_v44 = vld [vmem:[%s7669_s0 + $0x18] sm:$0xff]  ;;  %v456_v47 = vld [vmem:[#allocation7 + $0xc0] sm:$0xff]  ;;  %v6681_v51 = vpack.c.bf16 %v443_v43, %v440_v42 }
  0x72   :  { %5038 = vmatprep.subr.bf16.mxu0 %v5037_v54  ;;  %v6678_v46 = vpack.c.bf16 %v460_v39, %v457_v38  ;;  %v459_v48 = vld [vmem:[#allocation7 + $0xd8] sm:$0xff]  ;;  %v466_v50 = vld [vmem:[#allocation7 + $0x110] sm:$0xff]  ;;  %v449_v53 = vld [vmem:[#allocation7 + $0x88] sm:$0xff] }
  0x73   :  { %5064 = vmatpush3.bf16.msra.mxu1 %v5061_v59  ;;  %v463_v49 = vld [vmem:[#allocation7 + $0xf8] sm:$0xff]  ;;  %v446_v52 = vld [vmem:[#allocation7 + $0x70] sm:$0xff]  ;;  %v121_v54 = vld [vmem:[%s7669_s0 + $0x20] sm:$0xff]  ;;  %v6689_v55 = vpack.c.bf16 %v459_v48, %v456_v47 }
  0x74   :  { %5066 = vmatprep.subr.bf16.mxu1 %v5065_v5  ;;  %v6692_v56 = vpack.c.bf16 %v466_v50, %v463_v49  ;;  %v462_v57 = vld [vmem:[#allocation7 + $0xf0] sm:$0xff]  ;;  %v465_v58 = vld [vmem:[#allocation7 + $0x108] sm:$0xff]  ;;  %v472_v60 = vld [vmem:[#allocation7 + $0x140] sm:$0xff]  ;;  %v6695_v61 = vpack.c.bf16 %v449_v53, %v446_v52 }
  0x75   :  { %5040 = vmatpush1.bf16.msra.mxu0 %v5039_v62  ;;  %v469_v59 = vld [vmem:[#allocation7 + $0x128] sm:$0xff]  ;;  %v452_v62 = vld [vmem:[#allocation7 + $0xa0] sm:$0xff]  ;;  %v6703_v2 = vpack.c.bf16 %v465_v58, %v462_v57  ;;  %v123_v3 = vld [vmem:[%s7669_s0 + $0x30] sm:$0xff] }
  0x76   :  { %5042 = vmatprep.subr.bf16.mxu0 %v5041_v63  ;;  %v455_v63 = vld [vmem:[#allocation7 + $0xb8] sm:$0xff]  ;;  %v122_v1 = vld [vmem:[%s7669_s0 + $0x28] sm:$0xff]  ;;  %v6709_v4 = vpack.c.bf16 %v472_v60, %v469_v59  ;;  %v458_v11 = vld [vmem:[#allocation7 + $0xd0] sm:$0xff] }
  0x77   :  { %5068 = vmatpush3.bf16.msra.mxu1 %v5065_v5  ;;  %v468_v5 = vld [vmem:[#allocation7 + $0x120] sm:$0xff]  ;;  %v471_v6 = vld [vmem:[#allocation7 + $0x138] sm:$0xff]  ;;  %v6712_v10 = vpack.c.bf16 %v455_v63, %v452_v62  ;;  %v461_v12 = vld [vmem:[#allocation7 + $0xe8] sm:$0xff] }
  0x78   :  { %5070 = vmatprep.subr.bf16.mxu1 %v5069_v14  ;;  %v475_v7 = vld [vmem:[#allocation7 + $0x158] sm:$0xff]  ;;  %v6717_v13 = vpack.c.bf16 %v471_v6, %v468_v5  ;;  %v474_v16 = vld [vmem:[#allocation7 + $0x150] sm:$0xff]  ;;  %v477_v19 = vld [vmem:[#allocation7 + $0x168] sm:$0xff]  ;;  %v6726_v20 = vpack.c.bf16 %v461_v12, %v458_v11 }
  0x79   :  { %5044 = vmatpush1.bf16.msra.mxu0 %v5043_v8  ;;  %v478_v8 = vld [vmem:[#allocation7 + $0x170] sm:$0xff]  ;;  %v464_v21 = vld [vmem:[#allocation7 + $0x100] sm:$0xff]  ;;  %v467_v22 = vld [vmem:[#allocation7 + $0x118] sm:$0xff] }
  0x7a   :  { %5078 = vmatprep.subr.bf16.mxu0 %v6639_v9  ;;  %v6723_v15 = vpack.c.bf16 %v478_v8, %v475_v7  ;;  %v470_v27 = vld [vmem:[#allocation7 + $0x130] sm:$0xff]  ;;  %v473_v28 = vld [vmem:[#allocation7 + $0x148] sm:$0xff]  ;;  %v6745_v29 = vld [vmem:[%s7670_s1] sm:$0xff] }
  0x7b   :  { %5072 = vmatpush3.bf16.msra.mxu1 %v5069_v14  ;;  %v124_v14 = vld [vmem:[%s7669_s0 + $0x38] sm:$0xff]  ;;  %v6749_v30 = vpack.c.bf16 %v473_v28, %v470_v27  ;;  %v476_v31 = vld [vmem:[#allocation7 + $0x160] sm:$0xff] }
  0x7c   :  { %255 = vmatmul.mubr.f32.vlgmr.msra.gmra.mrb[0].mxu0 %v6636_v36  ;;  %5074 = vmatprep.subr.bf16.mxu1 %v5073_v23  ;;  %v450_v36 = vld [vmem:[#allocation7 + $0x90] sm:$0xff]  ;;  %v479_v32 = vld [vmem:[#allocation7 + $0x178] sm:$0xff]  ;;  %v173_v39 = vld [vmem:[%s7673_s4] sm:$0x7] }
  0x7d   :  { %5080 = vmatpush1.bf16.msra.mxu0 %v6641_v17  ;;  %260 = vmatprep.mubr.f32.mxu0 %v6463_v0  ;;  %v6675_v45 = vpack.c.bf16 %v453_v37, %v450_v36  ;;  %v175_v36 = vlaneseq }
  0x7e   :  { %5082 = vmatprep.subr.bf16.mxu0 %v6644_v18 }
  0x7f   :  { %5076 = vmatpush3.bf16.msra.mxu1 %v5073_v23  ;;  %v6733_v23 = vpack.c.bf16 %v477_v19, %v474_v16  ;;  %v6795_v37 = vshrl.u32 %v175_v36, 7 }
  0x80   :  { %261 = vmatmul.mubr.f32.gmra.mrb[2].mxu0 %v118_v24  ;;  %5109 = vmatprep.subr.bf16.mxu1 %v6464_v40 }
  0x81   :  { %5084 = vmatpush1.bf16.msra.mxu0 %v6652_v25  ;;  %266 = vmatprep.mubr.f32.mxu0 %v6463_v0  ;;  %v185_v38 = vsub.s32 2, %v6795_v37 }
  0x82   :  { %5086 = vmatprep.subr.bf16.mxu0 %v6655_v26  ;;  %4310 = vmatmul.mubr.f32.vlgmr.msra.gmra.mrb[0].mxu1 %v118_v24  ;;  %v6737_v24 = vpack.c.bf16 %v467_v22, %v464_v21 }
  0x83   :  { %5111 = vmatpush3.bf16.msra.mxu1 %v6668_v41  ;;  %4312 = vmatprep.mubr.f32.mxu1 %v119_v33  ;;  %v186_v42 = vrot.slane %v173_v39, %v185_v38 }
  0x84   :  { %267 = vmatmul.mubr.f32.gmra.mrb[4].mxu0 %v119_v33  ;;  %5112 = vmatprep.subr.bf16.mxu1 %v6464_v40  ;;  %v6757_v33 = vpack.c.bf16 %v479_v32, %v476_v31  ;;  %v6832_v31 = vld [vmem:[%s7674_s5] ss:$0 sm:$0xff] }
  0x85   :  { %5088 = vmatpush1.bf16.msra.mxu0 %v6662_v34  ;;  %272 = vmatprep.mubr.f32.mxu0 %v6463_v0 }
  0x86   :  { %5090 = vmatprep.subr.bf16.mxu0 %v6665_v35  ;;  %4313 = vmatmul.mubr.f32.gmra.mrb[2].mxu1 %v120_v44 }
  0x87   :  { %5114 = vmatpush3.bf16.msra.mxu1 %v6681_v51  ;;  %4315 = vmatprep.mubr.f32.mxu1 %v121_v54 }
  0x88   :  { %273 = vmatmul.mubr.f32.gmra.mrb[6].mxu0 %v120_v44  ;;  %5115 = vmatprep.subr.bf16.mxu1 %v6464_v40 }
  0x89   :  { %5092 = vmatpush1.bf16.msra.mxu0 %v6675_v45  ;;  %278 = vmatprep.mubr.f32.mxu0 %v6463_v0 }
  0x8a   :  { %5094 = vmatprep.subr.bf16.mxu0 %v6678_v46  ;;  %4316 = vmatmul.mubr.f32.gmra.mrb[4].mxu1 %v122_v1 }
  0x8b   :  { %5117 = vmatpush3.bf16.msra.mxu1 %v6695_v61  ;;  %4318 = vmatprep.mubr.f32.mxu1 %v123_v3 }
  0x8c   :  { %279 = vmatmul.mubr.f32.gmra.mrb[8].mxu0 %v121_v54  ;;  %5118 = vmatprep.subr.bf16.mxu1 %v6464_v40 }
  0x8d   :  { %5096 = vmatpush1.bf16.msra.mxu0 %v6689_v55  ;;  %284 = vmatprep.mubr.f32.mxu0 %v6463_v0 }
  0x8e   :  { %5098 = vmatprep.subr.bf16.mxu0 %v6692_v56  ;;  %4319 = vmatmul.mubr.f32.gmra.mrb[6].mxu1 %v124_v14 }
  0x8f   :  { %5120 = vmatpush3.bf16.msra.mxu1 %v6712_v10  ;;  %4353 = vmatprep.mubr.msk.f32.mxu1 %vm6465_vm0, %v6463_v0 }
  0x90   :  { %285 = vmatmul.mubr.f32.gmra.mrb[10].mxu0 %v122_v1  ;;  %5121 = vmatprep.subr.bf16.mxu1 %v6464_v40  ;;  %v177_v1 = vsub.s32 0, %v6795_v37 }
  0x91   :  { %5100 = vmatpush1.bf16.msra.mxu0 %v6703_v2  ;;  %290 = vmatprep.mubr.f32.mxu0 %v6463_v0 }
  0x92   :  { %5102 = vmatprep.subr.bf16.mxu0 %v6709_v4  ;;  %v6821_v5 = vrot.slane %v173_v39, %v177_v1 }
  0x93   :  { %5123 = vmatpush3.bf16.msra.mxu1 %v6726_v20 }
  0x94   :  { %291 = vmatmul.mubr.f32.gmra.mrb[12].mxu0 %v123_v3  ;;  %5124 = vmatprep.subr.bf16.mxu1 %v6464_v40  ;;  %v181_v3 = vsub.s32 1, %v6795_v37 }
  0x95   :  { %5104 = vmatpush1.bf16.msra.mxu0 %v6717_v13  ;;  %296 = vmatprep.mubr.f32.mxu0 %v6463_v0 }
  0x96   :  { %5106 = vmatprep.subr.bf16.mxu0 %v6723_v15  ;;  %v6825_v7 = vrot.slane %v173_v39, %v181_v3 }
  0x97   :  { %5126 = vmatpush3.bf16.msra.mxu1 %v6737_v24 }
  0x98   :  { %297 = vmatmul.mubr.f32.gmra.mrb[14].mxu0 %v124_v14  ;;  %5127 = vmatprep.subr.bf16.mxu1 %v6464_v40 }
  0x99   :  { %5108 = vmatpush1.bf16.msra.mxu0 %v6733_v23  ;;  %558 = vmatprep.mubr.f32.mxu0 %v6463_v0 }
  0x9a   :  { %5134 = vmatprep.subr.bf16.mxu0 %v6639_v9 }
  0x9b   :  { %5129 = vmatpush3.bf16.msra.mxu1 %v6749_v30 }
  0x9c   :  { %559 = vmatmul.mubr.f32.vlgmr.msra.gmra.mrb[0].mxu0 %v6745_v29  ;;  %5130 = vmatprep.subr.bf16.mxu1 %v6464_v40 }
  0x9d   :  { %5136 = vmatpush1.bf16.msra.mxu0 %v6641_v17  ;;  %728 = vmatprep.mubr.f32.mxu0 %v6463_v0 }
  0x9e   :  { %5138 = vmatprep.subr.bf16.mxu0 %v6644_v18 }
  0x9f   :  { %5132 = vmatpush3.bf16.msra.mxu1 %v6757_v33 }
  0xa0   :  { %5165 = vmatprep.subr.bf16.mxu1 %v6464_v40 }
  0xa1   :  { %5140 = vmatpush1.bf16.msra.mxu0 %v6652_v25 }
  0xa2   :  { %5142 = vmatprep.subr.bf16.mxu0 %v6655_v26  ;;  %4354 = vmatmul.mubr.f32.vlgmr.msra.gmra.mrb[8].mxu1 %v6745_v29 }
  0xa3   :  { %5167 = vmatpush3.bf16.msra.mxu1 %v6668_v41  ;;  %4388 = vmatprep.mubr.msk.f32.mxu1 %vm6465_vm0, %v6463_v0 }
  0xa4   :  { %5168 = vmatprep.subr.bf16.mxu1 %v6464_v40 }
  0xa5   :  { %5144 = vmatpush1.bf16.msra.mxu0 %v6662_v34 }
  0xa6   :  { %5146 = vmatprep.subr.bf16.mxu0 %v6665_v35 }
  0xa7   :  { %5170 = vmatpush3.bf16.msra.mxu1 %v6681_v51 }
  0xa8   :  { %5171 = vmatprep.subr.bf16.mxu1 %v6464_v40 }
  0xa9   :  { %5148 = vmatpush1.bf16.msra.mxu0 %v6675_v45 }
  0xaa   :  { %5150 = vmatprep.subr.bf16.mxu0 %v6678_v46 }
  0xab   :  { %5173 = vmatpush3.bf16.msra.mxu1 %v6695_v61 }
  0xac   :  { %5174 = vmatprep.subr.bf16.mxu1 %v6464_v40 }
  0xad   :  { %5152 = vmatpush1.bf16.msra.mxu0 %v6689_v55 }
  0xae   :  { %5154 = vmatprep.subr.bf16.mxu0 %v6692_v56 }
  0xaf   :  { %5176 = vmatpush3.bf16.msra.mxu1 %v6712_v10 }
  0xb0   :  { %5177 = vmatprep.subr.bf16.mxu1 %v6464_v40 }
  0xb1   :  { %5156 = vmatpush1.bf16.msra.mxu0 %v6703_v2 }
  0xb2   :  { %5158 = vmatprep.subr.bf16.mxu0 %v6709_v4 }
  0xb3   :  { %5179 = vmatpush3.bf16.msra.mxu1 %v6726_v20 }
  0xb4   :  { %5180 = vmatprep.subr.bf16.mxu1 %v6464_v40 }
  0xb5   :  { %5160 = vmatpush1.bf16.msra.mxu0 %v6717_v13 }
  0xb6   :  { %5162 = vmatprep.subr.bf16.mxu0 %v6723_v15 }
  0xb7   :  { %5182 = vmatpush3.bf16.msra.mxu1 %v6737_v24 }
  0xb8   :  { %5183 = vmatprep.subr.bf16.mxu1 %v6464_v40 }
  0xb9   :  { %5164 = vmatpush1.bf16.msra.mxu0 %v6733_v23 }
  0xba   :  { %5190 = vmatprep.subr.bf16.mxu0 %v6639_v9 }
  0xbb   :  { %5185 = vmatpush3.bf16.msra.mxu1 %v6749_v30 }
  0xbc   :  { %5186 = vmatprep.subr.bf16.mxu1 %v6464_v40 }
  0xbf   :  { %5188 = vmatpush3.bf16.msra.mxu1 %v6757_v33 }
  0xc0   :  { %5221 = vmatprep.subr.bf16.mxu1 %v6464_v40 }
 0x155   :  { %v4311_v43 = vpop.f32.mrb[0].mxu1 }
 0x156   :  { %v6803_v44 = vadd.f32 %v4311_v43, %v186_v42  ;;  %v369_v47 = vpop.f32.mrb[1].mxu1 }
 0x157   :  { %v370_v43 = vadd.f32 %v369_v47, %v186_v42 }
 0x159   :  { %v4314_v48 = vpop.f32.mrb[2].mxu1 }
 0x15a   :  { %v6805_v49 = vadd.f32 %v4314_v48, %v186_v42  ;;  %v379_v50 = vpop.f32.mrb[3].mxu1 }
 0x15b   :  { %v6807_v52 = vadd.f32 %v379_v50, %v186_v42 }
 0x15d   :  { %v4317_v53 = vpop.f32.mrb[4].mxu1 }
 0x15e   :  { %v6809_v54 = vadd.f32 %v4317_v53, %v186_v42  ;;  %v389_v57 = vpop.f32.mrb[5].mxu1 }
 0x15f   :  { %v6811_v58 = vadd.f32 %v389_v57, %v186_v42 }
 0x161   :  { %v4320_v59 = vpop.f32.mrb[6].mxu1 }
 0x162   :  { %v6813_v60 = vadd.f32 %v4320_v59, %v186_v42  ;;  %v399_v62 = vpop.f32.mrb[7].mxu1 }
 0x163   :  { %v6815_v63 = vadd.f32 %v399_v62, %v186_v42 }
 0x16f   :  { %v560_v6 = vpop.f32.mrb[0].mxu0 }
 0x170   :  { %v6101_v8 = vadd.f32 %v560_v6, %v6821_v5  ;;  %v562_v11 = vpop.f32.mrb[1].mxu0 }
 0x171   :  { %v6102_v14 = vadd.f32 %v562_v11, %v6825_v7 }
 0x172   :  { %v3872_v12 = vmul.f32 -1.442695, %v6101_v8 }
 0x173   :  { %v3873_v16 = vmul.f32 -1.442695, %v6102_v14 }
 0x174   :  { %6177 = vpow2.f32 %v3872_v12 }
 0x175   :  { %v631_v19 = vpop.f32.mrb[8].mxu1  ;;  %6179 = vpow2.f32 %v3873_v16 }
 0x176   :  { %v4355_v21 = vpop.f32.mrb[9].mxu1  ;;  %v649_v36 = vadd.f32 %v6832_v31, %v631_v19 }
 0x17e   :  { %v6178_v22 = vpop.eup %6177 }
 0x17f   :  { %v643_v27 = vadd.f32 1.0, %v6178_v22  ;;  %v6180_v28 = vpop.eup %6179 }
 0x180   :  { %v644_v32 = vadd.f32 1.0, %v6180_v28 }
 0x181   :  { %6181 = vrcp.f32 %v643_v27 }
 0x182   :  { %6183 = vrcp.f32 %v644_v32 }
 0x18b   :  { %v6182_v39 = vpop.eup %6181 }
 0x18c   :  { %v650_v48 = vmul.f32 %v6182_v39, %v649_v36  ;;  %v6184_v53 = vpop.eup %6183 }
 0x18d   :  { %v653_v57 = vsub.f32 1.0, %v6184_v53  ;;  %v655_v6 = vmul.f32 %v6184_v53, %v6745_v29 }
 0x18e   :  { %v651_v50 = vadd.f32 %v650_v48, %v370_v43 }
 0x190   :  { %6185 = vtanh.f32 %v651_v50 }
 0x19a   :  { %v6186_v59 = vpop.eup %6185 }
 0x19b   :  { %v654_v62 = vmul.f32 %v6186_v59, %v653_v57 }
 0x19d   :  { %v6836_v8 = vadd.f32 %v655_v6, %v654_v62 }
 0x19f   :  { %729 = vmatmul.mubr.f32.vlgmr.msra.gmra.mrb[2].mxu0 %v6836_v8  ;;  %4389 = vmatmul.mubr.f32.vlgmr.msra.gmra.mrb[10].mxu1 %v6836_v8 }
 0x1a0   :  { %5192 = vmatpush1.bf16.msra.mxu0 %v6641_v17  ;;  %5223 = vmatpush3.bf16.msra.mxu1 %v6668_v41 }
 0x1a1   :  { %5194 = vmatprep.subr.bf16.mxu0 %v6644_v18  ;;  %5224 = vmatprep.subr.bf16.mxu1 %v6464_v40 }
 0x1a2   :  { %899 = vmatprep.mubr.f32.mxu0 %v6463_v0  ;;  %4423 = vmatprep.mubr.msk.f32.mxu1 %vm6465_vm0, %v6463_v0 }
 0x1a4   :  { %5196 = vmatpush1.bf16.msra.mxu0 %v6652_v25  ;;  %5226 = vmatpush3.bf16.msra.mxu1 %v6681_v51 }
 0x1a5   :  { %5198 = vmatprep.subr.bf16.mxu0 %v6655_v26  ;;  %5227 = vmatprep.subr.bf16.mxu1 %v6464_v40 }
 0x1a8   :  { %5200 = vmatpush1.bf16.msra.mxu0 %v6662_v34  ;;  %5229 = vmatpush3.bf16.msra.mxu1 %v6695_v61 }
 0x1a9   :  { %5202 = vmatprep.subr.bf16.mxu0 %v6665_v35  ;;  %5230 = vmatprep.subr.bf16.mxu1 %v6464_v40 }
 0x1ac   :  { %5204 = vmatpush1.bf16.msra.mxu0 %v6675_v45  ;;  %5232 = vmatpush3.bf16.msra.mxu1 %v6712_v10 }
 0x1ad   :  { %5206 = vmatprep.subr.bf16.mxu0 %v6678_v46  ;;  %5233 = vmatprep.subr.bf16.mxu1 %v6464_v40 }
 0x1b0   :  { %5208 = vmatpush1.bf16.msra.mxu0 %v6689_v55  ;;  %5235 = vmatpush3.bf16.msra.mxu1 %v6726_v20 }
 0x1b1   :  { %5210 = vmatprep.subr.bf16.mxu0 %v6692_v56  ;;  %5236 = vmatprep.subr.bf16.mxu1 %v6464_v40 }
 0x1b4   :  { %5212 = vmatpush1.bf16.msra.mxu0 %v6703_v2  ;;  %5238 = vmatpush3.bf16.msra.mxu1 %v6737_v24 }
 0x1b5   :  { %5214 = vmatprep.subr.bf16.mxu0 %v6709_v4  ;;  %5239 = vmatprep.subr.bf16.mxu1 %v6464_v40 }
 0x1b8   :  { %5216 = vmatpush1.bf16.msra.mxu0 %v6717_v13  ;;  %5241 = vmatpush3.bf16.msra.mxu1 %v6749_v30 }
 0x1b9   :  { %5218 = vmatprep.subr.bf16.mxu0 %v6723_v15  ;;  %5242 = vmatprep.subr.bf16.mxu1 %v6464_v40 }
 0x1bc   :  { %5220 = vmatpush1.bf16.msra.mxu0 %v6733_v23  ;;  %5244 = vmatpush3.bf16.msra.mxu1 %v6757_v33 }
 0x1bd   :  { %5246 = vmatprep.subr.bf16.mxu0 %v6639_v9  ;;  %5277 = vmatprep.subr.bf16.mxu1 %v6464_v40 }
 0x272   :  { %v730_v29 = vpop.f32.mrb[2].mxu0  ;;  %v801_v42 = vpop.f32.mrb[10].mxu1 }
 0x273   :  { %v6103_v47 = vadd.f32 %v730_v29, %v6821_v5  ;;  %v732_v11 = vpop.f32.mrb[3].mxu0  ;;  %v4390_v12 = vpop.f32.mrb[11].mxu1  ;;  %v819_v32 = vadd.f32 %v6832_v31, %v801_v42 }
 0x274   :  { %v6104_v16 = vadd.f32 %v732_v11, %v6825_v7 }
 0x275   :  { %v3874_v14 = vmul.f32 -1.442695, %v6103_v47 }
 0x276   :  { %v3875_v19 = vmul.f32 -1.442695, %v6104_v16 }
 0x277   :  { %6187 = vpow2.f32 %v3874_v14 }
 0x278   :  { %6189 = vpow2.f32 %v3875_v19 }
 0x281   :  { %v6188_v21 = vpop.eup %6187 }
 0x282   :  { %v813_v22 = vadd.f32 1.0, %v6188_v21  ;;  %v6190_v27 = vpop.eup %6189 }
 0x283   :  { %v814_v28 = vadd.f32 1.0, %v6190_v27 }
 0x284   :  { %6191 = vrcp.f32 %v813_v22 }
 0x285   :  { %6193 = vrcp.f32 %v814_v28 }
 0x28e   :  { %v6192_v36 = vpop.eup %6191 }
 0x28f   :  { %v820_v39 = vmul.f32 %v6192_v36, %v819_v32  ;;  %v6194_v48 = vpop.eup %6193 }
 0x290   :  { %v823_v50 = vsub.f32 1.0, %v6194_v48  ;;  %v825_v59 = vmul.f32 %v6194_v48, %v6836_v8 }
 0x291   :  { %v821_v43 = vadd.f32 %v820_v39, %v6803_v44 }
 0x293   :  { %6195 = vtanh.f32 %v821_v43 }
 0x29d   :  { %v6196_v53 = vpop.eup %6195 }
 0x29e   :  { %v824_v57 = vmul.f32 %v6196_v53, %v823_v50 }
 0x2a0   :  { %v6880_v62 = vadd.f32 %v825_v59, %v824_v57 }
 0x2a2   :  { %900 = vmatmul.mubr.f32.vlgmr.msra.gmra.mrb[4].mxu0 %v6880_v62  ;;  %4424 = vmatmul.mubr.f32.vlgmr.msra.gmra.mrb[12].mxu1 %v6880_v62 }
 0x2a3   :  { %5248 = vmatpush1.bf16.msra.mxu0 %v6641_v17  ;;  %5279 = vmatpush3.bf16.msra.mxu1 %v6668_v41 }
 0x2a4   :  { %5250 = vmatprep.subr.bf16.mxu0 %v6644_v18  ;;  %5280 = vmatprep.subr.bf16.mxu1 %v6464_v40 }
 0x2a5   :  { %1070 = vmatprep.mubr.f32.mxu0 %v6463_v0  ;;  %4458 = vmatprep.mubr.msk.f32.mxu1 %vm6465_vm0, %v6463_v0 }
 0x2a7   :  { %5252 = vmatpush1.bf16.msra.mxu0 %v6652_v25  ;;  %5282 = vmatpush3.bf16.msra.mxu1 %v6681_v51 }
 0x2a8   :  { %5254 = vmatprep.subr.bf16.mxu0 %v6655_v26  ;;  %5283 = vmatprep.subr.bf16.mxu1 %v6464_v40 }
 0x2ab   :  { %5256 = vmatpush1.bf16.msra.mxu0 %v6662_v34  ;;  %5285 = vmatpush3.bf16.msra.mxu1 %v6695_v61 }
 0x2ac   :  { %5258 = vmatprep.subr.bf16.mxu0 %v6665_v35  ;;  %5286 = vmatprep.subr.bf16.mxu1 %v6464_v40 }
 0x2af   :  { %5260 = vmatpush1.bf16.msra.mxu0 %v6675_v45  ;;  %5288 = vmatpush3.bf16.msra.mxu1 %v6712_v10 }
 0x2b0   :  { %5262 = vmatprep.subr.bf16.mxu0 %v6678_v46  ;;  %5289 = vmatprep.subr.bf16.mxu1 %v6464_v40 }
 0x2b3   :  { %5264 = vmatpush1.bf16.msra.mxu0 %v6689_v55  ;;  %5291 = vmatpush3.bf16.msra.mxu1 %v6726_v20 }
 0x2b4   :  { %5266 = vmatprep.subr.bf16.mxu0 %v6692_v56  ;;  %5292 = vmatprep.subr.bf16.mxu1 %v6464_v40 }
 0x2b7   :  { %5268 = vmatpush1.bf16.msra.mxu0 %v6703_v2  ;;  %5294 = vmatpush3.bf16.msra.mxu1 %v6737_v24 }
 0x2b8   :  { %5270 = vmatprep.subr.bf16.mxu0 %v6709_v4  ;;  %5295 = vmatprep.subr.bf16.mxu1 %v6464_v40 }
 0x2bb   :  { %5272 = vmatpush1.bf16.msra.mxu0 %v6717_v13  ;;  %5297 = vmatpush3.bf16.msra.mxu1 %v6749_v30 }
 0x2bc   :  { %5274 = vmatprep.subr.bf16.mxu0 %v6723_v15  ;;  %5298 = vmatprep.subr.bf16.mxu1 %v6464_v40 }
 0x2bf   :  { %5276 = vmatpush1.bf16.msra.mxu0 %v6733_v23  ;;  %5300 = vmatpush3.bf16.msra.mxu1 %v6757_v33 }
 0x2c0   :  { %5302 = vmatprep.subr.bf16.mxu0 %v6639_v9  ;;  %5333 = vmatprep.subr.bf16.mxu1 %v6464_v40 }
 0x375   :  { %v901_v44 = vpop.f32.mrb[4].mxu0  ;;  %v972_v6 = vpop.f32.mrb[12].mxu1 }
 0x376   :  { %v6105_v29 = vadd.f32 %v901_v44, %v6821_v5  ;;  %v903_v42 = vpop.f32.mrb[5].mxu0  ;;  %v4425_v47 = vpop.f32.mrb[13].mxu1  ;;  %v990_v27 = vadd.f32 %v6832_v31, %v972_v6 }
 0x377   :  { %v6106_v12 = vadd.f32 %v903_v42, %v6825_v7 }
 0x378   :  { %v3876_v11 = vmul.f32 -1.442695, %v6105_v29 }
 0x379   :  { %v3877_v14 = vmul.f32 -1.442695, %v6106_v12 }
 0x37a   :  { %6197 = vpow2.f32 %v3876_v11 }
 0x37b   :  { %6199 = vpow2.f32 %v3877_v14 }
 0x384   :  { %v6198_v16 = vpop.eup %6197 }
 0x385   :  { %v984_v19 = vadd.f32 1.0, %v6198_v16  ;;  %v6200_v21 = vpop.eup %6199 }
 0x386   :  { %v985_v22 = vadd.f32 1.0, %v6200_v21 }
 0x387   :  { %6201 = vrcp.f32 %v984_v19 }
 0x388   :  { %6203 = vrcp.f32 %v985_v22 }
 0x391   :  { %v6202_v28 = vpop.eup %6201 }
 0x392   :  { %v991_v32 = vmul.f32 %v6202_v28, %v990_v27  ;;  %v6204_v39 = vpop.eup %6203 }
 0x393   :  { %v994_v43 = vsub.f32 1.0, %v6204_v39  ;;  %v996_v53 = vmul.f32 %v6204_v39, %v6880_v62 }
 0x394   :  { %v992_v36 = vadd.f32 %v991_v32, %v6807_v52 }
 0x396   :  { %6205 = vtanh.f32 %v992_v36 }
 0x3a0   :  { %v6206_v48 = vpop.eup %6205 }
 0x3a1   :  { %v995_v50 = vmul.f32 %v6206_v48, %v994_v43 }
 0x3a3   :  { %v6924_v57 = vadd.f32 %v996_v53, %v995_v50 }
 0x3a5   :  { %1071 = vmatmul.mubr.f32.vlgmr.msra.gmra.mrb[6].mxu0 %v6924_v57  ;;  %4459 = vmatmul.mubr.f32.vlgmr.msra.gmra.mrb[14].mxu1 %v6924_v57 }
 0x3a6   :  { %5304 = vmatpush1.bf16.msra.mxu0 %v6641_v17  ;;  %5335 = vmatpush3.bf16.msra.mxu1 %v6668_v41 }
 0x3a7   :  { %5306 = vmatprep.subr.bf16.mxu0 %v6644_v18  ;;  %5336 = vmatprep.subr.bf16.mxu1 %v6464_v40 }
 0x3a8   :  { %1241 = vmatprep.mubr.f32.mxu0 %v6463_v0  ;;  %4493 = vmatprep.mubr.msk.f32.mxu1 %vm6465_vm0, %v6463_v0 }
 0x3aa   :  { %5308 = vmatpush1.bf16.msra.mxu0 %v6652_v25  ;;  %5338 = vmatpush3.bf16.msra.mxu1 %v6681_v51 }
 0x3ab   :  { %5310 = vmatprep.subr.bf16.mxu0 %v6655_v26  ;;  %5339 = vmatprep.subr.bf16.mxu1 %v6464_v40 }
 0x3ae   :  { %5312 = vmatpush1.bf16.msra.mxu0 %v6662_v34  ;;  %5341 = vmatpush3.bf16.msra.mxu1 %v6695_v61 }
 0x3af   :  { %5314 = vmatprep.subr.bf16.mxu0 %v6665_v35  ;;  %5342 = vmatprep.subr.bf16.mxu1 %v6464_v40 }
 0x3b2   :  { %5316 = vmatpush1.bf16.msra.mxu0 %v6675_v45  ;;  %5344 = vmatpush3.bf16.msra.mxu1 %v6712_v10 }
 0x3b3   :  { %5318 = vmatprep.subr.bf16.mxu0 %v6678_v46  ;;  %5345 = vmatprep.subr.bf16.mxu1 %v6464_v40 }
 0x3b6   :  { %5320 = vmatpush1.bf16.msra.mxu0 %v6689_v55  ;;  %5347 = vmatpush3.bf16.msra.mxu1 %v6726_v20 }
 0x3b7   :  { %5322 = vmatprep.subr.bf16.mxu0 %v6692_v56  ;;  %5348 = vmatprep.subr.bf16.mxu1 %v6464_v40 }
 0x3ba   :  { %5324 = vmatpush1.bf16.msra.mxu0 %v6703_v2  ;;  %5350 = vmatpush3.bf16.msra.mxu1 %v6737_v24 }
 0x3bb   :  { %5326 = vmatprep.subr.bf16.mxu0 %v6709_v4  ;;  %5351 = vmatprep.subr.bf16.mxu1 %v6464_v40 }
 0x3be   :  { %5328 = vmatpush1.bf16.msra.mxu0 %v6717_v13  ;;  %5353 = vmatpush3.bf16.msra.mxu1 %v6749_v30 }
 0x3bf   :  { %5330 = vmatprep.subr.bf16.mxu0 %v6723_v15  ;;  %5354 = vmatprep.subr.bf16.mxu1 %v6464_v40 }
 0x3c2   :  { %5332 = vmatpush1.bf16.msra.mxu0 %v6733_v23  ;;  %5356 = vmatpush3.bf16.msra.mxu1 %v6757_v33 }
 0x3c3   :  { %5358 = vmatprep.subr.bf16.mxu0 %v6639_v9  ;;  %5389 = vmatprep.subr.bf16.mxu1 %v6464_v40 }
 0x478   :  { %v1072_v52 = vpop.f32.mrb[6].mxu0  ;;  %v1143_v59 = vpop.f32.mrb[14].mxu1 }
 0x479   :  { %v6107_v44 = vadd.f32 %v1072_v52, %v6821_v5  ;;  %v1074_v6 = vpop.f32.mrb[7].mxu0  ;;  %v4460_v29 = vpop.f32.mrb[15].mxu1  ;;  %v1161_v21 = vadd.f32 %v6832_v31, %v1143_v59 }
 0x47a   :  { %v6108_v47 = vadd.f32 %v1074_v6, %v6825_v7 }
 0x47b   :  { %v3878_v42 = vmul.f32 -1.442695, %v6107_v44 }
 0x47c   :  { %v3879_v11 = vmul.f32 -1.442695, %v6108_v47 }
 0x47d   :  { %6207 = vpow2.f32 %v3878_v42 }
 0x47e   :  { %6209 = vpow2.f32 %v3879_v11 }
 0x487   :  { %v6208_v12 = vpop.eup %6207 }
 0x488   :  { %v1155_v14 = vadd.f32 1.0, %v6208_v12  ;;  %v6210_v16 = vpop.eup %6209 }
 0x489   :  { %v1156_v19 = vadd.f32 1.0, %v6210_v16 }
 0x48a   :  { %6211 = vrcp.f32 %v1155_v14 }
 0x48b   :  { %6213 = vrcp.f32 %v1156_v19 }
 0x494   :  { %v6212_v22 = vpop.eup %6211 }
 0x495   :  { %v1162_v27 = vmul.f32 %v6212_v22, %v1161_v21  ;;  %v6214_v32 = vpop.eup %6213 }
 0x496   :  { %v1165_v36 = vsub.f32 1.0, %v6214_v32  ;;  %v1167_v48 = vmul.f32 %v6214_v32, %v6924_v57 }
 0x497   :  { %v1163_v28 = vadd.f32 %v1162_v27, %v6805_v49 }
 0x499   :  { %6215 = vtanh.f32 %v1163_v28 }
 0x4a3   :  { %v6216_v39 = vpop.eup %6215 }
 0x4a4   :  { %v1166_v43 = vmul.f32 %v6216_v39, %v1165_v36 }
 0x4a6   :  { %v6968_v50 = vadd.f32 %v1167_v48, %v1166_v43 }
 0x4a8   :  { %1242 = vmatmul.mubr.f32.vlgmr.msra.gmra.mrb[8].mxu0 %v6968_v50  ;;  %4494 = vmatmul.mubr.f32.vlgmr.msra.gmra.mrb[16].mxu1 %v6968_v50 }
 0x4a9   :  { %5360 = vmatpush1.bf16.msra.mxu0 %v6641_v17  ;;  %5391 = vmatpush3.bf16.msra.mxu1 %v6668_v41 }
 0x4aa   :  { %5362 = vmatprep.subr.bf16.mxu0 %v6644_v18  ;;  %5392 = vmatprep.subr.bf16.mxu1 %v6464_v40 }
 0x4ab   :  { %1412 = vmatprep.mubr.f32.mxu0 %v6463_v0  ;;  %4528 = vmatprep.mubr.msk.f32.mxu1 %vm6465_vm0, %v6463_v0 }
 0x4ad   :  { %5364 = vmatpush1.bf16.msra.mxu0 %v6652_v25  ;;  %5394 = vmatpush3.bf16.msra.mxu1 %v6681_v51 }
 0x4ae   :  { %5366 = vmatprep.subr.bf16.mxu0 %v6655_v26  ;;  %5395 = vmatprep.subr.bf16.mxu1 %v6464_v40 }
 0x4b1   :  { %5368 = vmatpush1.bf16.msra.mxu0 %v6662_v34  ;;  %5397 = vmatpush3.bf16.msra.mxu1 %v6695_v61 }
 0x4b2   :  { %5370 = vmatprep.subr.bf16.mxu0 %v6665_v35  ;;  %5398 = vmatprep.subr.bf16.mxu1 %v6464_v40 }
 0x4b5   :  { %5372 = vmatpush1.bf16.msra.mxu0 %v6675_v45  ;;  %5400 = vmatpush3.bf16.msra.mxu1 %v6712_v10 }
 0x4b6   :  { %5374 = vmatprep.subr.bf16.mxu0 %v6678_v46  ;;  %5401 = vmatprep.subr.bf16.mxu1 %v6464_v40 }
 0x4b9   :  { %5376 = vmatpush1.bf16.msra.mxu0 %v6689_v55  ;;  %5403 = vmatpush3.bf16.msra.mxu1 %v6726_v20 }
 0x4ba   :  { %5378 = vmatprep.subr.bf16.mxu0 %v6692_v56  ;;  %5404 = vmatprep.subr.bf16.mxu1 %v6464_v40 }
 0x4bd   :  { %5380 = vmatpush1.bf16.msra.mxu0 %v6703_v2  ;;  %5406 = vmatpush3.bf16.msra.mxu1 %v6737_v24 }
 0x4be   :  { %5382 = vmatprep.subr.bf16.mxu0 %v6709_v4  ;;  %5407 = vmatprep.subr.bf16.mxu1 %v6464_v40 }
 0x4c1   :  { %5384 = vmatpush1.bf16.msra.mxu0 %v6717_v13  ;;  %5409 = vmatpush3.bf16.msra.mxu1 %v6749_v30 }
 0x4c2   :  { %5386 = vmatprep.subr.bf16.mxu0 %v6723_v15  ;;  %5410 = vmatprep.subr.bf16.mxu1 %v6464_v40 }
 0x4c5   :  { %5388 = vmatpush1.bf16.msra.mxu0 %v6733_v23  ;;  %5412 = vmatpush3.bf16.msra.mxu1 %v6757_v33 }
 0x4c6   :  { %5414 = vmatprep.subr.bf16.mxu0 %v6639_v9  ;;  %5445 = vmatprep.subr.bf16.mxu1 %v6464_v40 }
 0x57b   :  { %v1243_v49 = vpop.f32.mrb[8].mxu0  ;;  %v1314_v53 = vpop.f32.mrb[16].mxu1 }
 0x57c   :  { %v6109_v52 = vadd.f32 %v1243_v49, %v6821_v5  ;;  %v1245_v59 = vpop.f32.mrb[9].mxu0  ;;  %v4495_v44 = vpop.f32.mrb[17].mxu1  ;;  %v1332_v16 = vadd.f32 %v6832_v31, %v1314_v53 }
 0x57d   :  { %v6110_v29 = vadd.f32 %v1245_v59, %v6825_v7 }
 0x57e   :  { %v3880_v6 = vmul.f32 -1.442695, %v6109_v52 }
 0x57f   :  { %v3881_v42 = vmul.f32 -1.442695, %v6110_v29 }
 0x580   :  { %6217 = vpow2.f32 %v3880_v6 }
 0x581   :  { %6219 = vpow2.f32 %v3881_v42 }
 0x58a   :  { %v6218_v47 = vpop.eup %6217 }
 0x58b   :  { %v1326_v11 = vadd.f32 1.0, %v6218_v47  ;;  %v6220_v12 = vpop.eup %6219 }
 0x58c   :  { %v1327_v14 = vadd.f32 1.0, %v6220_v12 }
 0x58d   :  { %6221 = vrcp.f32 %v1326_v11 }
 0x58e   :  { %6223 = vrcp.f32 %v1327_v14 }
 0x597   :  { %v6222_v19 = vpop.eup %6221 }
 0x598   :  { %v1333_v21 = vmul.f32 %v6222_v19, %v1332_v16  ;;  %v6224_v27 = vpop.eup %6223 }
 0x599   :  { %v1336_v28 = vsub.f32 1.0, %v6224_v27  ;;  %v1338_v39 = vmul.f32 %v6224_v27, %v6968_v50 }
 0x59a   :  { %v1334_v22 = vadd.f32 %v1333_v21, %v6811_v58 }
 0x59c   :  { %6225 = vtanh.f32 %v1334_v22 }
 0x5a6   :  { %v6226_v32 = vpop.eup %6225 }
 0x5a7   :  { %v1337_v36 = vmul.f32 %v6226_v32, %v1336_v28 }
 0x5a9   :  { %v7012_v43 = vadd.f32 %v1338_v39, %v1337_v36  ;;  %v1864_v36 = vld [vmem:[#allocation9] sm:$0xff]  ;;  %v1867_v39 = vld [vmem:[#allocation9 + $0x18] sm:$0xff] }
 0x5ab   :  { %1413 = vmatmul.mubr.f32.vlgmr.msra.gmra.mrb[10].mxu0 %v7012_v43  ;;  %4529 = vmatmul.mubr.f32.vlgmr.msra.gmra.mrb[18].mxu1 %v7012_v43 }
 0x5ac   :  { %5416 = vmatpush1.bf16.msra.mxu0 %v6641_v17  ;;  %5447 = vmatpush3.bf16.msra.mxu1 %v6668_v41 }
 0x5ad   :  { %5418 = vmatprep.subr.bf16.mxu0 %v6644_v18  ;;  %5448 = vmatprep.subr.bf16.mxu1 %v6464_v40 }
 0x5ae   :  { %1583 = vmatprep.mubr.f32.mxu0 %v6463_v0  ;;  %4563 = vmatprep.mubr.msk.f32.mxu1 %vm6465_vm0, %v6463_v0 }
 0x5b0   :  { %5420 = vmatpush1.bf16.msra.mxu0 %v6652_v25  ;;  %5450 = vmatpush3.bf16.msra.mxu1 %v6681_v51 }
 0x5b1   :  { %5422 = vmatprep.subr.bf16.mxu0 %v6655_v26  ;;  %5451 = vmatprep.subr.bf16.mxu1 %v6464_v40 }
 0x5b4   :  { %5424 = vmatpush1.bf16.msra.mxu0 %v6662_v34  ;;  %5453 = vmatpush3.bf16.msra.mxu1 %v6695_v61 }
 0x5b5   :  { %5426 = vmatprep.subr.bf16.mxu0 %v6665_v35  ;;  %5454 = vmatprep.subr.bf16.mxu1 %v6464_v40 }
 0x5b8   :  { %5428 = vmatpush1.bf16.msra.mxu0 %v6675_v45  ;;  %5456 = vmatpush3.bf16.msra.mxu1 %v6712_v10 }
 0x5b9   :  { %5430 = vmatprep.subr.bf16.mxu0 %v6678_v46  ;;  %5457 = vmatprep.subr.bf16.mxu1 %v6464_v40 }
 0x5bc   :  { %5432 = vmatpush1.bf16.msra.mxu0 %v6689_v55  ;;  %5459 = vmatpush3.bf16.msra.mxu1 %v6726_v20 }
 0x5bd   :  { %5434 = vmatprep.subr.bf16.mxu0 %v6692_v56  ;;  %5460 = vmatprep.subr.bf16.mxu1 %v6464_v40 }
 0x5c0   :  { %5436 = vmatpush1.bf16.msra.mxu0 %v6703_v2  ;;  %5462 = vmatpush3.bf16.msra.mxu1 %v6737_v24 }
 0x5c1   :  { %5438 = vmatprep.subr.bf16.mxu0 %v6709_v4  ;;  %5463 = vmatprep.subr.bf16.mxu1 %v6464_v40 }
 0x5c4   :  { %5440 = vmatpush1.bf16.msra.mxu0 %v6717_v13  ;;  %5465 = vmatpush3.bf16.msra.mxu1 %v6749_v30 }
 0x5c5   :  { %5442 = vmatprep.subr.bf16.mxu0 %v6723_v15  ;;  %5466 = vmatprep.subr.bf16.mxu1 %v6464_v40 }
 0x5c8   :  { %5444 = vmatpush1.bf16.msra.mxu0 %v6733_v23  ;;  %5468 = vmatpush3.bf16.msra.mxu1 %v6757_v33 }
 0x5c9   :  { %5470 = vmatprep.subr.bf16.mxu0 %v6639_v9  ;;  %5501 = vmatprep.subr.bf16.mxu1 %v6464_v40 }
 0x67e   :  { %v1414_v58 = vpop.f32.mrb[10].mxu0  ;;  %v1485_v48 = vpop.f32.mrb[18].mxu1 }
 0x67f   :  { %v6111_v49 = vadd.f32 %v1414_v58, %v6821_v5  ;;  %v1416_v53 = vpop.f32.mrb[11].mxu0  ;;  %v4530_v52 = vpop.f32.mrb[19].mxu1  ;;  %v1503_v9 = vadd.f32 %v6832_v31, %v1485_v48  ;;  %v1871_v48 = vld [vmem:[#allocation9 + $0x38] sm:$0xff] }
 0x680   :  { %v6112_v44 = vadd.f32 %v1416_v53, %v6825_v7 }
 0x681   :  { %v3882_v59 = vmul.f32 -1.442695, %v6111_v49  ;;  %v1874_v49 = vld [vmem:[#allocation9 + $0x50] sm:$0xff] }
 0x682   :  { %v3883_v6 = vmul.f32 -1.442695, %v6112_v44  ;;  %v1875_v44 = vld [vmem:[#allocation9 + $0x58] sm:$0xff] }
 0x683   :  { %6227 = vpow2.f32 %v3882_v59  ;;  %v1872_v59 = vld [vmem:[#allocation9 + $0x40] sm:$0xff] }
 0x684   :  { %6229 = vpow2.f32 %v3883_v6  ;;  %v5527_v6 = vpack.c.bf16 %v1867_v39, %v1864_v36  ;;  %v1894_v36 = vld [vmem:[#allocation9 + $0xf0] sm:$0xff]  ;;  %v1897_v39 = vld [vmem:[#allocation9 + $0x108] sm:$0xff] }
 0x68d   :  { %v6228_v29 = vpop.eup %6227 }
 0x68e   :  { %v1497_v42 = vadd.f32 1.0, %v6228_v29  ;;  %v6230_v47 = vpop.eup %6229  ;;  %v5529_v29 = vpack.c.bf16 %v1874_v49, %v1871_v48  ;;  %v1904_v48 = vld [vmem:[#allocation9 + $0x140] sm:$0xff]  ;;  %v1902_v49 = vld [vmem:[#allocation9 + $0x130] sm:$0xff] }
 0x68f   :  { %v1498_v11 = vadd.f32 1.0, %v6230_v47  ;;  %v1873_v47 = vld [vmem:[#allocation9 + $0x48] sm:$0xff] }
 0x690   :  { %6231 = vrcp.f32 %v1497_v42  ;;  %v1870_v42 = vld [vmem:[#allocation9 + $0x30] sm:$0xff] }
 0x691   :  { %6233 = vrcp.f32 %v1498_v11  ;;  %v5561_v11 = vpack.c.bf16 %v1875_v44, %v1872_v59 }
 0x69a   :  { %v6232_v12 = vpop.eup %6231 }
 0x69b   :  { %v1504_v14 = vmul.f32 %v6232_v12, %v1503_v9  ;;  %v6234_v19 = vpop.eup %6233  ;;  %v1880_v9 = vld [vmem:[#allocation9 + $0x80] sm:$0xff]  ;;  %v1878_v12 = vld [vmem:[#allocation9 + $0x70] sm:$0xff] }
 0x69c   :  { %v1507_v21 = vsub.f32 1.0, %v6234_v19  ;;  %v1509_v28 = vmul.f32 %v6234_v19, %v7012_v43 }
 0x69d   :  { %v1505_v16 = vadd.f32 %v1504_v14, %v6809_v54  ;;  %v1881_v14 = vld [vmem:[#allocation9 + $0x88] sm:$0xff] }
 0x69f   :  { %6235 = vtanh.f32 %v1505_v16  ;;  %v5531_v16 = vpack.c.bf16 %v1873_v47, %v1870_v42  ;;  %v1907_v42 = vld [vmem:[#allocation9 + $0x158] sm:$0xff]  ;;  %v1910_v47 = vld [vmem:[#allocation9 + $0x170] sm:$0xff] }
 0x6a9   :  { %v6236_v22 = vpop.eup %6235 }
 0x6aa   :  { %v1508_v27 = vmul.f32 %v6236_v22, %v1507_v21  ;;  %v5565_v21 = vpack.c.bf16 %v1881_v14, %v1878_v12  ;;  %v1876_v22 = vld [vmem:[#allocation9 + $0x60] sm:$0xff]  ;;  %v5553_v12 = vpack.c.bf16 %v1910_v47, %v1907_v42  ;;  %v2214_v47 = vld [vmem:[#allocation10 + $0x158] sm:$0xff] }
 0x6ac   :  { %v7056_v32 = vadd.f32 %v1509_v28, %v1508_v27  ;;  %v1879_v27 = vld [vmem:[#allocation9 + $0x78] sm:$0xff] }
 0x6ad   :  { %v1883_v28 = vld [vmem:[#allocation9 + $0x98] sm:$0xff] }
 0x6ae   :  { %1584 = vmatmul.mubr.f32.vlgmr.msra.gmra.mrb[12].mxu0 %v7056_v32  ;;  %4564 = vmatmul.mubr.f32.vlgmr.msra.gmra.mrb[20].mxu1 %v7056_v32 }
 0x6af   :  { %5472 = vmatpush1.bf16.msra.mxu0 %v6641_v17  ;;  %5503 = vmatpush3.bf16.msra.mxu1 %v6668_v41  ;;  %v1865_v17 = vld [vmem:[#allocation9 + $0x8] sm:$0xff] }
 0x6b0   :  { %5474 = vmatprep.subr.bf16.mxu0 %v6644_v18  ;;  %5504 = vmatprep.subr.bf16.mxu1 %v6464_v40  ;;  %v1868_v18 = vld [vmem:[#allocation9 + $0x20] sm:$0xff] }
 0x6b1   :  { %1754 = vmatprep.mubr.f32.mxu0 %v6463_v0  ;;  %4598 = vmatprep.mubr.msk.f32.mxu1 %vm6465_vm0, %v6463_v0 }
 0x6b3   :  { %5476 = vmatpush1.bf16.msra.mxu0 %v6652_v25  ;;  %5506 = vmatpush3.bf16.msra.mxu1 %v6681_v51  ;;  %v1866_v25 = vld [vmem:[#allocation9 + $0x10] sm:$0xff] }
 0x6b4   :  { %5478 = vmatprep.subr.bf16.mxu0 %v6655_v26  ;;  %5507 = vmatprep.subr.bf16.mxu1 %v6464_v40  ;;  %v5525_v26 = vpack.c.bf16 %v1868_v18, %v1865_v17  ;;  %v1886_v17 = vld [vmem:[#allocation9 + $0xb0] sm:$0xff]  ;;  %v1884_v18 = vld [vmem:[#allocation9 + $0xa0] sm:$0xff] }
 0x6b7   :  { %5480 = vmatpush1.bf16.msra.mxu0 %v6662_v34  ;;  %5509 = vmatpush3.bf16.msra.mxu1 %v6695_v61  ;;  %v1869_v34 = vld [vmem:[#allocation9 + $0x28] sm:$0xff] }
 0x6b8   :  { %5482 = vmatprep.subr.bf16.mxu0 %v6665_v35  ;;  %5510 = vmatprep.subr.bf16.mxu1 %v6464_v40  ;;  %v5557_v35 = vpack.c.bf16 %v1869_v34, %v1866_v25  ;;  %v1887_v25 = vld [vmem:[#allocation9 + $0xb8] sm:$0xff]  ;;  %v5537_v34 = vpack.c.bf16 %v1886_v17, %v1883_v28  ;;  %v2177_v17 = vld [vmem:[#allocation10 + $0x30] sm:$0xff] }
 0x6bb   :  { %5484 = vmatpush1.bf16.msra.mxu0 %v6675_v45  ;;  %5512 = vmatpush3.bf16.msra.mxu1 %v6712_v10 }
 0x6bc   :  { %5486 = vmatprep.subr.bf16.mxu0 %v6678_v46  ;;  %5513 = vmatprep.subr.bf16.mxu1 %v6464_v40 }
 0x6bf   :  { %5488 = vmatpush1.bf16.msra.mxu0 %v6689_v55  ;;  %5515 = vmatpush3.bf16.msra.mxu1 %v6726_v20 }
 0x6c0   :  { %5490 = vmatprep.subr.bf16.mxu0 %v6692_v56  ;;  %5516 = vmatprep.subr.bf16.mxu1 %v6464_v40 }
 0x6c3   :  { %5492 = vmatpush1.bf16.msra.mxu0 %v6703_v2  ;;  %5518 = vmatpush3.bf16.msra.mxu1 %v6737_v24 }
 0x6c4   :  { %5494 = vmatprep.subr.bf16.mxu0 %v6709_v4  ;;  %5519 = vmatprep.subr.bf16.mxu1 %v6464_v40 }
 0x6c7   :  { %5496 = vmatpush1.bf16.msra.mxu0 %v6717_v13  ;;  %5521 = vmatpush3.bf16.msra.mxu1 %v6749_v30 }
 0x6c8   :  { %5498 = vmatprep.subr.bf16.mxu0 %v6723_v15  ;;  %5522 = vmatprep.subr.bf16.mxu1 %v6464_v40 }
 0x6cb   :  { %5500 = vmatpush1.bf16.msra.mxu0 %v6733_v23  ;;  %5524 = vmatpush3.bf16.msra.mxu1 %v6757_v33 }
 0x6cc   :  { %5526 = vmatprep.subr.bf16.mxu0 %v5525_v26  ;;  %5558 = vmatprep.subr.bf16.mxu1 %v5557_v35  ;;  %v5535_v26 = vpack.c.bf16 %v1879_v27, %v1876_v22  ;;  %v2171_v22 = vld [vmem:[#allocation10] sm:$0xff] }
 0x781   :  { %v1585_v41 = vpop.f32.mrb[12].mxu0  ;;  %v1656_v45 = vpop.f32.mrb[20].mxu1 }
 0x782   :  { %v6113_v46 = vadd.f32 %v1585_v41, %v6821_v5  ;;  %v1587_v51 = vpop.f32.mrb[13].mxu0  ;;  %v4565_v55 = vpop.f32.mrb[21].mxu1  ;;  %v1674_v20 = vadd.f32 %v6832_v31, %v1656_v45  ;;  %v1882_v41 = vld [vmem:[#allocation9 + $0x90] sm:$0xff]  ;;  %v1885_v45 = vld [vmem:[#allocation9 + $0xa8] sm:$0xff] }
 0x783   :  { %v6114_v61 = vadd.f32 %v1587_v51, %v6825_v7  ;;  %v1892_v51 = vld [vmem:[#allocation9 + $0xe0] sm:$0xff]  ;;  %v1890_v55 = vld [vmem:[#allocation9 + $0xd0] sm:$0xff] }
 0x784   :  { %v3884_v56 = vmul.f32 -1.442695, %v6113_v46  ;;  %v1889_v46 = vld [vmem:[#allocation9 + $0xc8] sm:$0xff] }
 0x785   :  { %v3885_v2 = vmul.f32 -1.442695, %v6114_v61  ;;  %v5539_v61 = vpack.c.bf16 %v1885_v45, %v1882_v41  ;;  %v2183_v41 = vld [vmem:[#allocation10 + $0x60] sm:$0xff]  ;;  %v2186_v45 = vld [vmem:[#allocation10 + $0x78] sm:$0xff] }
 0x786   :  { %6237 = vpow2.f32 %v3884_v56  ;;  %v1893_v56 = vld [vmem:[#allocation9 + $0xe8] sm:$0xff] }
 0x787   :  { %6239 = vpow2.f32 %v3885_v2  ;;  %v5541_v2 = vpack.c.bf16 %v1892_v51, %v1889_v46  ;;  %v7139_v46 = vpack.c.bf16 %v2186_v45, %v2183_v41  ;;  %v2190_v51 = vld [vmem:[#allocation10 + $0x98] sm:$0xff] }
 0x788   :  { %v2206_v41 = vld [vmem:[#allocation10 + $0x118] sm:$0xff] }
 0x790   :  { %v6238_v4 = vpop.eup %6237 }
 0x791   :  { %v1668_v10 = vadd.f32 1.0, %v6238_v4  ;;  %v6240_v13 = vpop.eup %6239  ;;  %v5573_v4 = vpack.c.bf16 %v1893_v56, %v1890_v55  ;;  %v2193_v55 = vld [vmem:[#allocation10 + $0xb0] sm:$0xff] }
 0x792   :  { %v1669_v15 = vadd.f32 1.0, %v6240_v13  ;;  %v1891_v13 = vld [vmem:[#allocation9 + $0xd8] sm:$0xff]  ;;  %v7143_v56 = vpack.c.bf16 %v2193_v55, %v2190_v51  ;;  %v2209_v51 = vld [vmem:[#allocation10 + $0x130] sm:$0xff]  ;;  %v2212_v55 = vld [vmem:[#allocation10 + $0x148] sm:$0xff] }
 0x793   :  { %6241 = vrcp.f32 %v1668_v10  ;;  %v1888_v10 = vld [vmem:[#allocation9 + $0xc0] sm:$0xff] }
 0x794   :  { %6243 = vrcp.f32 %v1669_v15  ;;  %v1895_v15 = vld [vmem:[#allocation9 + $0xf8] sm:$0xff] }
 0x79d   :  { %v6242_v23 = vpop.eup %6241 }
 0x79e   :  { %v1675_v24 = vmul.f32 %v6242_v23, %v1674_v20  ;;  %v6244_v33 = vpop.eup %6243  ;;  %v1898_v20 = vld [vmem:[#allocation9 + $0x110] sm:$0xff]  ;;  %v1896_v23 = vld [vmem:[#allocation9 + $0x100] sm:$0xff] }
 0x79f   :  { %v1678_v54 = vsub.f32 1.0, %v6244_v33  ;;  %v1680_v52 = vmul.f32 %v6244_v33, %v7056_v32  ;;  %v5545_v33 = vpack.c.bf16 %v1898_v20, %v1895_v15  ;;  %v2195_v20 = vld [vmem:[#allocation10 + $0xc0] sm:$0xff] }
 0x7a0   :  { %v1676_v30 = vadd.f32 %v1675_v24, %v6815_v63  ;;  %v1877_v63 = vld [vmem:[#allocation9 + $0x68] sm:$0xff]  ;;  %v1899_v24 = vld [vmem:[#allocation9 + $0x118] sm:$0xff] }
 0x7a1   :  { %v5533_v19 = vpack.c.bf16 %v1880_v9, %v1877_v63  ;;  %v1908_v63 = vld [vmem:[#allocation9 + $0x160] sm:$0xff] }
 0x7a2   :  { %6245 = vtanh.f32 %v1676_v30  ;;  %v5543_v30 = vpack.c.bf16 %v1891_v13, %v1888_v10  ;;  %v2196_v10 = vld [vmem:[#allocation10 + $0xc8] sm:$0xff]  ;;  %v2199_v13 = vld [vmem:[#allocation10 + $0xe0] sm:$0xff] }
 0x7a3   :  { %v7149_v15 = vpack.c.bf16 %v2199_v13, %v2196_v10  ;;  %v2218_v10 = vld [vmem:[#allocation10 + $0x178] sm:$0xff] }
 0x7ac   :  { %v6246_v58 = vpop.eup %6245 }
 0x7ad   :  { %v1679_v53 = vmul.f32 %v6246_v58, %v1678_v54  ;;  %v5577_v54 = vpack.c.bf16 %v1899_v24, %v1896_v23  ;;  %v1901_v58 = vld [vmem:[#allocation9 + $0x128] sm:$0xff]  ;;  %v2198_v23 = vld [vmem:[#allocation10 + $0xd8] sm:$0xff] }
 0x7ae   :  { %v5549_v59 = vpack.c.bf16 %v1904_v48, %v1901_v58  ;;  %v7151_v24 = vpack.c.bf16 %v2198_v23, %v2195_v20  ;;  %v2208_v48 = vld [vmem:[#allocation10 + $0x128] sm:$0xff] }
 0x7af   :  { %v7098_v31 = vadd.f32 %v1680_v52, %v1679_v53  ;;  %v1905_v53 = vld [vmem:[#allocation9 + $0x148] sm:$0xff]  ;;  %v5547_v52 = vpack.c.bf16 %v1897_v39, %v1894_v36  ;;  %v2201_v36 = vld [vmem:[#allocation10 + $0xf0] sm:$0xff] }
 0x7b0   :  { %v5581_v44 = vpack.c.bf16 %v1905_v53, %v1902_v49  ;;  %v2204_v39 = vld [vmem:[#allocation10 + $0x108] sm:$0xff]  ;;  %v2211_v49 = vld [vmem:[#allocation10 + $0x140] sm:$0xff] }
 0x7b1   :  { %1755 = vmatmul.mubr.f32.vlgmr.msra.gmra.mrb[14].mxu0 %v7098_v31  ;;  %4599 = vmatmul.mubr.f32.vlgmr.msra.gmra.mrb[22].mxu1 %v7098_v31  ;;  %v7157_v58 = vpack.c.bf16 %v2204_v39, %v2201_v36  ;;  %v2207_v53 = vld [vmem:[#allocation10 + $0x120] sm:$0xff] }
 0x7b2   :  { %5528 = vmatpush1.bf16.msra.mxu0 %v5527_v6  ;;  %5560 = vmatpush3.bf16.msra.mxu1 %v5557_v35  ;;  %v5569_v35 = vpack.c.bf16 %v1887_v25, %v1884_v18  ;;  %v1900_v6 = vld [vmem:[#allocation9 + $0x120] sm:$0xff]  ;;  %v2180_v18 = vld [vmem:[#allocation10 + $0x48] sm:$0xff] }
 0x7b3   :  { %4633 = vmatprep.mubr.f32.mxu1 %v6836_v8  ;;  %5530 = vmatprep.subr.bf16.mxu0 %v5529_v29  ;;  %v1903_v29 = vld [vmem:[#allocation9 + $0x138] sm:$0xff]  ;;  %v7133_v25 = vpack.c.bf16 %v2180_v18, %v2177_v17  ;;  %v2197_v17 = vld [vmem:[#allocation10 + $0xd0] sm:$0xff]  ;;  %v2200_v18 = vld [vmem:[#allocation10 + $0xe8] sm:$0xff] }
 0x7b4   :  { %5562 = vmatprep.subr.bf16.mxu1 %v5561_v11  ;;  %1993 = vmatprep.mubr.f32.mxu0 %v6463_v0  ;;  %v5551_v9 = vpack.c.bf16 %v1903_v29, %v1900_v6  ;;  %v2176_v6 = vld [vmem:[#allocation10 + $0x28] sm:$0xff] }
 0x7b6   :  { %5532 = vmatpush1.bf16.msra.mxu0 %v5531_v16  ;;  %5564 = vmatpush3.bf16.msra.mxu1 %v5561_v11  ;;  %v1911_v11 = vld [vmem:[#allocation9 + $0x178] sm:$0xff]  ;;  %v1906_v16 = vld [vmem:[#allocation9 + $0x150] sm:$0xff] }
 0x7b7   :  { %5534 = vmatprep.subr.bf16.mxu0 %v5533_v19  ;;  %5566 = vmatprep.subr.bf16.mxu1 %v5565_v21  ;;  %v5585_v14 = vpack.c.bf16 %v1911_v11, %v1908_v63  ;;  %v1909_v19 = vld [vmem:[#allocation9 + $0x168] sm:$0xff]  ;;  %v2217_v63 = vld [vmem:[#allocation10 + $0x170] sm:$0xff] }
 0x7b8   :  { %v7170_v11 = vpack.c.bf16 %v2217_v63, %v2214_v47  ;;  %v6337_v47 = vld [vmem:[%s7674_s5] ss:$0 sm:$0xff] }
 0x7ba   :  { %5536 = vmatpush1.bf16.msra.mxu0 %v5535_v26  ;;  %5568 = vmatpush3.bf16.msra.mxu1 %v5565_v21  ;;  %v5555_v21 = vpack.c.bf16 %v1909_v19, %v1906_v16  ;;  %v2184_v26 = vld [vmem:[#allocation10 + $0x68] sm:$0xff]  ;;  %v2179_v16 = vld [vmem:[#allocation10 + $0x40] sm:$0xff]  ;;  %v2182_v19 = vld [vmem:[#allocation10 + $0x58] sm:$0xff] }
 0x7bb   :  { %5538 = vmatprep.subr.bf16.mxu0 %v5537_v34  ;;  %5570 = vmatprep.subr.bf16.mxu1 %v5569_v35  ;;  %v2187_v34 = vld [vmem:[#allocation10 + $0x80] sm:$0xff] }
 0x7be   :  { %5540 = vmatpush1.bf16.msra.mxu0 %v5539_v61  ;;  %5572 = vmatpush3.bf16.msra.mxu1 %v5569_v35  ;;  %v7137_v35 = vpack.c.bf16 %v2187_v34, %v2184_v26  ;;  %v2189_v61 = vld [vmem:[#allocation10 + $0x90] sm:$0xff]  ;;  %v7189_v26 = vpack.c.bf16 %v2200_v18, %v2197_v17  ;;  %v2203_v34 = vld [vmem:[#allocation10 + $0x100] sm:$0xff] }
 0x7bf   :  { %5542 = vmatprep.subr.bf16.mxu0 %v5541_v2  ;;  %5574 = vmatprep.subr.bf16.mxu1 %v5573_v4  ;;  %v2192_v2 = vld [vmem:[#allocation10 + $0xa8] sm:$0xff]  ;;  %v7193_v45 = vpack.c.bf16 %v2206_v41, %v2203_v34 }
 0x7c2   :  { %5544 = vmatpush1.bf16.msra.mxu0 %v5543_v30  ;;  %5576 = vmatpush3.bf16.msra.mxu1 %v5573_v4  ;;  %v7145_v4 = vpack.c.bf16 %v2192_v2, %v2189_v61  ;;  %v2202_v30 = vld [vmem:[#allocation10 + $0xf8] sm:$0xff]  ;;  %v7197_v61 = vpack.c.bf16 %v2212_v55, %v2209_v51  ;;  %v2215_v2 = vld [vmem:[#allocation10 + $0x160] sm:$0xff] }
 0x7c3   :  { %5546 = vmatprep.subr.bf16.mxu0 %v5545_v33  ;;  %5578 = vmatprep.subr.bf16.mxu1 %v5577_v54  ;;  %v2205_v33 = vld [vmem:[#allocation10 + $0x110] sm:$0xff]  ;;  %v7201_v13 = vpack.c.bf16 %v2218_v10, %v2215_v2 }
 0x7c6   :  { %5548 = vmatpush1.bf16.msra.mxu0 %v5547_v52  ;;  %5580 = vmatpush3.bf16.msra.mxu1 %v5577_v54  ;;  %v7155_v54 = vpack.c.bf16 %v2205_v33, %v2202_v30  ;;  %v7161_v52 = vpack.c.bf16 %v2211_v49, %v2208_v48 }
 0x7c7   :  { %5550 = vmatprep.subr.bf16.mxu0 %v5549_v59  ;;  %5582 = vmatprep.subr.bf16.mxu1 %v5581_v44  ;;  %v2210_v59 = vld [vmem:[#allocation10 + $0x138] sm:$0xff] }
 0x7c8   :  { %v7163_v29 = vpack.c.bf16 %v2210_v59, %v2207_v53 }
 0x7ca   :  { %5552 = vmatpush1.bf16.msra.mxu0 %v5551_v9  ;;  %5584 = vmatpush3.bf16.msra.mxu1 %v5581_v44  ;;  %v2173_v44 = vld [vmem:[#allocation10 + $0x10] sm:$0xff] }
 0x7cb   :  { %5554 = vmatprep.subr.bf16.mxu0 %v5553_v12  ;;  %5586 = vmatprep.subr.bf16.mxu1 %v5585_v14  ;;  %v7165_v42 = vpack.c.bf16 %v2176_v6, %v2173_v44  ;;  %v2213_v9 = vld [vmem:[#allocation10 + $0x150] sm:$0xff]  ;;  %v2216_v12 = vld [vmem:[#allocation10 + $0x168] sm:$0xff] }
 0x7ce   :  { %5556 = vmatpush1.bf16.msra.mxu0 %v5555_v21  ;;  %5588 = vmatpush3.bf16.msra.mxu1 %v5585_v14  ;;  %v7173_v14 = vpack.c.bf16 %v2216_v12, %v2213_v9  ;;  %v7176_v21 = vpack.c.bf16 %v2182_v19, %v2179_v16 }
 0x7cf   :  { %5621 = vmatprep.subr.bf16.mxu1 %v6464_v40 }
 0x7d1   :  { %1994 = vmatmul.mubr.f32.vlgmr.msra.gmra.mrb[16].mxu0 %v6836_v8  ;;  %4634 = vmatmul.mubr.f32.vlgmr.msra.gmra.mrb[24].mxu1 %v6880_v62  ;;  %v2172_v8 = vld [vmem:[#allocation10 + $0x8] sm:$0xff] }
 0x7d2   :  { %4636 = vmatprep.mubr.f32.mxu1 %v6924_v57  ;;  %1999 = vmatprep.mubr.f32.mxu0 %v6463_v0 }
 0x7d3   :  { %5623 = vmatpush3.bf16.msra.mxu1 %v7165_v42 }
 0x7d4   :  { %5624 = vmatprep.subr.bf16.mxu1 %v6464_v40 }
 0x7d5   :  { %2000 = vmatmul.mubr.f32.gmra.mrb[18].mxu0 %v6880_v62  ;;  %4637 = vmatmul.mubr.f32.gmra.mrb[26].mxu1 %v6968_v50  ;;  %v2175_v62 = vld [vmem:[#allocation10 + $0x20] sm:$0xff] }
 0x7d6   :  { %4639 = vmatprep.mubr.f32.mxu1 %v7012_v43  ;;  %2005 = vmatprep.mubr.f32.mxu0 %v6463_v0 }
 0x7d7   :  { %5626 = vmatpush3.bf16.msra.mxu1 %v7176_v21 }
 0x7d8   :  { %5627 = vmatprep.subr.bf16.mxu1 %v6464_v40 }
 0x7d9   :  { %2006 = vmatmul.mubr.f32.gmra.mrb[20].mxu0 %v6924_v57  ;;  %4640 = vmatmul.mubr.f32.gmra.mrb[28].mxu1 %v7056_v32  ;;  %v7125_v57 = vpack.c.bf16 %v2175_v62, %v2172_v8  ;;  %v2185_v8 = vld [vmem:[#allocation10 + $0x70] sm:$0xff]  ;;  %v2188_v62 = vld [vmem:[#allocation10 + $0x88] sm:$0xff] }
 0x7da   :  { %4642 = vmatprep.mubr.f32.mxu1 %v7098_v31  ;;  %2011 = vmatprep.mubr.f32.mxu0 %v6463_v0 }
 0x7db   :  { %5590 = vmatprep.subr.bf16.mxu0 %v7125_v57 }
 0x7dd   :  { %2012 = vmatmul.mubr.f32.gmra.mrb[22].mxu0 %v6968_v50  ;;  %v2174_v50 = vld [vmem:[#allocation10 + $0x18] sm:$0xff] }
 0x7de   :  { %2017 = vmatprep.mubr.f32.mxu0 %v6463_v0  ;;  %v7127_v27 = vpack.c.bf16 %v2174_v50, %v2171_v22  ;;  %v2191_v22 = vld [vmem:[#allocation10 + $0xa0] sm:$0xff]  ;;  %v7182_v50 = vpack.c.bf16 %v2188_v62, %v2185_v8 }
 0x7e0   :  { %5592 = vmatpush1.bf16.msra.mxu0 %v7127_v27  ;;  %5629 = vmatpush3.bf16.msra.mxu1 %v7182_v50 }
 0x7e1   :  { %2018 = vmatmul.mubr.f32.gmra.mrb[24].mxu0 %v7012_v43  ;;  %v2178_v43 = vld [vmem:[#allocation10 + $0x38] sm:$0xff]  ;;  %5630 = vmatprep.subr.bf16.mxu1 %v6464_v40 }
 0x7e2   :  { %2023 = vmatprep.mubr.f32.mxu0 %v6463_v0 }
 0x7e5   :  { %2024 = vmatmul.mubr.f32.gmra.mrb[26].mxu0 %v7056_v32  ;;  %v2181_v32 = vld [vmem:[#allocation10 + $0x50] sm:$0xff] }
 0x7e6   :  { %2029 = vmatprep.mubr.f32.mxu0 %v6463_v0  ;;  %v7131_v28 = vpack.c.bf16 %v2181_v32, %v2178_v43  ;;  %v2194_v43 = vld [vmem:[#allocation10 + $0xb8] sm:$0xff] }
 0x7e7   :  { %v7185_v32 = vpack.c.bf16 %v2194_v43, %v2191_v22 }
 0x7e8   :  { %5594 = vmatprep.subr.bf16.mxu0 %v7131_v28 }
 0x7e9   :  { %2030 = vmatmul.mubr.f32.gmra.mrb[28].mxu0 %v7098_v31  ;;  %5632 = vmatpush3.bf16.msra.mxu1 %v7185_v32 }
 0x7ea   :  { %2035 = vmatprep.mubr.f32.mxu0 %v6463_v0  ;;  %5596 = vmatpush1.bf16.msra.mxu0 %v7133_v25 }
 0x7eb   :  { %5598 = vmatprep.subr.bf16.mxu0 %v7137_v35  ;;  %5633 = vmatprep.subr.bf16.mxu1 %v6464_v40 }
 0x7ed   :  { %5635 = vmatpush3.bf16.msra.mxu1 %v7189_v26 }
 0x7ee   :  { %5600 = vmatpush1.bf16.msra.mxu0 %v7139_v46  ;;  %5636 = vmatprep.subr.bf16.mxu1 %v6464_v40 }
 0x7ef   :  { %5602 = vmatprep.subr.bf16.mxu0 %v7143_v56 }
 0x7f1   :  { %5638 = vmatpush3.bf16.msra.mxu1 %v7193_v45 }
 0x7f2   :  { %5604 = vmatpush1.bf16.msra.mxu0 %v7145_v4  ;;  %5639 = vmatprep.subr.bf16.mxu1 %v6464_v40 }
 0x7f3   :  { %5606 = vmatprep.subr.bf16.mxu0 %v7149_v15 }
 0x7f5   :  { %5641 = vmatpush3.bf16.msra.mxu1 %v7197_v61 }
 0x7f6   :  { %5608 = vmatpush1.bf16.msra.mxu0 %v7151_v24  ;;  %5642 = vmatprep.subr.bf16.mxu1 %v6464_v40 }
 0x7f7   :  { %5610 = vmatprep.subr.bf16.mxu0 %v7155_v54 }
 0x7f9   :  { %5644 = vmatpush3.bf16.msra.mxu1 %v7201_v13 }
 0x7fa   :  { %5612 = vmatpush1.bf16.msra.mxu0 %v7157_v58  ;;  %5677 = vmatprep.subr.bf16.mxu1 %v6464_v40 }
 0x7fb   :  { %5614 = vmatprep.subr.bf16.mxu0 %v7161_v52 }
 0x7fe   :  { %5616 = vmatpush1.bf16.msra.mxu0 %v7163_v29 }
 0x7ff   :  { %5618 = vmatprep.subr.bf16.mxu0 %v7170_v11 }
 0x802   :  { %5620 = vmatpush1.bf16.msra.mxu0 %v7173_v14 }
 0x803   :  { %5646 = vmatprep.subr.bf16.mxu0 %v7125_v57 }
 0x884   :  { %v1756_v20 = vpop.f32.mrb[14].mxu0  ;;  %v1827_v23 = vpop.f32.mrb[22].mxu1 }
 0x885   :  { %v6115_v30 = vadd.f32 %v1756_v20, %v6821_v5  ;;  %v1758_v33 = vpop.f32.mrb[15].mxu0  ;;  %v4600_v36 = vpop.f32.mrb[23].mxu1  ;;  %v1845_v63 = vadd.f32 %v6337_v47, %v1827_v23 }
 0x886   :  { %v6116_v48 = vadd.f32 %v1758_v33, %v6825_v7 }
 0x887   :  { %v3886_v39 = vmul.f32 -1.442695, %v6115_v30 }
 0x888   :  { %v3887_v49 = vmul.f32 -1.442695, %v6116_v48 }
 0x889   :  { %6247 = vpow2.f32 %v3886_v39 }
 0x88a   :  { %6249 = vpow2.f32 %v3887_v49 }
 0x893   :  { %v6248_v53 = vpop.eup %6247 }
 0x894   :  { %v1839_v59 = vadd.f32 1.0, %v6248_v53  ;;  %v6250_v44 = vpop.eup %6249 }
 0x895   :  { %v1840_v6 = vadd.f32 1.0, %v6250_v44 }
 0x896   :  { %6251 = vrcp.f32 %v1839_v59 }
 0x897   :  { %6253 = vrcp.f32 %v1840_v6 }
 0x8a0   :  { %v6252_v9 = vpop.eup %6251 }
 0x8a1   :  { %v1846_v5 = vmul.f32 %v6252_v9, %v1845_v63  ;;  %v6254_v62 = vpop.eup %6253 }
 0x8a2   :  { %v1849_v17 = vsub.f32 1.0, %v6254_v62  ;;  %v1851_v41 = vmul.f32 %v6254_v62, %v7098_v31  ;;  %v1912_v31 = vld [vmem:[%s7677_s8] sm:$0x7] }
 0x8a3   :  { %v1847_v12 = vadd.f32 %v1846_v5, %v6813_v60  ;;  %v7282_v10 = vrot.slane %v1912_v31, %v177_v1  ;;  %v7286_v23 = vrot.slane %v1912_v31, %v181_v3  ;;  %v7293_v3 = vld [vmem:[%s7678_s9] ss:$0 sm:$0xff]  ;;  %v7297_v6 = vrot.slane %v1912_v31, %v185_v38 }
 0x8a4   :  { %v7212_v16 = vpop.f32.mrb[24].mxu1 }
 0x8a5   :  { %6255 = vtanh.f32 %v1847_v12  ;;  %v7214_v7 = vpop.f32.mrb[25].mxu1 }
 0x8a6   :  { %v2109_v5 = vadd.f32 %v7214_v7, %v7297_v6 }
 0x8a8   :  { %v7216_v19 = vpop.f32.mrb[26].mxu1 }
 0x8a9   :  { %v7218_v8 = vpop.f32.mrb[27].mxu1 }
 0x8ac   :  { %v7220_v22 = vpop.f32.mrb[28].mxu1 }
 0x8ad   :  { %v7222_v43 = vpop.f32.mrb[29].mxu1 }
 0x8af   :  { %v6256_v18 = vpop.eup %6255 }
 0x8b0   :  { %v1850_v34 = vmul.f32 %v6256_v18, %v1849_v17 }
 0x8b2   :  { %v1852_v60 = vadd.f32 %v1851_v41, %v1850_v34 }
 0x8b4   :  { %1855 = vst [vmem:[%s7684_s15] sm:$0xff] %v1852_v60  ;;  %2036 = vmatmul.mubr.f32.gmra.mrb[30].mxu0 %v1852_v60  ;;  %4643 = vmatmul.mubr.f32.gmra.mrb[30].mxu1 %v1852_v60 }
 0x8b5   :  { %2295 = vmatprep.mubr.f32.mxu0 %v6463_v0  ;;  %4677 = vmatprep.mubr.msk.f32.mxu1 %vm6465_vm0, %v6463_v0 }
 0x8bb   :  { %v7232_v51 = vld [vmem:[%s7670_s1 + $0x8] sm:$0xff] }
 0x8bc   :  { %2296 = vmatmul.mubr.f32.vlgmr.msra.gmra.mrb[16].mxu0 %v7232_v51  ;;  %4678 = vmatmul.mubr.f32.vlgmr.msra.gmra.mrb[32].mxu1 %v7232_v51 }
 0x8bd   :  { %5648 = vmatpush1.bf16.msra.mxu0 %v7127_v27  ;;  %5679 = vmatpush3.bf16.msra.mxu1 %v7165_v42 }
 0x8be   :  { %5650 = vmatprep.subr.bf16.mxu0 %v7131_v28  ;;  %5680 = vmatprep.subr.bf16.mxu1 %v6464_v40 }
 0x8bf   :  { %2462 = vmatprep.mubr.f32.mxu0 %v6463_v0  ;;  %4712 = vmatprep.mubr.msk.f32.mxu1 %vm6465_vm0, %v6463_v0 }
 0x8c1   :  { %5652 = vmatpush1.bf16.msra.mxu0 %v7133_v25  ;;  %5682 = vmatpush3.bf16.msra.mxu1 %v7176_v21 }
 0x8c2   :  { %5654 = vmatprep.subr.bf16.mxu0 %v7137_v35  ;;  %5683 = vmatprep.subr.bf16.mxu1 %v6464_v40 }
 0x8c5   :  { %5656 = vmatpush1.bf16.msra.mxu0 %v7139_v46  ;;  %5685 = vmatpush3.bf16.msra.mxu1 %v7182_v50 }
 0x8c6   :  { %5658 = vmatprep.subr.bf16.mxu0 %v7143_v56  ;;  %5686 = vmatprep.subr.bf16.mxu1 %v6464_v40 }
 0x8c9   :  { %5660 = vmatpush1.bf16.msra.mxu0 %v7145_v4  ;;  %5688 = vmatpush3.bf16.msra.mxu1 %v7185_v32 }
 0x8ca   :  { %5662 = vmatprep.subr.bf16.mxu0 %v7149_v15  ;;  %5689 = vmatprep.subr.bf16.mxu1 %v6464_v40 }
 0x8cd   :  { %5664 = vmatpush1.bf16.msra.mxu0 %v7151_v24  ;;  %5691 = vmatpush3.bf16.msra.mxu1 %v7189_v26 }
 0x8ce   :  { %5666 = vmatprep.subr.bf16.mxu0 %v7155_v54  ;;  %5692 = vmatprep.subr.bf16.mxu1 %v6464_v40 }
 0x8d1   :  { %5668 = vmatpush1.bf16.msra.mxu0 %v7157_v58  ;;  %5694 = vmatpush3.bf16.msra.mxu1 %v7193_v45 }
 0x8d2   :  { %5670 = vmatprep.subr.bf16.mxu0 %v7161_v52  ;;  %5695 = vmatprep.subr.bf16.mxu1 %v6464_v40 }
 0x8d5   :  { %5672 = vmatpush1.bf16.msra.mxu0 %v7163_v29  ;;  %5697 = vmatpush3.bf16.msra.mxu1 %v7197_v61 }
 0x8d6   :  { %5674 = vmatprep.subr.bf16.mxu0 %v7170_v11  ;;  %5698 = vmatprep.subr.bf16.mxu1 %v6464_v40 }
 0x8d9   :  { %5676 = vmatpush1.bf16.msra.mxu0 %v7173_v14  ;;  %5700 = vmatpush3.bf16.msra.mxu1 %v7201_v13 }
 0x8da   :  { %5702 = vmatprep.subr.bf16.mxu0 %v7125_v57  ;;  %5733 = vmatprep.subr.bf16.mxu1 %v6464_v40 }
 0x987   :  { %v7276_v55 = vpop.f32.mrb[30].mxu1 }
 0x988   :  { %v7278_v2 = vpop.f32.mrb[31].mxu1 }
 0x98f   :  { %v2297_v20 = vpop.f32.mrb[16].mxu0  ;;  %v2368_v30 = vpop.f32.mrb[32].mxu1 }
 0x990   :  { %v6117_v33 = vadd.f32 %v2297_v20, %v7282_v10  ;;  %v2299_v36 = vpop.f32.mrb[17].mxu0  ;;  %v4679_v39 = vpop.f32.mrb[33].mxu1  ;;  %v2386_v63 = vadd.f32 %v7293_v3, %v2368_v30 }
 0x991   :  { %v6118_v49 = vadd.f32 %v2299_v36, %v7286_v23 }
 0x992   :  { %v3890_v48 = vmul.f32 -1.442695, %v6117_v33 }
 0x993   :  { %v3891_v53 = vmul.f32 -1.442695, %v6118_v49 }
 0x994   :  { %6257 = vpow2.f32 %v3890_v48 }
 0x995   :  { %6259 = vpow2.f32 %v3891_v53 }
 0x99e   :  { %v6258_v59 = vpop.eup %6257 }
 0x99f   :  { %v2380_v44 = vadd.f32 1.0, %v6258_v59  ;;  %v6260_v1 = vpop.eup %6259 }
 0x9a0   :  { %v2381_v47 = vadd.f32 1.0, %v6260_v1  ;;  %v2114_v1 = vadd.f32 %v7212_v16, %v7297_v6 }
 0x9a1   :  { %6261 = vrcp.f32 %v2380_v44 }
 0x9a2   :  { %6263 = vrcp.f32 %v2381_v47 }
 0x9ab   :  { %v6262_v9 = vpop.eup %6261 }
 0x9ac   :  { %v2387_v12 = vmul.f32 %v6262_v9, %v2386_v63  ;;  %v6264_v17 = vpop.eup %6263 }
 0x9ad   :  { %v2390_v18 = vsub.f32 1.0, %v6264_v17  ;;  %v2392_v60 = vmul.f32 %v6264_v17, %v7232_v51 }
 0x9ae   :  { %v2388_v62 = vadd.f32 %v2387_v12, %v2109_v5 }
 0x9b0   :  { %6265 = vtanh.f32 %v2388_v62 }
 0x9ba   :  { %v6266_v34 = vpop.eup %6265 }
 0x9bb   :  { %v2391_v41 = vmul.f32 %v6266_v34, %v2390_v18 }
 0x9bd   :  { %v7303_v37 = vadd.f32 %v2392_v60, %v2391_v41 }
 0x9bf   :  { %2463 = vmatmul.mubr.f32.vlgmr.msra.gmra.mrb[18].mxu0 %v7303_v37  ;;  %4713 = vmatmul.mubr.f32.vlgmr.msra.gmra.mrb[34].mxu1 %v7303_v37 }
 0x9c0   :  { %5704 = vmatpush1.bf16.msra.mxu0 %v7127_v27  ;;  %5735 = vmatpush3.bf16.msra.mxu1 %v7165_v42 }
 0x9c1   :  { %5706 = vmatprep.subr.bf16.mxu0 %v7131_v28  ;;  %5736 = vmatprep.subr.bf16.mxu1 %v6464_v40 }
 0x9c2   :  { %2630 = vmatprep.mubr.f32.mxu0 %v6463_v0  ;;  %4747 = vmatprep.mubr.msk.f32.mxu1 %vm6465_vm0, %v6463_v0 }
 0x9c4   :  { %5708 = vmatpush1.bf16.msra.mxu0 %v7133_v25  ;;  %5738 = vmatpush3.bf16.msra.mxu1 %v7176_v21 }
 0x9c5   :  { %5710 = vmatprep.subr.bf16.mxu0 %v7137_v35  ;;  %5739 = vmatprep.subr.bf16.mxu1 %v6464_v40 }
 0x9c8   :  { %5712 = vmatpush1.bf16.msra.mxu0 %v7139_v46  ;;  %5741 = vmatpush3.bf16.msra.mxu1 %v7182_v50 }
 0x9c9   :  { %5714 = vmatprep.subr.bf16.mxu0 %v7143_v56  ;;  %5742 = vmatprep.subr.bf16.mxu1 %v6464_v40 }
 0x9cc   :  { %5716 = vmatpush1.bf16.msra.mxu0 %v7145_v4  ;;  %5744 = vmatpush3.bf16.msra.mxu1 %v7185_v32 }
 0x9cd   :  { %5718 = vmatprep.subr.bf16.mxu0 %v7149_v15  ;;  %5745 = vmatprep.subr.bf16.mxu1 %v6464_v40 }
 0x9d0   :  { %5720 = vmatpush1.bf16.msra.mxu0 %v7151_v24  ;;  %5747 = vmatpush3.bf16.msra.mxu1 %v7189_v26 }
 0x9d1   :  { %5722 = vmatprep.subr.bf16.mxu0 %v7155_v54  ;;  %5748 = vmatprep.subr.bf16.mxu1 %v6464_v40 }
 0x9d4   :  { %5724 = vmatpush1.bf16.msra.mxu0 %v7157_v58  ;;  %5750 = vmatpush3.bf16.msra.mxu1 %v7193_v45 }
 0x9d5   :  { %5726 = vmatprep.subr.bf16.mxu0 %v7161_v52  ;;  %5751 = vmatprep.subr.bf16.mxu1 %v6464_v40 }
 0x9d8   :  { %5728 = vmatpush1.bf16.msra.mxu0 %v7163_v29  ;;  %5753 = vmatpush3.bf16.msra.mxu1 %v7197_v61 }
 0x9d9   :  { %5730 = vmatprep.subr.bf16.mxu0 %v7170_v11  ;;  %5754 = vmatprep.subr.bf16.mxu1 %v6464_v40 }
 0x9dc   :  { %5732 = vmatpush1.bf16.msra.mxu0 %v7173_v14  ;;  %5756 = vmatpush3.bf16.msra.mxu1 %v7201_v13 }
 0x9dd   :  { %5758 = vmatprep.subr.bf16.mxu0 %v7125_v57  ;;  %5789 = vmatprep.subr.bf16.mxu1 %v6464_v40 }
 0xa92   :  { %v2464_v38 = vpop.f32.mrb[18].mxu0  ;;  %v2535_v7 = vpop.f32.mrb[34].mxu1 }
 0xa93   :  { %v6119_v51 = vadd.f32 %v2464_v38, %v7282_v10  ;;  %v2466_v31 = vpop.f32.mrb[19].mxu0  ;;  %v4714_v20 = vpop.f32.mrb[35].mxu1  ;;  %v2553_v59 = vadd.f32 %v7293_v3, %v2535_v7 }
 0xa94   :  { %v6120_v33 = vadd.f32 %v2466_v31, %v7286_v23 }
 0xa95   :  { %v3892_v30 = vmul.f32 -1.442695, %v6119_v51 }
 0xa96   :  { %v3893_v36 = vmul.f32 -1.442695, %v6120_v33 }
 0xa97   :  { %6267 = vpow2.f32 %v3892_v30 }
 0xa98   :  { %6269 = vpow2.f32 %v3893_v36 }
 0xaa1   :  { %v6268_v39 = vpop.eup %6267 }
 0xaa2   :  { %v2547_v48 = vadd.f32 1.0, %v6268_v39  ;;  %v6270_v49 = vpop.eup %6269 }
 0xaa3   :  { %v2548_v53 = vadd.f32 1.0, %v6270_v49  ;;  %v2119_v49 = vadd.f32 %v7218_v8, %v7297_v6 }
 0xaa4   :  { %6271 = vrcp.f32 %v2547_v48 }
 0xaa5   :  { %6273 = vrcp.f32 %v2548_v53 }
 0xaae   :  { %v6272_v44 = vpop.eup %6271 }
 0xaaf   :  { %v2554_v47 = vmul.f32 %v6272_v44, %v2553_v59  ;;  %v6274_v9 = vpop.eup %6273 }
 0xab0   :  { %v2557_v5 = vsub.f32 1.0, %v6274_v9  ;;  %v2559_v17 = vmul.f32 %v6274_v9, %v7303_v37 }
 0xab1   :  { %v2555_v63 = vadd.f32 %v2554_v47, %v2114_v1 }
 0xab3   :  { %6275 = vtanh.f32 %v2555_v63 }
 0xabd   :  { %v6276_v12 = vpop.eup %6275 }
 0xabe   :  { %v2558_v62 = vmul.f32 %v6276_v12, %v2557_v5 }
 0xac0   :  { %v7348_v18 = vadd.f32 %v2559_v17, %v2558_v62 }
 0xac2   :  { %2631 = vmatmul.mubr.f32.vlgmr.msra.gmra.mrb[20].mxu0 %v7348_v18  ;;  %4748 = vmatmul.mubr.f32.vlgmr.msra.gmra.mrb[36].mxu1 %v7348_v18 }
 0xac3   :  { %5760 = vmatpush1.bf16.msra.mxu0 %v7127_v27  ;;  %5791 = vmatpush3.bf16.msra.mxu1 %v7165_v42 }
 0xac4   :  { %5762 = vmatprep.subr.bf16.mxu0 %v7131_v28  ;;  %5792 = vmatprep.subr.bf16.mxu1 %v6464_v40 }
 0xac5   :  { %2798 = vmatprep.mubr.f32.mxu0 %v6463_v0  ;;  %4782 = vmatprep.mubr.msk.f32.mxu1 %vm6465_vm0, %v6463_v0 }
 0xac7   :  { %5764 = vmatpush1.bf16.msra.mxu0 %v7133_v25  ;;  %5794 = vmatpush3.bf16.msra.mxu1 %v7176_v21 }
 0xac8   :  { %5766 = vmatprep.subr.bf16.mxu0 %v7137_v35  ;;  %5795 = vmatprep.subr.bf16.mxu1 %v6464_v40 }
 0xacb   :  { %5768 = vmatpush1.bf16.msra.mxu0 %v7139_v46  ;;  %5797 = vmatpush3.bf16.msra.mxu1 %v7182_v50 }
 0xacc   :  { %5770 = vmatprep.subr.bf16.mxu0 %v7143_v56  ;;  %5798 = vmatprep.subr.bf16.mxu1 %v6464_v40 }
 0xacf   :  { %5772 = vmatpush1.bf16.msra.mxu0 %v7145_v4  ;;  %5800 = vmatpush3.bf16.msra.mxu1 %v7185_v32 }
 0xad0   :  { %5774 = vmatprep.subr.bf16.mxu0 %v7149_v15  ;;  %5801 = vmatprep.subr.bf16.mxu1 %v6464_v40 }
 0xad3   :  { %5776 = vmatpush1.bf16.msra.mxu0 %v7151_v24  ;;  %5803 = vmatpush3.bf16.msra.mxu1 %v7189_v26 }
 0xad4   :  { %5778 = vmatprep.subr.bf16.mxu0 %v7155_v54  ;;  %5804 = vmatprep.subr.bf16.mxu1 %v6464_v40 }
 0xad7   :  { %5780 = vmatpush1.bf16.msra.mxu0 %v7157_v58  ;;  %5806 = vmatpush3.bf16.msra.mxu1 %v7193_v45 }
 0xad8   :  { %5782 = vmatprep.subr.bf16.mxu0 %v7161_v52  ;;  %5807 = vmatprep.subr.bf16.mxu1 %v6464_v40 }
 0xadb   :  { %5784 = vmatpush1.bf16.msra.mxu0 %v7163_v29  ;;  %5809 = vmatpush3.bf16.msra.mxu1 %v7197_v61 }
 0xadc   :  { %5786 = vmatprep.subr.bf16.mxu0 %v7170_v11  ;;  %5810 = vmatprep.subr.bf16.mxu1 %v6464_v40 }
 0xadf   :  { %5788 = vmatpush1.bf16.msra.mxu0 %v7173_v14  ;;  %5812 = vmatpush3.bf16.msra.mxu1 %v7201_v13 }
 0xae0   :  { %5814 = vmatprep.subr.bf16.mxu0 %v7125_v57  ;;  %5845 = vmatprep.subr.bf16.mxu1 %v6464_v40 }
 0xb95   :  { %v2632_v16 = vpop.f32.mrb[20].mxu0  ;;  %v2703_v34 = vpop.f32.mrb[36].mxu1 }
 0xb96   :  { %v6121_v41 = vadd.f32 %v2632_v16, %v7282_v10  ;;  %v2634_v60 = vpop.f32.mrb[21].mxu0  ;;  %v4749_v38 = vpop.f32.mrb[37].mxu1  ;;  %v2721_v39 = vadd.f32 %v7293_v3, %v2703_v34 }
 0xb97   :  { %v6122_v51 = vadd.f32 %v2634_v60, %v7286_v23 }
 0xb98   :  { %v3894_v7 = vmul.f32 -1.442695, %v6121_v41 }
 0xb99   :  { %v3895_v31 = vmul.f32 -1.442695, %v6122_v51 }
 0xb9a   :  { %6277 = vpow2.f32 %v3894_v7 }
 0xb9b   :  { %6279 = vpow2.f32 %v3895_v31 }
 0xba4   :  { %v6278_v20 = vpop.eup %6277 }
 0xba5   :  { %v2715_v30 = vadd.f32 1.0, %v6278_v20  ;;  %v6280_v33 = vpop.eup %6279 }
 0xba6   :  { %v2716_v36 = vadd.f32 1.0, %v6280_v33  ;;  %v2124_v33 = vadd.f32 %v7216_v19, %v7297_v6 }
 0xba7   :  { %6281 = vrcp.f32 %v2715_v30 }
 0xba8   :  { %6283 = vrcp.f32 %v2716_v36 }
 0xbb1   :  { %v6282_v48 = vpop.eup %6281 }
 0xbb2   :  { %v2722_v53 = vmul.f32 %v6282_v48, %v2721_v39  ;;  %v6284_v44 = vpop.eup %6283 }
 0xbb3   :  { %v2725_v1 = vsub.f32 1.0, %v6284_v44  ;;  %v2727_v9 = vmul.f32 %v6284_v44, %v7348_v18 }
 0xbb4   :  { %v2723_v59 = vadd.f32 %v2722_v53, %v2119_v49 }
 0xbb6   :  { %6285 = vtanh.f32 %v2723_v59 }
 0xbc0   :  { %v6286_v47 = vpop.eup %6285 }
 0xbc1   :  { %v2726_v63 = vmul.f32 %v6286_v47, %v2725_v1 }
 0xbc3   :  { %v7393_v5 = vadd.f32 %v2727_v9, %v2726_v63 }
 0xbc5   :  { %2799 = vmatmul.mubr.f32.vlgmr.msra.gmra.mrb[22].mxu0 %v7393_v5  ;;  %4783 = vmatmul.mubr.f32.vlgmr.msra.gmra.mrb[38].mxu1 %v7393_v5 }
 0xbc6   :  { %5816 = vmatpush1.bf16.msra.mxu0 %v7127_v27  ;;  %5847 = vmatpush3.bf16.msra.mxu1 %v7165_v42 }
 0xbc7   :  { %5818 = vmatprep.subr.bf16.mxu0 %v7131_v28  ;;  %5848 = vmatprep.subr.bf16.mxu1 %v6464_v40 }
 0xbc8   :  { %2966 = vmatprep.mubr.f32.mxu0 %v6463_v0  ;;  %4817 = vmatprep.mubr.msk.f32.mxu1 %vm6465_vm0, %v6463_v0 }
 0xbca   :  { %5820 = vmatpush1.bf16.msra.mxu0 %v7133_v25  ;;  %5850 = vmatpush3.bf16.msra.mxu1 %v7176_v21 }
 0xbcb   :  { %5822 = vmatprep.subr.bf16.mxu0 %v7137_v35  ;;  %5851 = vmatprep.subr.bf16.mxu1 %v6464_v40 }
 0xbce   :  { %5824 = vmatpush1.bf16.msra.mxu0 %v7139_v46  ;;  %5853 = vmatpush3.bf16.msra.mxu1 %v7182_v50 }
 0xbcf   :  { %5826 = vmatprep.subr.bf16.mxu0 %v7143_v56  ;;  %5854 = vmatprep.subr.bf16.mxu1 %v6464_v40 }
 0xbd2   :  { %5828 = vmatpush1.bf16.msra.mxu0 %v7145_v4  ;;  %5856 = vmatpush3.bf16.msra.mxu1 %v7185_v32 }
 0xbd3   :  { %5830 = vmatprep.subr.bf16.mxu0 %v7149_v15  ;;  %5857 = vmatprep.subr.bf16.mxu1 %v6464_v40 }
 0xbd6   :  { %5832 = vmatpush1.bf16.msra.mxu0 %v7151_v24  ;;  %5859 = vmatpush3.bf16.msra.mxu1 %v7189_v26 }
 0xbd7   :  { %5834 = vmatprep.subr.bf16.mxu0 %v7155_v54  ;;  %5860 = vmatprep.subr.bf16.mxu1 %v6464_v40 }
 0xbda   :  { %5836 = vmatpush1.bf16.msra.mxu0 %v7157_v58  ;;  %5862 = vmatpush3.bf16.msra.mxu1 %v7193_v45 }
 0xbdb   :  { %5838 = vmatprep.subr.bf16.mxu0 %v7161_v52  ;;  %5863 = vmatprep.subr.bf16.mxu1 %v6464_v40 }
 0xbde   :  { %5840 = vmatpush1.bf16.msra.mxu0 %v7163_v29  ;;  %5865 = vmatpush3.bf16.msra.mxu1 %v7197_v61 }
 0xbdf   :  { %5842 = vmatprep.subr.bf16.mxu0 %v7170_v11  ;;  %5866 = vmatprep.subr.bf16.mxu1 %v6464_v40 }
 0xbe2   :  { %5844 = vmatpush1.bf16.msra.mxu0 %v7173_v14  ;;  %5868 = vmatpush3.bf16.msra.mxu1 %v7201_v13 }
 0xbe3   :  { %5870 = vmatprep.subr.bf16.mxu0 %v7125_v57  ;;  %5901 = vmatprep.subr.bf16.mxu1 %v6464_v40 }
 0xc98   :  { %v2800_v8 = vpop.f32.mrb[22].mxu0  ;;  %v2871_v12 = vpop.f32.mrb[38].mxu1 }
 0xc99   :  { %v6123_v62 = vadd.f32 %v2800_v8, %v7282_v10  ;;  %v2802_v17 = vpop.f32.mrb[23].mxu0  ;;  %v4784_v16 = vpop.f32.mrb[39].mxu1  ;;  %v2889_v20 = vadd.f32 %v7293_v3, %v2871_v12 }
 0xc9a   :  { %v6124_v41 = vadd.f32 %v2802_v17, %v7286_v23 }
 0xc9b   :  { %v3896_v34 = vmul.f32 -1.442695, %v6123_v62 }
 0xc9c   :  { %v3897_v60 = vmul.f32 -1.442695, %v6124_v41 }
 0xc9d   :  { %6287 = vpow2.f32 %v3896_v34 }
 0xc9e   :  { %6289 = vpow2.f32 %v3897_v60 }
 0xca7   :  { %v6288_v38 = vpop.eup %6287 }
 0xca8   :  { %v2883_v7 = vadd.f32 1.0, %v6288_v38  ;;  %v6290_v51 = vpop.eup %6289 }
 0xca9   :  { %v2884_v31 = vadd.f32 1.0, %v6290_v51  ;;  %v2129_v51 = vadd.f32 %v7222_v43, %v7297_v6 }
 0xcaa   :  { %6291 = vrcp.f32 %v2883_v7 }
 0xcab   :  { %6293 = vrcp.f32 %v2884_v31 }
 0xcb4   :  { %v6292_v30 = vpop.eup %6291 }
 0xcb5   :  { %v2890_v36 = vmul.f32 %v6292_v30, %v2889_v20  ;;  %v6294_v48 = vpop.eup %6293 }
 0xcb6   :  { %v2893_v49 = vsub.f32 1.0, %v6294_v48  ;;  %v2895_v44 = vmul.f32 %v6294_v48, %v7393_v5 }
 0xcb7   :  { %v2891_v39 = vadd.f32 %v2890_v36, %v2124_v33 }
 0xcb9   :  { %6295 = vtanh.f32 %v2891_v39 }
 0xcc3   :  { %v6296_v53 = vpop.eup %6295 }
 0xcc4   :  { %v2894_v59 = vmul.f32 %v6296_v53, %v2893_v49 }
 0xcc6   :  { %v7438_v1 = vadd.f32 %v2895_v44, %v2894_v59 }
 0xcc8   :  { %2967 = vmatmul.mubr.f32.vlgmr.msra.gmra.mrb[24].mxu0 %v7438_v1  ;;  %4818 = vmatmul.mubr.f32.vlgmr.msra.gmra.mrb[40].mxu1 %v7438_v1 }
 0xcc9   :  { %5872 = vmatpush1.bf16.msra.mxu0 %v7127_v27  ;;  %5903 = vmatpush3.bf16.msra.mxu1 %v7165_v42 }
 0xcca   :  { %5874 = vmatprep.subr.bf16.mxu0 %v7131_v28  ;;  %5904 = vmatprep.subr.bf16.mxu1 %v6464_v40 }
 0xccb   :  { %3134 = vmatprep.mubr.f32.mxu0 %v6463_v0  ;;  %4852 = vmatprep.mubr.msk.f32.mxu1 %vm6465_vm0, %v6463_v0 }
 0xccd   :  { %5876 = vmatpush1.bf16.msra.mxu0 %v7133_v25  ;;  %5906 = vmatpush3.bf16.msra.mxu1 %v7176_v21 }
 0xcce   :  { %5878 = vmatprep.subr.bf16.mxu0 %v7137_v35  ;;  %5907 = vmatprep.subr.bf16.mxu1 %v6464_v40 }
 0xcd1   :  { %5880 = vmatpush1.bf16.msra.mxu0 %v7139_v46  ;;  %5909 = vmatpush3.bf16.msra.mxu1 %v7182_v50 }
 0xcd2   :  { %5882 = vmatprep.subr.bf16.mxu0 %v7143_v56  ;;  %5910 = vmatprep.subr.bf16.mxu1 %v6464_v40 }
 0xcd5   :  { %5884 = vmatpush1.bf16.msra.mxu0 %v7145_v4  ;;  %5912 = vmatpush3.bf16.msra.mxu1 %v7185_v32 }
 0xcd6   :  { %5886 = vmatprep.subr.bf16.mxu0 %v7149_v15  ;;  %5913 = vmatprep.subr.bf16.mxu1 %v6464_v40 }
 0xcd9   :  { %5888 = vmatpush1.bf16.msra.mxu0 %v7151_v24  ;;  %5915 = vmatpush3.bf16.msra.mxu1 %v7189_v26 }
 0xcda   :  { %5890 = vmatprep.subr.bf16.mxu0 %v7155_v54  ;;  %5916 = vmatprep.subr.bf16.mxu1 %v6464_v40 }
 0xcdd   :  { %5892 = vmatpush1.bf16.msra.mxu0 %v7157_v58  ;;  %5918 = vmatpush3.bf16.msra.mxu1 %v7193_v45 }
 0xcde   :  { %5894 = vmatprep.subr.bf16.mxu0 %v7161_v52  ;;  %5919 = vmatprep.subr.bf16.mxu1 %v6464_v40 }
 0xce1   :  { %5896 = vmatpush1.bf16.msra.mxu0 %v7163_v29  ;;  %5921 = vmatpush3.bf16.msra.mxu1 %v7197_v61 }
 0xce2   :  { %5898 = vmatprep.subr.bf16.mxu0 %v7170_v11  ;;  %5922 = vmatprep.subr.bf16.mxu1 %v6464_v40 }
 0xce5   :  { %5900 = vmatpush1.bf16.msra.mxu0 %v7173_v14  ;;  %5924 = vmatpush3.bf16.msra.mxu1 %v7201_v13 }
 0xce6   :  { %5926 = vmatprep.subr.bf16.mxu0 %v7125_v57  ;;  %5957 = vmatprep.subr.bf16.mxu1 %v6464_v40 }
 0xd9b   :  { %v2968_v19 = vpop.f32.mrb[24].mxu0  ;;  %v3039_v47 = vpop.f32.mrb[40].mxu1 }
 0xd9c   :  { %v6125_v63 = vadd.f32 %v2968_v19, %v7282_v10  ;;  %v2970_v9 = vpop.f32.mrb[25].mxu0  ;;  %v4819_v8 = vpop.f32.mrb[41].mxu1  ;;  %v3057_v38 = vadd.f32 %v7293_v3, %v3039_v47 }
 0xd9d   :  { %v6126_v62 = vadd.f32 %v2970_v9, %v7286_v23 }
 0xd9e   :  { %v3898_v12 = vmul.f32 -1.442695, %v6125_v63 }
 0xd9f   :  { %v3899_v17 = vmul.f32 -1.442695, %v6126_v62 }
 0xda0   :  { %6297 = vpow2.f32 %v3898_v12 }
 0xda1   :  { %6299 = vpow2.f32 %v3899_v17 }
 0xdaa   :  { %v6298_v16 = vpop.eup %6297 }
 0xdab   :  { %v3051_v34 = vadd.f32 1.0, %v6298_v16  ;;  %v6300_v41 = vpop.eup %6299 }
 0xdac   :  { %v3052_v60 = vadd.f32 1.0, %v6300_v41 }
 0xdad   :  { %6301 = vrcp.f32 %v3051_v34  ;;  %v2134_v34 = vadd.f32 %v7220_v22, %v7297_v6 }
 0xdae   :  { %6303 = vrcp.f32 %v3052_v60 }
 0xdb7   :  { %v6302_v7 = vpop.eup %6301 }
 0xdb8   :  { %v3058_v31 = vmul.f32 %v6302_v7, %v3057_v38  ;;  %v6304_v30 = vpop.eup %6303 }
 0xdb9   :  { %v3061_v33 = vsub.f32 1.0, %v6304_v30  ;;  %v3063_v48 = vmul.f32 %v6304_v30, %v7438_v1 }
 0xdba   :  { %v3059_v20 = vadd.f32 %v3058_v31, %v2129_v51 }
 0xdbc   :  { %6305 = vtanh.f32 %v3059_v20 }
 0xdc6   :  { %v6306_v36 = vpop.eup %6305 }
 0xdc7   :  { %v3062_v39 = vmul.f32 %v6306_v36, %v3061_v33 }
 0xdc9   :  { %v7483_v49 = vadd.f32 %v3063_v48, %v3062_v39  ;;  %v3585_v39 = vld [vmem:[%s7679_s10 + $0x20] sm:$0xff]  ;;  %v3586_v48 = vld [vmem:[%s7679_s10 + $0x28] sm:$0xff] }
 0xdcb   :  { %3135 = vmatmul.mubr.f32.vlgmr.msra.gmra.mrb[26].mxu0 %v7483_v49  ;;  %4853 = vmatmul.mubr.f32.vlgmr.msra.gmra.mrb[42].mxu1 %v7483_v49 }
 0xdcc   :  { %5928 = vmatpush1.bf16.msra.mxu0 %v7127_v27  ;;  %5959 = vmatpush3.bf16.msra.mxu1 %v7165_v42 }
 0xdcd   :  { %5930 = vmatprep.subr.bf16.mxu0 %v7131_v28  ;;  %5960 = vmatprep.subr.bf16.mxu1 %v6464_v40 }
 0xdce   :  { %3302 = vmatprep.mubr.f32.mxu0 %v6463_v0  ;;  %4887 = vmatprep.mubr.msk.f32.mxu1 %vm6465_vm0, %v6463_v0 }
 0xdd0   :  { %5932 = vmatpush1.bf16.msra.mxu0 %v7133_v25  ;;  %5962 = vmatpush3.bf16.msra.mxu1 %v7176_v21 }
 0xdd1   :  { %5934 = vmatprep.subr.bf16.mxu0 %v7137_v35  ;;  %5963 = vmatprep.subr.bf16.mxu1 %v6464_v40 }
 0xdd4   :  { %5936 = vmatpush1.bf16.msra.mxu0 %v7139_v46  ;;  %5965 = vmatpush3.bf16.msra.mxu1 %v7182_v50 }
 0xdd5   :  { %5938 = vmatprep.subr.bf16.mxu0 %v7143_v56  ;;  %5966 = vmatprep.subr.bf16.mxu1 %v6464_v40 }
 0xdd8   :  { %5940 = vmatpush1.bf16.msra.mxu0 %v7145_v4  ;;  %5968 = vmatpush3.bf16.msra.mxu1 %v7185_v32 }
 0xdd9   :  { %5942 = vmatprep.subr.bf16.mxu0 %v7149_v15  ;;  %5969 = vmatprep.subr.bf16.mxu1 %v6464_v40 }
 0xddc   :  { %5944 = vmatpush1.bf16.msra.mxu0 %v7151_v24  ;;  %5971 = vmatpush3.bf16.msra.mxu1 %v7189_v26 }
 0xddd   :  { %5946 = vmatprep.subr.bf16.mxu0 %v7155_v54  ;;  %5972 = vmatprep.subr.bf16.mxu1 %v6464_v40 }
 0xde0   :  { %5948 = vmatpush1.bf16.msra.mxu0 %v7157_v58  ;;  %5974 = vmatpush3.bf16.msra.mxu1 %v7193_v45 }
 0xde1   :  { %5950 = vmatprep.subr.bf16.mxu0 %v7161_v52  ;;  %5975 = vmatprep.subr.bf16.mxu1 %v6464_v40 }
 0xde4   :  { %5952 = vmatpush1.bf16.msra.mxu0 %v7163_v29  ;;  %5977 = vmatpush3.bf16.msra.mxu1 %v7197_v61 }
 0xde5   :  { %5954 = vmatprep.subr.bf16.mxu0 %v7170_v11  ;;  %5978 = vmatprep.subr.bf16.mxu1 %v6464_v40 }
 0xde8   :  { %5956 = vmatpush1.bf16.msra.mxu0 %v7173_v14  ;;  %5980 = vmatpush3.bf16.msra.mxu1 %v7201_v13 }
 0xde9   :  { %5982 = vmatprep.subr.bf16.mxu0 %v7125_v57  ;;  %6013 = vmatprep.subr.bf16.mxu1 %v6464_v40 }
 0xe9e   :  { %v3136_v43 = vpop.f32.mrb[26].mxu0  ;;  %v3207_v53 = vpop.f32.mrb[42].mxu1 }
 0xe9f   :  { %v6127_v59 = vadd.f32 %v3136_v43, %v7282_v10  ;;  %v3138_v44 = vpop.f32.mrb[27].mxu0  ;;  %v4854_v19 = vpop.f32.mrb[43].mxu1  ;;  %v3225_v57 = vadd.f32 %v7293_v3, %v3207_v53  ;;  %v6045_v43 = vpack.c.bf16 %v3586_v48, %v3585_v39  ;;  %v3587_v53 = vld [vmem:[%s7679_s10 + $0x30] sm:$0xff] }
 0xea0   :  { %v6128_v63 = vadd.f32 %v3138_v44, %v7286_v23  ;;  %v3589_v19 = vld [vmem:[%s7679_s10 + $0x40] sm:$0xff] }
 0xea1   :  { %v3900_v47 = vmul.f32 -1.442695, %v6127_v59  ;;  %v3588_v59 = vld [vmem:[%s7679_s10 + $0x38] sm:$0xff] }
 0xea2   :  { %v3901_v9 = vmul.f32 -1.442695, %v6128_v63  ;;  %v6049_v44 = vpack.c.bf16 %v3588_v59, %v3587_v53  ;;  %v3591_v63 = vld [vmem:[%s7679_s10 + $0x50] sm:$0xff] }
 0xea3   :  { %6307 = vpow2.f32 %v3900_v47 }
 0xea4   :  { %6309 = vpow2.f32 %v3901_v9  ;;  %v3592_v9 = vld [vmem:[%s7679_s10 + $0x58] sm:$0xff] }
 0xead   :  { %v6308_v8 = vpop.eup %6307 }
 0xeae   :  { %v3219_v12 = vadd.f32 1.0, %v6308_v8  ;;  %v6310_v62 = vpop.eup %6309  ;;  %v6057_v8 = vpack.c.bf16 %v3592_v9, %v3591_v63 }
 0xeaf   :  { %v3220_v17 = vadd.f32 1.0, %v6310_v62  ;;  %v3594_v62 = vld [vmem:[%s7679_s10 + $0x68] sm:$0xff] }
 0xeb0   :  { %6311 = vrcp.f32 %v3219_v12  ;;  %v3593_v12 = vld [vmem:[%s7679_s10 + $0x60] sm:$0xff] }
 0xeb1   :  { %6313 = vrcp.f32 %v3220_v17  ;;  %v6061_v17 = vpack.c.bf16 %v3594_v62, %v3593_v12 }
 0xeba   :  { %v6312_v16 = vpop.eup %6311 }
 0xebb   :  { %v3226_v41 = vmul.f32 %v6312_v16, %v3225_v57  ;;  %v6314_v38 = vpop.eup %6313  ;;  %v3595_v57 = vld [vmem:[%s7679_s10 + $0x70] sm:$0xff]  ;;  %v3596_v16 = vld [vmem:[%s7679_s10 + $0x78] sm:$0xff] }
 0xebc   :  { %v3229_v7 = vsub.f32 1.0, %v6314_v38  ;;  %v3231_v20 = vmul.f32 %v6314_v38, %v7483_v49 }
 0xebd   :  { %v3227_v60 = vadd.f32 %v3226_v41, %v2134_v34  ;;  %v6065_v34 = vpack.c.bf16 %v3596_v16, %v3595_v57  ;;  %v3717_v41 = vld [vmem:[#allocation12] sm:$0xff] }
 0xebf   :  { %6315 = vtanh.f32 %v3227_v60  ;;  %v3718_v60 = vld [vmem:[#allocation12 + $0x8] sm:$0xff] }
 0xec0   :  { %v6069_v38 = vpack.c.bf16 %v3718_v60, %v3717_v41 }
 0xec9   :  { %v6316_v51 = vpop.eup %6315 }
 0xeca   :  { %v3230_v31 = vmul.f32 %v6316_v51, %v3229_v7  ;;  %v3719_v7 = vld [vmem:[#allocation12 + $0x10] sm:$0xff]  ;;  %v3720_v51 = vld [vmem:[#allocation12 + $0x18] sm:$0xff] }
 0xecc   :  { %v7528_v30 = vadd.f32 %v3231_v20, %v3230_v31  ;;  %v6073_v31 = vpack.c.bf16 %v3720_v51, %v3719_v7  ;;  %v3908_v7 = vld [vmem:[%s7682_s13] ss:$0 sm:$0xff] }
 0xece   :  { %3303 = vmatmul.mubr.f32.vlgmr.msra.gmra.mrb[28].mxu0 %v7528_v30  ;;  %4888 = vmatmul.mubr.f32.vlgmr.msra.gmra.mrb[44].mxu1 %v7528_v30 }
 0xecf   :  { %5984 = vmatpush1.bf16.msra.mxu0 %v7127_v27  ;;  %6015 = vmatpush3.bf16.msra.mxu1 %v7165_v42  ;;  %v3582_v27 = vld [vmem:[%s7679_s10 + $0x8] sm:$0xff] }
 0xed0   :  { %5986 = vmatprep.subr.bf16.mxu0 %v7131_v28  ;;  %6016 = vmatprep.subr.bf16.mxu1 %v6464_v40 }
 0xed1   :  { %3470 = vmatprep.mubr.f32.mxu0 %v6463_v0  ;;  %4922 = vmatprep.mubr.msk.f32.mxu1 %vm6465_vm0, %v6463_v0  ;;  %v3581_v0 = vld [vmem:[%s7679_s10] sm:$0xff] }
 0xed2   :  { %v6037_v28 = vpack.c.bf16 %v3582_v27, %v3581_v0  ;;  %v3725_v0 = vld [vmem:[#allocation12 + $0x40] sm:$0xff]  ;;  %v3726_v27 = vld [vmem:[#allocation12 + $0x48] sm:$0xff] }
 0xed3   :  { %5988 = vmatpush1.bf16.msra.mxu0 %v7133_v25  ;;  %6018 = vmatpush3.bf16.msra.mxu1 %v7176_v21 }
 0xed4   :  { %5990 = vmatprep.subr.bf16.mxu0 %v7137_v35  ;;  %6019 = vmatprep.subr.bf16.mxu1 %v6464_v40 }
 0xed7   :  { %5992 = vmatpush1.bf16.msra.mxu0 %v7139_v46  ;;  %6021 = vmatpush3.bf16.msra.mxu1 %v7182_v50 }
 0xed8   :  { %5994 = vmatprep.subr.bf16.mxu0 %v7143_v56  ;;  %6022 = vmatprep.subr.bf16.mxu1 %v6464_v40 }
 0xedb   :  { %5996 = vmatpush1.bf16.msra.mxu0 %v7145_v4  ;;  %6024 = vmatpush3.bf16.msra.mxu1 %v7185_v32 }
 0xedc   :  { %5998 = vmatprep.subr.bf16.mxu0 %v7149_v15  ;;  %6025 = vmatprep.subr.bf16.mxu1 %v6464_v40 }
 0xedf   :  { %6000 = vmatpush1.bf16.msra.mxu0 %v7151_v24  ;;  %6027 = vmatpush3.bf16.msra.mxu1 %v7189_v26 }
 0xee0   :  { %6002 = vmatprep.subr.bf16.mxu0 %v7155_v54  ;;  %6028 = vmatprep.subr.bf16.mxu1 %v6464_v40 }
 0xee3   :  { %6004 = vmatpush1.bf16.msra.mxu0 %v7157_v58  ;;  %6030 = vmatpush3.bf16.msra.mxu1 %v7193_v45 }
 0xee4   :  { %6006 = vmatprep.subr.bf16.mxu0 %v7161_v52  ;;  %6031 = vmatprep.subr.bf16.mxu1 %v6464_v40 }
 0xee7   :  { %6008 = vmatpush1.bf16.msra.mxu0 %v7163_v29  ;;  %6033 = vmatpush3.bf16.msra.mxu1 %v7197_v61  ;;  %v3583_v61 = vld [vmem:[%s7679_s10 + $0x10] sm:$0xff] }
 0xee8   :  { %6010 = vmatprep.subr.bf16.mxu0 %v7170_v11  ;;  %6034 = vmatprep.subr.bf16.mxu1 %v6464_v40 }
 0xeeb   :  { %6012 = vmatpush1.bf16.msra.mxu0 %v7173_v14  ;;  %6036 = vmatpush3.bf16.msra.mxu1 %v7201_v13  ;;  %v2139_v14 = vadd.f32 %v7278_v2, %v7297_v6  ;;  %v3584_v13 = vld [vmem:[%s7679_s10 + $0x18] sm:$0xff] }
 0xeec   :  { %6038 = vmatprep.subr.bf16.mxu0 %v6037_v28  ;;  %v6041_v2 = vpack.c.bf16 %v3584_v13, %v3583_v61  ;;  %6070 = vmatprep.subr.bf16.mxu1 %v6069_v38 }
 0xfa1   :  { %v3304_v25 = vpop.f32.mrb[28].mxu0  ;;  %v3375_v35 = vpop.f32.mrb[44].mxu1 }
 0xfa2   :  { %v6129_v46 = vadd.f32 %v3304_v25, %v7282_v10  ;;  %v3306_v56 = vpop.f32.mrb[29].mxu0  ;;  %v4889_v40 = vpop.f32.mrb[45].mxu1  ;;  %v3393_v42 = vadd.f32 %v7293_v3, %v3375_v35  ;;  %v3727_v25 = vld [vmem:[#allocation12 + $0x50] sm:$0xff]  ;;  %v3728_v35 = vld [vmem:[#allocation12 + $0x58] sm:$0xff] }
 0xfa3   :  { %v6130_v15 = vadd.f32 %v3306_v56, %v7286_v23  ;;  %v3729_v56 = vld [vmem:[#allocation12 + $0x60] sm:$0xff]  ;;  %v3730_v40 = vld [vmem:[#allocation12 + $0x68] sm:$0xff] }
 0xfa4   :  { %v3902_v4 = vmul.f32 -1.442695, %v6129_v46  ;;  %v6089_v46 = vpack.c.bf16 %v3728_v35, %v3727_v25 }
 0xfa5   :  { %v3903_v24 = vmul.f32 -1.442695, %v6130_v15  ;;  %v3731_v15 = vld [vmem:[#allocation12 + $0x70] sm:$0xff] }
 0xfa6   :  { %6317 = vpow2.f32 %v3902_v4  ;;  %v6093_v4 = vpack.c.bf16 %v3730_v40, %v3729_v56 }
 0xfa7   :  { %6319 = vpow2.f32 %v3903_v24  ;;  %v3732_v24 = vld [vmem:[#allocation12 + $0x78] sm:$0xff] }
 0xfb0   :  { %v6318_v54 = vpop.eup %6317 }
 0xfb1   :  { %v3387_v58 = vadd.f32 1.0, %v6318_v54  ;;  %v6320_v52 = vpop.eup %6319  ;;  %v6097_v54 = vpack.c.bf16 %v3732_v24, %v3731_v15 }
 0xfb2   :  { %v3388_v29 = vadd.f32 1.0, %v6320_v52 }
 0xfb3   :  { %6321 = vrcp.f32 %v3387_v58 }
 0xfb4   :  { %6323 = vrcp.f32 %v3388_v29 }
 0xfbd   :  { %v6322_v11 = vpop.eup %6321 }
 0xfbe   :  { %v3394_v21 = vmul.f32 %v6322_v11, %v3393_v42  ;;  %v6324_v32 = vpop.eup %6323 }
 0xfbf   :  { %v3397_v26 = vsub.f32 1.0, %v6324_v32  ;;  %v3399_v33 = vmul.f32 %v6324_v32, %v7528_v30 }
 0xfc0   :  { %v3395_v50 = vadd.f32 %v3394_v21, %v2139_v14 }
 0xfc2   :  { %6325 = vtanh.f32 %v3395_v50 }
 0xfcc   :  { %v6326_v45 = vpop.eup %6325 }
 0xfcd   :  { %v3398_v22 = vmul.f32 %v6326_v45, %v3397_v26 }
 0xfcf   :  { %v7583_v36 = vadd.f32 %v3399_v33, %v3398_v22  ;;  %v2144_v33 = vadd.f32 %v7276_v55, %v7297_v6 }
 0xfd1   :  { %3471 = vmatmul.mubr.f32.vlgmr.msra.gmra.mrb[30].mxu0 %v7583_v36  ;;  %4923 = vmatmul.mubr.f32.vlgmr.msra.gmra.mrb[46].mxu1 %v7583_v36 }
 0xfd2   :  { %6040 = vmatpush3.bf16.msra.mxu0 %v6037_v28  ;;  %4957 = vmatprep.mubr.f32.mxu0 %v7303_v37  ;;  %v3590_v37 = vld [vmem:[%s7679_s10 + $0x48] sm:$0xff]  ;;  %v6085_v28 = vpack.c.bf16 %v3726_v27, %v3725_v0 }
 0xfd3   :  { %6042 = vmatprep.subr.bf16.mxu0 %v6041_v2  ;;  %v6053_v47 = vpack.c.bf16 %v3590_v37, %v3589_v19  ;;  %6072 = vmatpush3.bf16.msra.mxu1 %v6069_v38 }
 0xfd4   :  { %6074 = vmatprep.subr.bf16.mxu1 %v6073_v31 }
 0xfd6   :  { %6044 = vmatpush3.bf16.msra.mxu0 %v6041_v2 }
 0xfd7   :  { %6046 = vmatprep.subr.bf16.mxu0 %v6045_v43  ;;  %6076 = vmatpush3.bf16.msra.mxu1 %v6073_v31 }
 0xfda   :  { %6048 = vmatpush3.bf16.msra.mxu0 %v6045_v43 }
 0xfdb   :  { %6050 = vmatprep.subr.bf16.mxu0 %v6049_v44 }
 0xfde   :  { %6052 = vmatpush3.bf16.msra.mxu0 %v6049_v44 }
 0xfdf   :  { %6054 = vmatprep.subr.bf16.mxu0 %v6053_v47 }
 0xfe2   :  { %6056 = vmatpush3.bf16.msra.mxu0 %v6053_v47 }
 0xfe3   :  { %6058 = vmatprep.subr.bf16.mxu0 %v6057_v8 }
 0xfe6   :  { %6060 = vmatpush3.bf16.msra.mxu0 %v6057_v8 }
 0xfe7   :  { %6062 = vmatprep.subr.bf16.mxu0 %v6061_v17 }
 0xfea   :  { %6064 = vmatpush3.bf16.msra.mxu0 %v6061_v17 }
 0xfeb   :  { %6066 = vmatprep.subr.bf16.mxu0 %v6065_v34 }
 0xfee   :  { %6068 = vmatpush3.bf16.msra.mxu0 %v6065_v34 }
 0xff1   :  { %4958 = vmatmul.mubr.f32.vlgmr.msra.gmra.mrb[32].mxu0 %v7348_v18  ;;  %v3721_v18 = vld [vmem:[#allocation12 + $0x20] sm:$0xff] }
 0xff2   :  { %4960 = vmatprep.mubr.f32.mxu0 %v7393_v5  ;;  %v3722_v5 = vld [vmem:[#allocation12 + $0x28] sm:$0xff] }
 0xff3   :  { %v6077_v20 = vpack.c.bf16 %v3722_v5, %v3721_v18 }
 0xff5   :  { %4961 = vmatmul.mubr.f32.gmra.mrb[34].mxu0 %v7438_v1  ;;  %6078 = vmatprep.subr.bf16.mxu1 %v6077_v20  ;;  %v3723_v1 = vld [vmem:[#allocation12 + $0x30] sm:$0xff] }
 0xff6   :  { %4963 = vmatprep.mubr.f32.mxu0 %v7483_v49  ;;  %6080 = vmatpush3.bf16.msra.mxu1 %v6077_v20  ;;  %v3724_v49 = vld [vmem:[#allocation12 + $0x38] sm:$0xff] }
 0xff9   :  { %4964 = vmatmul.mubr.f32.gmra.mrb[36].mxu0 %v7528_v30  ;;  %v6081_v30 = vpack.c.bf16 %v3724_v49, %v3723_v1 }
 0xffa   :  { %4966 = vmatprep.mubr.f32.mxu0 %v7583_v36 }
 0xffb   :  { %6082 = vmatprep.subr.bf16.mxu1 %v6081_v30 }
 0xffc   :  { %6084 = vmatpush3.bf16.msra.mxu1 %v6081_v30 }
 0xffd   :  { %6086 = vmatprep.subr.bf16.mxu1 %v6085_v28 }
0x1000   :  { %6088 = vmatpush3.bf16.msra.mxu1 %v6085_v28 }
0x1001   :  { %6090 = vmatprep.subr.bf16.mxu1 %v6089_v46 }
0x1004   :  { %6092 = vmatpush3.bf16.msra.mxu1 %v6089_v46 }
0x1005   :  { %6094 = vmatprep.subr.bf16.mxu1 %v6093_v4 }
0x1008   :  { %6096 = vmatpush3.bf16.msra.mxu1 %v6093_v4 }
0x1009   :  { %6098 = vmatprep.subr.bf16.mxu1 %v6097_v54 }
0x100c   :  { %6100 = vmatpush3.bf16.msra.mxu1 %v6097_v54 }
0x10a4   :  { %v3472_v58 = vpop.f32.mrb[30].mxu0  ;;  %v3543_v52 = vpop.f32.mrb[46].mxu1 }
0x10a5   :  { %v6131_v29 = vadd.f32 %v3472_v58, %v7282_v10  ;;  %v3474_v42 = vpop.f32.mrb[31].mxu0  ;;  %v4924_v11 = vpop.f32.mrb[47].mxu1  ;;  %v3561_v13 = vadd.f32 %v7293_v3, %v3543_v52 }
0x10a6   :  { %v6132_v21 = vadd.f32 %v3474_v42, %v7286_v23  ;;  %v3907_v23 = vld [vmem:[%s7680_s11] ss:$0 sm:$0xff] }
0x10a7   :  { %v3904_v14 = vmul.f32 -1.442695, %v6131_v29 }
0x10a8   :  { %v3905_v50 = vmul.f32 -1.442695, %v6132_v21 }
0x10a9   :  { %6327 = vpow2.f32 %v3904_v14 }
0x10aa   :  { %6329 = vpow2.f32 %v3905_v50 }
0x10b3   :  { %v6328_v32 = vpop.eup %6327 }
0x10b4   :  { %v3555_v26 = vadd.f32 1.0, %v6328_v32  ;;  %v6330_v45 = vpop.eup %6329 }
0x10b5   :  { %v3556_v61 = vadd.f32 1.0, %v6330_v45 }
0x10b6   :  { %6331 = vrcp.f32 %v3555_v26 }
0x10b7   :  { %6333 = vrcp.f32 %v3556_v61 }
0x10c0   :  { %v6332_v22 = vpop.eup %6331 }
0x10c1   :  { %v3562_v10 = vmul.f32 %v6332_v22, %v3561_v13  ;;  %v6334_v55 = vpop.eup %6333 }
0x10c2   :  { %v3565_v17 = vsub.f32 1.0, %v6334_v55  ;;  %v3567_v41 = vmul.f32 %v6334_v55, %v7583_v36 }
0x10c3   :  { %v3563_v2 = vadd.f32 %v3562_v10, %v2144_v33 }
0x10c4   :  { %v4959_v39 = vpop.f32.mrb[32].mxu0 }
0x10c5   :  { %6335 = vtanh.f32 %v3563_v2  ;;  %v3676_v48 = vadd.f32 %v4959_v39, %v3907_v23  ;;  %v3670_v43 = vpop.f32.mrb[33].mxu0 }
0x10c6   :  { %v3671_v53 = vadd.f32 %v3907_v23, %v3670_v43 }
0x10c7   :  { %v3710_v19 = vmax.f32 %v3676_v48, 0.0 }
0x10c8   :  { %v3709_v59 = vmax.f32 %v3671_v53, 0.0  ;;  %v4962_v44 = vpop.f32.mrb[34].mxu0 }
0x10c9   :  { %v3686_v3 = vadd.f32 %v4962_v44, %v3907_v23  ;;  %v3680_v37 = vpop.f32.mrb[35].mxu0 }
0x10ca   :  { %v3681_v47 = vadd.f32 %v3907_v23, %v3680_v37  ;;  %5001 = vmatprep.mubr.f32.mxu1 %v3709_v59 }
0x10cb   :  { %5002 = vmatmul.mubr.f32.vlgmr.msra.gmra.mrb[48].mxu1 %v3710_v19  ;;  %v3712_v9 = vmax.f32 %v3686_v3, 0.0 }
0x10cc   :  { %v3711_v6 = vmax.f32 %v3681_v47, 0.0  ;;  %v4965_v63 = vpop.f32.mrb[36].mxu0 }
0x10cd   :  { %v3696_v8 = vadd.f32 %v4965_v63, %v3907_v23  ;;  %v3690_v12 = vpop.f32.mrb[37].mxu0 }
0x10ce   :  { %v3691_v62 = vadd.f32 %v3907_v23, %v3690_v12  ;;  %5004 = vmatprep.mubr.f32.mxu1 %v3711_v6 }
0x10cf   :  { %v6336_v57 = vpop.eup %6335  ;;  %5005 = vmatmul.mubr.f32.gmra.mrb[50].mxu1 %v3712_v9  ;;  %v3714_v60 = vmax.f32 %v3696_v8, 0.0 }
0x10d0   :  { %v3713_v16 = vmax.f32 %v3691_v62, 0.0  ;;  %v3566_v34 = vmul.f32 %v6336_v57, %v3565_v17 }
0x10d2   :  { %5007 = vmatprep.mubr.f32.mxu1 %v3713_v16  ;;  %v3568_v38 = vadd.f32 %v3567_v41, %v3566_v34 }
0x10d3   :  { %5008 = vmatmul.mubr.f32.gmra.mrb[52].mxu1 %v3714_v60 }
0x10d4   :  { %3906 = vst [vmem:[%s7684_s15 + $0x8] sm:$0xff] %v3568_v38  ;;  %4967 = vmatmul.mubr.f32.gmra.mrb[38].mxu0 %v3568_v38 }
0x119e   :  { %v5003_v51 = vpop.f32.mrb[48].mxu1 }
0x119f   :  { %v3812_v31 = vadd.f32 %v5003_v51, %v3908_v7  ;;  %v3806_v18 = vpop.f32.mrb[49].mxu1 }
0x11a0   :  { %v3807_v5 = vadd.f32 %v3908_v7, %v3806_v18 }
0x11a1   :  { %3846 = vst [vmem:[%s7683_s14 + $0x8] sm:$0xff] %v3812_v31 }
0x11a2   :  { %3845 = vst [vmem:[%s7683_s14] sm:$0xff] %v3807_v5  ;;  %v5006_v36 = vpop.f32.mrb[50].mxu1 }
0x11a3   :  { %v3822_v20 = vadd.f32 %v5006_v36, %v3908_v7  ;;  %v3816_v1 = vpop.f32.mrb[51].mxu1 }
0x11a4   :  { %v3817_v49 = vadd.f32 %v3908_v7, %v3816_v1 }
0x11a5   :  { %3848 = vst [vmem:[%s7683_s14 + $0x18] sm:$0xff] %v3822_v20 }
0x11a6   :  { %3847 = vst [vmem:[%s7683_s14 + $0x10] sm:$0xff] %v3817_v49  ;;  %v5009_v30 = vpop.f32.mrb[52].mxu1 }
0x11a7   :  { %v3832_v0 = vadd.f32 %v5009_v30, %v3908_v7  ;;  %v3826_v27 = vpop.f32.mrb[53].mxu1  ;;  %v4968_v28 = vpop.f32.mrb[38].mxu0 }
0x11a8   :  { %v3827_v25 = vadd.f32 %v3908_v7, %v3826_v27  ;;  %v3706_v35 = vadd.f32 %v4968_v28, %v3907_v23  ;;  %v3700_v46 = vpop.f32.mrb[39].mxu0 }
0x11a9   :  { %3850 = vst [vmem:[%s7683_s14 + $0x28] sm:$0xff] %v3832_v0  ;;  %v3701_v56 = vadd.f32 %v3907_v23, %v3700_v46 }
0x11aa   :  { %3849 = vst [vmem:[%s7683_s14 + $0x20] sm:$0xff] %v3827_v25  ;;  %v3716_v4 = vmax.f32 %v3706_v35, 0.0 }
0x11ab   :  { %v3715_v40 = vmax.f32 %v3701_v56, 0.0 }
0x11ad   :  { %5010 = vmatprep.mubr.f32.mxu1 %v3715_v40 }
0x11ae   :  { %5011 = vmatmul.mubr.f32.gmra.mrb[54].mxu1 %v3716_v4 }
0x1281   :  { %v5012_v15 = vpop.f32.mrb[54].mxu1 }
0x1282   :  { %v3842_v24 = vadd.f32 %v5012_v15, %v3908_v7  ;;  %v3836_v54 = vpop.f32.mrb[55].mxu1 }
0x1283   :  { %v3837_v58 = vadd.f32 %v3908_v7, %v3836_v54 }
0x1284   :  { %3852 = vst [vmem:[%s7683_s14 + $0x38] sm:$0xff] %v3842_v24 }
0x1285   :  { %3851 = vst [vmem:[%s7683_s14 + $0x30] sm:$0xff] %v3837_v58 }
0x1286   :  { %3861 = vsyncpa [#allocation6], 1 }
0x1287   :  { %3862 = vsyncpa [#allocation8], 1 }
0x1288   :  { %3863 = vsyncpa [#allocation11], 1 }

</bundles_post_ra>
